<compile_context>
chip_gen: v7x
topology: tpu7x:2x2x1
jax: 0.10.0
libtpu: 0.0.40
codegen_flags: <defaults>
</compile_context>

<pallas_src>
import functools

import jax
import jax.numpy as jnp
from jax import lax
from jax.experimental import pallas as pl
from jax.experimental.pallas import tpu as pltpu


_STATIC_UNROLL_MAX = 32     # chunks up to this many timesteps are fully unrolled


# --------------------------- fused decoder kernel ----------------------------

def gru_decoder_kernel(seqs_ref, h0_ref, wih_ref, bih_ref, whh_ref, bhh_ref,
                       wout_ref, bout_ref, out_ref, hT_ref,
                       h_scratch, hbuf, *gi_refs,
                       t_real, t_total, fuse_gates, unroll):
    """One (batch-block, time-chunk) grid step of the SeqDecoder forward."""
    c = pl.program_id(1)                       # time-chunk index (sequential)
    bb, tc, hd = hbuf.shape                    # (Bb, Tc, H)
    out_dim = out_ref.shape[-1]

    # Initialise the carried hidden state at the first chunk of this batch block.
    @pl.when(c == 0)
    def _():
        h_scratch[...] = h0_ref[...].astype(jnp.float32)

    # --- (1) input-side gate projections for the whole chunk (off the serial
    #         per-timestep chain; one batched MXU matmul, result kept in VMEM) --
    x = seqs_ref[...].astype(jnp.bfloat16).reshape(bb * tc, hd)      # (Bb*Tc, H)
    if fuse_gates:                  # H % 128 == 0: gates concatenated along lanes
        gi_refs[0][...] = (
            jnp.dot(x, wih_ref[...], preferred_element_type=jnp.float32)
            + bih_ref[...]).reshape(bb, tc, 3 * hd)
        w_hh = whh_ref[...]                          # (H, 3H) bf16, resident
        b_hh = bhh_ref[...]                          # (1, 3H) f32
    else:                           # small / lane-unaligned H: gate-split weights
        for g in range(3):
            gi_refs[g][...] = (
                jnp.dot(x, wih_ref[g], preferred_element_type=jnp.float32)
                + bih_ref[g]).reshape(bb, tc, hd)
        w_r, w_z, w_n = whh_ref[0], whh_ref[1], whh_ref[2]   # (H, H) bf16 each
        b_r, b_z, b_n = bhh_ref[0], bhh_ref[1], bhh_ref[2]   # (1, H) f32 each

    # --- (2) sequential GRU recurrence over the chunk -------------------------
    def step(i, h):
        hb = h.astype(jnp.bfloat16)
        if fuse_gates:
            gh = jnp.dot(hb, w_hh, preferred_element_type=jnp.float32) + b_hh
            if isinstance(i, int):
                gi = gi_refs[0][:, i, :]
            else:
                gi = gi_refs[0][:, pl.ds(i, 1), :][:, 0, :]          # (Bb, 3H)
            r = jax.nn.sigmoid(gi[:, :hd] + gh[:, :hd])
            z = jax.nn.sigmoid(gi[:, hd:2 * hd] + gh[:, hd:2 * hd])
            n = jnp.tanh(gi[:, 2 * hd:] + r * gh[:, 2 * hd:])
        else:
            gh_r = jnp.dot(hb, w_r, preferred_element_type=jnp.float32) + b_r
            gh_z = jnp.dot(hb, w_z, preferred_element_type=jnp.float32) + b_z
            gh_n = jnp.dot(hb, w_n, preferred_element_type=jnp.float32) + b_n
            if isinstance(i, int):
                gi_r = gi_refs[0][:, i, :]
                gi_z = gi_refs[1][:, i, :]
                gi_n = gi_refs[2][:, i, :]
            else:
                gi_r = gi_refs[0][:, pl.ds(i, 1), :][:, 0, :]
                gi_z = gi_refs[1][:, pl.ds(i, 1), :][:, 0, :]
                gi_n = gi_refs[2][:, pl.ds(i, 1), :][:, 0, :]
            r = jax.nn.sigmoid(gi_r + gh_r)
            z = jax.nn.sigmoid(gi_z + gh_z)
            n = jnp.tanh(gi_n + r * gh_n)
        h_new = (1.0 - z) * n + z * h
        if t_total != t_real:       # padded timesteps keep the hidden state fixed
            valid = ((c * tc + i) < t_real).astype(h_new.dtype)
            h_new = valid * h_new + (1.0 - valid) * h
        # Keep the chunk's hidden states in VMEM for the fused projection.
        # (v5e note: if the single vst slot binds, switch hbuf to (Tc, Bb, H).)
        if isinstance(i, int):
            hbuf[:, i, :] = h_new
        else:
            hbuf[:, pl.ds(i, 1), :] = h_new[:, None, :]
        return h_new

    h = h_scratch[...]                                       # (Bb, H) f32 carry
    if tc <= _STATIC_UNROLL_MAX:
        for i in range(tc):                                  # static unroll
            h = step(i, h)
    else:
        h = lax.fori_loop(0, tc, step, h, unroll=unroll)     # bounded live ranges
    h_scratch[...] = h                                       # carry to next chunk

    # --- (3) fused character_distribution + log_softmax on the VMEM chunk,
    #         one flattened matmul, written directly in (B, T, OUT) layout ------
    hs = hbuf[...].astype(jnp.bfloat16).reshape(bb * tc, hd)         # (Bb*Tc, H)
    logits = (jnp.dot(hs, wout_ref[...], preferred_element_type=jnp.float32)
              + bout_ref[...])                                       # (Bb*Tc, OUT)
    m = jnp.max(logits, axis=-1, keepdims=True)
    s = logits - m
    lse = jnp.log(jnp.sum(jnp.exp(s), axis=-1, keepdims=True))
    out_ref[...] = (s - lse).reshape(bb, tc, out_dim).astype(out_ref.dtype)

    # Final hidden state: constant-index output block, written only on the last
    # chunk of this batch block; Pallas writes it back to HBM exactly once after
    # the last grid step mapping to it (same pattern as the flash-attn epilogue).
    @pl.when(c == pl.num_programs(1) - 1)
    def _():
        hT_ref[...] = h.astype(hT_ref.dtype)


# ---------------------------------- wrapper ----------------------------------

def _vmem_bytes(Bb, Tc, H, OUT, seq_isize, out_isize):
    """Rough per-core VMEM footprint estimate for one grid step."""
    b = 0
    b += 2 * Bb * Tc * H * seq_isize            # seqs chunk, double-buffered
    b += 2 * Bb * Tc * OUT * out_isize          # output chunk, double-buffered
    b += 4 * Bb * H * 4                         # h0 in + hT out blocks
    w = 2 * (3 * H * H) * 2 + 2 * (3 * H) * 4 + H * OUT * 2 + OUT * 4
    b += 2 * w                                  # weights (assume double-buffered)
    b += Bb * H * 4                             # h_scratch
    b += Bb * Tc * H * 4                        # hbuf
    b += 3 * Bb * Tc * H * 4                    # gi scratch
    return b


def _pick_time_chunk(T, Bb, H, OUT, seq_isize, out_isize,
                     max_chunk=32, vmem_budget=20 * 1024 * 1024):
    """Tc (always a multiple of 8) and the padded total length T_total."""
    def fits(tc):
        return _vmem_bytes(Bb, tc, H, OUT, seq_isize, out_isize) <= vmem_budget

    cap = max(8, min(max_chunk, ((T + 7) // 8) * 8))
    cap = (cap // 8) * 8
    tc = cap
    while tc > 8 and not fits(tc):
        tc -= 8
    # Among multiples of 8 <= tc, minimise total padded length (prefer larger Tc).
    best_tc, best_total = tc, -(-T // tc) * tc
    cand = tc - 8
    while cand >= 8:
        total = -(-T // cand) * cand
        if total < best_total:
            best_tc, best_total = cand, total
        cand -= 8
    return best_tc, best_total


def seq_decoder_forward(params, encs, seqs, *, out_dtype=jnp.float32,
                        max_chunk=32, fori_unroll=8,
                        vmem_budget=20 * 1024 * 1024):
    """SeqDecoder.forward_train / forward_sample semantics.

    encs: (B, H)    initial hidden state (PyTorch: encs.unsqueeze(0) -> h0)
    seqs: (B, T, H) batch-first GRU inputs (targets / empties)
    Returns:
      output: (B, T, out_size) log-probabilities ((B, out_size) if T == 1,
              mirroring rnn_output.squeeze(1))
      hidden: (B, H) final hidden state (rnn_hidden.squeeze(0))
    """
    B, T, H = seqs.shape
    OUT = params['w_out'].shape[-1]

    fuse_gates = (H % 128 == 0)          # gate-concat path needs lane-aligned H
    nbb = 2 if B % 16 == 0 else 1        # v7x: shard the recurrence by batch block
    Bb = B // nbb

    seq_isize = jnp.dtype(seqs.dtype).itemsize
    out_isize = jnp.dtype(out_dtype).itemsize
    Tc, T_total = _pick_time_chunk(T, Bb, H, OUT, seq_isize, out_isize,
                                   max_chunk=max_chunk, vmem_budget=vmem_budget)
    n_chunks = T_total // Tc
    if T_total != T:                     # pad time (padded steps masked in-kernel)
        seqs = jnp.pad(seqs, ((0, 0), (0, T_total - T), (0, 0)))

    encs = encs.astype(jnp.float32)
    # bf16 matmul operands (native MXU path, half the weight DMA); f32 biases.
    w_ih = params['w_ih'].astype(jnp.bfloat16)     # (3, H, H)
    w_hh = params['w_hh'].astype(jnp.bfloat16)     # (3, H, H)
    w_out = params['w_out'].astype(jnp.bfloat16)   # (H, OUT)
    b_ih = params['b_ih'].astype(jnp.float32)      # (3, 1, H)
    b_hh = params['b_hh'].astype(jnp.float32)      # (3, 1, H)
    b_out = params['b_out'].astype(jnp.float32)    # (1, OUT)

    if fuse_gates:
        # Concatenate gates along the output dim -> one (H, 3H) matmul per use.
        w_ih_k = jnp.transpose(w_ih, (1, 0, 2)).reshape(H, 3 * H)
        w_hh_k = jnp.transpose(w_hh, (1, 0, 2)).reshape(H, 3 * H)
        b_ih_k = b_ih.reshape(1, 3 * H)
        b_hh_k = b_hh.reshape(1, 3 * H)
        wih_spec = pl.BlockSpec((H, 3 * H), lambda b, c: (0, 0))
        bih_spec = pl.BlockSpec((1, 3 * H), lambda b, c: (0, 0))
        whh_spec = pl.BlockSpec((H, 3 * H), lambda b, c: (0, 0))
        bhh_spec = pl.BlockSpec((1, 3 * H), lambda b, c: (0, 0))
        gi_scratch = [pltpu.VMEM((Bb, Tc, 3 * H), jnp.float32)]
    else:
        w_ih_k, w_hh_k, b_ih_k, b_hh_k = w_ih, w_hh, b_ih, b_hh
        wih_spec = pl.BlockSpec((3, H, H), lambda b, c: (0, 0, 0))
        bih_spec = pl.BlockSpec((3, 1, H), lambda b, c: (0, 0, 0))
        whh_spec = pl.BlockSpec((3, H, H), lambda b, c: (0, 0, 0))
        bhh_spec = pl.BlockSpec((3, 1, H), lambda b, c: (0, 0, 0))
        gi_scratch = [pltpu.VMEM((Bb, Tc, H), jnp.float32) for _ in range(3)]

    est = _vmem_bytes(Bb, Tc, H, OUT, seq_isize, out_isize)
    vmem_limit = int(min(48 * 1024 * 1024, max(32 * 1024 * 1024, 2 * est)))

    kernel = functools.partial(
        gru_decoder_kernel, t_real=T, t_total=T_total,
        fuse_gates=fuse_gates, unroll=max(1, min(fori_unroll, Tc)))

    out, h_final = pl.pallas_call(
        kernel,
        out_shape=(jax.ShapeDtypeStruct((B, T_total, OUT), out_dtype),
                   jax.ShapeDtypeStruct((B, H), jnp.float32)),
        grid_spec=pltpu.PrefetchScalarGridSpec(
            num_scalar_prefetch=0,
            grid=(nbb, n_chunks),
            in_specs=[
                pl.BlockSpec((Bb, Tc, H), lambda b, c: (b, c, 0)),    # seqs chunk
                pl.BlockSpec((Bb, H), lambda b, c: (b, 0)),           # h0
                wih_spec, bih_spec, whh_spec, bhh_spec,               # GRU weights
                pl.BlockSpec((H, OUT), lambda b, c: (0, 0)),          # W_out
                pl.BlockSpec((1, OUT), lambda b, c: (0, 0)),          # b_out
            ],
            out_specs=[
                pl.BlockSpec((Bb, Tc, OUT), lambda b, c: (b, c, 0)),  # log-probs
                pl.BlockSpec((Bb, H), lambda b, c: (b, 0)),           # final hidden
            ],
            scratch_shapes=[pltpu.VMEM((Bb, H), jnp.float32),         # carried h
                            pltpu.VMEM((Bb, Tc, H), jnp.float32)]     # chunk states
                           + gi_scratch,                              # gate pre-acts
        ),
        compiler_params=pltpu.CompilerParams(
            dimension_semantics=("parallel", "arbitrary"),
            vmem_limit_bytes=vmem_limit),
    )(seqs, encs, w_ih_k, b_ih_k, w_hh_k, b_hh_k, w_out, b_out)

    if T_total != T:
        out = out[:, :T]
    if T == 1:
        out = out[:, 0, :]               # mirrors rnn_output.squeeze(1)
    return out, h_final


# --------------------------- pure-JAX references ------------------------------

def reference_forward(params, encs, seqs, *, act_matmul_dtype=jnp.bfloat16):
    """Pure-JAX/XLA reference.

    act_matmul_dtype=bfloat16 mirrors the kernel's mixed-precision policy
    (bf16 matmul operands, f32 accumulation, f32 hidden-state carry).
    act_matmul_dtype=float32 gives the plain f32 GRU+Linear+log_softmax
    semantics of the PyTorch module (same bf16-valued weights).
    """
    B, T, H = seqs.shape
    f32 = jnp.float32
    w_ih = params['w_ih'].astype(jnp.bfloat16).astype(f32)
    w_hh = params['w_hh'].astype(jnp.bfloat16).astype(f32)
    w_out = params['w_out'].astype(jnp.bfloat16).astype(f32)
    b_ih = params['b_ih'].astype(f32)
    b_hh = params['b_hh'].astype(f32)
    b_out = params['b_out'].astype(f32)

    def cast(a):
        return a.astype(act_matmul_dtype).astype(f32)

    x = cast(seqs.astype(f32))                                        # (B, T, H)
    gi = jnp.einsum('bth,ghk->gbtk', x, w_ih) + b_ih[:, None]         # (3, B, T, H)
    gi_tm = jnp.transpose(gi, (2, 0, 1, 3))                           # (T, 3, B, H)

    def step(h, gi_t):
        hb = cast(h)
        gh_r = hb @ w_hh[0] + b_hh[0]
        gh_z = hb @ w_hh[1] + b_hh[1]
        gh_n = hb @ w_hh[2] + b_hh[2]
        r = jax.nn.sigmoid(gi_t[0] + gh_r)
        z = jax.nn.sigmoid(gi_t[1] + gh_z)
        n = jnp.tanh(gi_t[2] + r * gh_n)
        h_new = (1.0 - z) * n + z * h
        return h_new, h_new

    h_final, hs = lax.scan(step, encs.astype(f32), gi_tm)             # hs: (T, B, H)
    logits = jnp.einsum('tbh,hk->tbk', cast(hs), w_out) + b_out[0]
    logp = jax.nn.log_softmax(logits, axis=-1)
    output = jnp.transpose(logp, (1, 0, 2))                           # (B, T, OUT)
    if T == 1:
        output = output[:, 0, :]
    return output, h_final


# ----------------------------------- test -------------------------------------

if __name__ == "__main__":
    def make_params(key, H, OUT):
        ks = jax.random.split(key, 6)
        scale = 1.0 / (H ** 0.5)
        return {
            'w_ih':  jax.random.uniform(ks[0], (3, H, H), jnp.float32, -scale, scale).astype(jnp.bfloat16),
            'w_hh':  jax.random.uniform(ks[1], (3, H, H), jnp.float32, -scale, scale).astype(jnp.bfloat16),
            'b_ih':  jax.random.uniform(ks[2], (3, 1, H), jnp.float32, -scale, scale),
            'b_hh':  jax.random.uniform(ks[3], (3, 1, H), jnp.float32, -scale, scale),
            'w_out': jax.random.uniform(ks[4], (H, OUT), jnp.float32, -scale, scale).astype(jnp.bfloat16),
            'b_out': jax.random.uniform(ks[5], (1, OUT), jnp.float32, -scale, scale),
        }

    root = jax.random.PRNGKey(0)
    kA, kB = jax.random.split(root, 2)

    # ---- Case A: small shapes, gate-split path, f32 output (forward_train) ----
    B, T, H, OUT = 4, 8, 32, 16
    kp, ke, ks_ = jax.random.split(kA, 3)
    params = make_params(kp, H, OUT)
    encs = jax.random.normal(ke, (B, H), jnp.float32)
    seqs = jax.random.normal(ks_, (B, T, H), jnp.float32)

    fwd = jax.jit(functools.partial(seq_decoder_forward, params, out_dtype=jnp.float32))
    out, hid = fwd(encs, seqs)
    jax.block_until_ready((out, hid))
    assert out.shape == (B, T, OUT) and hid.shape == (B, H)

    ref_out, ref_h = reference_forward(params, encs, seqs, act_matmul_dtype=jnp.bfloat16)
    assert jnp.allclose(out, ref_out, atol=2e-3, rtol=2e-3)
    assert jnp.allclose(hid, ref_h, atol=2e-3, rtol=2e-3)
    ref_out32, ref_h32 = reference_forward(params, encs, seqs, act_matmul_dtype=jnp.float32)
    assert jnp.allclose(out, ref_out32, atol=5e-2, rtol=5e-2)
    assert jnp.allclose(hid, ref_h32, atol=5e-2, rtol=5e-2)

    # ---- Case A2: single-step decode (forward_sample squeeze semantics) -------
    seqs1 = seqs[:, :1, :]
    out1, hid1 = fwd(encs, seqs1)
    jax.block_until_ready((out1, hid1))
    assert out1.shape == (B, OUT) and hid1.shape == (B, H)
    ref_out1, ref_h1 = reference_forward(params, encs, seqs1, act_matmul_dtype=jnp.bfloat16)
    assert jnp.allclose(out1, ref_out1, atol=2e-3, rtol=2e-3)
    assert jnp.allclose(hid1, ref_h1, atol=2e-3, rtol=2e-3)

    # ---- Case B: lane-aligned H -> fused gates, batch-split grid, multi-chunk
    #      recurrence with T padding, bf16 output ---------------------------------
    B2, T2, H2, OUT2 = 16, 20, 128, 128
    kp2, ke2, ks2 = jax.random.split(kB, 3)
    params2 = make_params(kp2, H2, OUT2)
    encs2 = jax.random.normal(ke2, (B2, H2), jnp.float32)
    seqs2 = jax.random.normal(ks2, (B2, T2, H2), jnp.float32)

    fwd2 = jax.jit(functools.partial(seq_decoder_forward, params2,
                                     out_dtype=jnp.bfloat16, max_chunk=8))
    out2, hid2 = fwd2(encs2, seqs2)
    jax.block_until_ready((out2, hid2))
    assert out2.shape == (B2, T2, OUT2) and hid2.shape == (B2, H2)

    ref_out2, ref_h2 = reference_forward(params2, encs2, seqs2, act_matmul_dtype=jnp.bfloat16)
    assert jnp.allclose(out2.astype(jnp.float32), ref_out2, atol=5e-2, rtol=5e-2)
    assert jnp.allclose(hid2, ref_h2, atol=1e-2, rtol=1e-2)

    print("KERNEL_OK")
</pallas_src>

<mosaic_0001>
module attributes {stable_mosaic.version = 11 : i64} {
  func.func @gru_decoder_kernel(%arg0: i32, %arg1: i32, %arg2: memref<4x8x32xf32, #tpu.memory_space<vmem>>, %arg3: memref<4x32xf32, #tpu.memory_space<vmem>>, %arg4: memref<3x32x32xbf16, #tpu.memory_space<vmem>>, %arg5: memref<3x1x32xf32, #tpu.memory_space<vmem>>, %arg6: memref<3x32x32xbf16, #tpu.memory_space<vmem>>, %arg7: memref<3x1x32xf32, #tpu.memory_space<vmem>>, %arg8: memref<32x16xbf16, #tpu.memory_space<vmem>>, %arg9: memref<1x16xf32, #tpu.memory_space<vmem>>, %arg10: memref<4x8x16xf32, #tpu.memory_space<vmem>>, %arg11: memref<4x32xf32, #tpu.memory_space<vmem>>, %arg12: memref<4x32xf32, #tpu.memory_space<vmem>>, %arg13: memref<4x8x32xf32, #tpu.memory_space<vmem>>, %arg14: memref<4x8x32xf32, #tpu.memory_space<vmem>>, %arg15: memref<4x8x32xf32, #tpu.memory_space<vmem>>, %arg16: memref<4x8x32xf32, #tpu.memory_space<vmem>>) attributes {dimension_semantics = [#tpu.dimension_semantics<parallel>, #tpu.dimension_semantics<arbitrary>], iteration_bounds = array<i64: 1, 1>, scalar_prefetch = 0 : i64, scratch_operands = 5 : i64, tpu.core_type = #tpu.core_type<tc>, window_params = [{transform_indices = @transform_0, window_bounds = array<i64: 4, 8, 32>}, {transform_indices = @transform_1, window_bounds = array<i64: 4, 32>}, {pipeline_mode = #tpu.pipeline_mode<synchronous>, transform_indices = @transform_2, window_bounds = array<i64: 3, 32, 32>}, {pipeline_mode = #tpu.pipeline_mode<synchronous>, transform_indices = @transform_3, window_bounds = array<i64: 3, 1, 32>}, {pipeline_mode = #tpu.pipeline_mode<synchronous>, transform_indices = @transform_4, window_bounds = array<i64: 3, 32, 32>}, {pipeline_mode = #tpu.pipeline_mode<synchronous>, transform_indices = @transform_5, window_bounds = array<i64: 3, 1, 32>}, {pipeline_mode = #tpu.pipeline_mode<synchronous>, transform_indices = @transform_6, window_bounds = array<i64: 32, 16>}, {pipeline_mode = #tpu.pipeline_mode<synchronous>, transform_indices = @transform_7, window_bounds = array<i64: 1, 16>}, {transform_indices = @transform_8, window_bounds = array<i64: 4, 8, 16>}, {transform_indices = @transform_9, window_bounds = array<i64: 4, 32>}]} {
    %c0_i32 = arith.constant 0 : i32
    %0 = arith.cmpi eq, %arg1, %c0_i32 : i32
    %1 = arith.extui %0 : i1 to i32
    %c0_i32_0 = arith.constant 0 : i32
    %2 = arith.cmpi ne, %1, %c0_i32_0 : i32
    scf.if %2 {
      %c0_206 = arith.constant 0 : index
      %c0_207 = arith.constant 0 : index
      %382 = vector.load %arg3[%c0_206, %c0_207] : memref<4x32xf32, #tpu.memory_space<vmem>>, vector<4x32xf32>
      %c0_208 = arith.constant 0 : index
      %c0_209 = arith.constant 0 : index
      %383 = vector.load %arg12[%c0_208, %c0_209] : memref<4x32xf32, #tpu.memory_space<vmem>>, vector<4x32xf32>
      tpu.vector_store %arg12[%c0_208, %c0_209], %382 {strides = array<i32>} : memref<4x32xf32, #tpu.memory_space<vmem>>, vector<4x32xf32>,
    } else {
    }
    %c0 = arith.constant 0 : index
    %c0_1 = arith.constant 0 : index
    %c0_2 = arith.constant 0 : index
    %3 = vector.load %arg2[%c0, %c0_1, %c0_2] : memref<4x8x32xf32, #tpu.memory_space<vmem>>, vector<4x8x32xf32>
    %4 = arith.truncf %3 : vector<4x8x32xf32> to vector<4x8x32xbf16>
    %5 = vector.shape_cast %4 : vector<4x8x32xbf16> to vector<32x32xbf16>
    %c0_3 = arith.constant 0 : index
    %c0_4 = arith.constant 0 : index
    %c0_5 = arith.constant 0 : index
    %6 = vector.load %arg4[%c0_3, %c0_4, %c0_5] : memref<3x32x32xbf16, #tpu.memory_space<vmem>>, vector<1x32x32xbf16>
    %7 = vector.shape_cast %6 : vector<1x32x32xbf16> to vector<32x32xbf16>
    %cst = arith.constant dense<0.000000e+00> : vector<32x32xf32>
    %8 = tpu.matmul %5, %7, %cst {dimension_numbers = #tpu.dot_dimension_numbers<[1], [0], [0], [1], [0, 0, 1, 1], [], []>} : vector<32x32xbf16>, vector<32x32xbf16>, vector<32x32xf32> -> vector<32x32xf32>
    %c0_6 = arith.constant 0 : index
    %c0_7 = arith.constant 0 : index
    %c0_8 = arith.constant 0 : index
    %9 = vector.load %arg5[%c0_6, %c0_7, %c0_8] : memref<3x1x32xf32, #tpu.memory_space<vmem>>, vector<1x1x32xf32>
    %10 = vector.shape_cast %9 : vector<1x1x32xf32> to vector<1x32xf32>
    %11 = vector.broadcast %10 : vector<1x32xf32> to vector<32x32xf32>
    %12 = arith.addf %8, %11 : vector<32x32xf32>
    %13 = vector.shape_cast %12 : vector<32x32xf32> to vector<4x8x32xf32>
    %c0_9 = arith.constant 0 : index
    %c0_10 = arith.constant 0 : index
    %c0_11 = arith.constant 0 : index
    %14 = vector.load %arg14[%c0_9, %c0_10, %c0_11] : memref<4x8x32xf32, #tpu.memory_space<vmem>>, vector<4x8x32xf32>
    tpu.vector_store %arg14[%c0_9, %c0_10, %c0_11], %13 {strides = array<i32>} : memref<4x8x32xf32, #tpu.memory_space<vmem>>, vector<4x8x32xf32>,
    %c1 = arith.constant 1 : index
    %c0_12 = arith.constant 0 : index
    %c0_13 = arith.constant 0 : index
    %15 = vector.load %arg4[%c1, %c0_12, %c0_13] : memref<3x32x32xbf16, #tpu.memory_space<vmem>>, vector<1x32x32xbf16>
    %16 = vector.shape_cast %15 : vector<1x32x32xbf16> to vector<32x32xbf16>
    %cst_14 = arith.constant dense<0.000000e+00> : vector<32x32xf32>
    %17 = tpu.matmul %5, %16, %cst_14 {dimension_numbers = #tpu.dot_dimension_numbers<[1], [0], [0], [1], [0, 0, 1, 1], [], []>} : vector<32x32xbf16>, vector<32x32xbf16>, vector<32x32xf32> -> vector<32x32xf32>
    %c1_15 = arith.constant 1 : index
    %c0_16 = arith.constant 0 : index
    %c0_17 = arith.constant 0 : index
    %18 = vector.load %arg5[%c1_15, %c0_16, %c0_17] : memref<3x1x32xf32, #tpu.memory_space<vmem>>, vector<1x1x32xf32>
    %19 = vector.shape_cast %18 : vector<1x1x32xf32> to vector<1x32xf32>
    %20 = vector.broadcast %19 : vector<1x32xf32> to vector<32x32xf32>
    %21 = arith.addf %17, %20 : vector<32x32xf32>
    %22 = vector.shape_cast %21 : vector<32x32xf32> to vector<4x8x32xf32>
    %c0_18 = arith.constant 0 : index
    %c0_19 = arith.constant 0 : index
    %c0_20 = arith.constant 0 : index
    %23 = vector.load %arg15[%c0_18, %c0_19, %c0_20] : memref<4x8x32xf32, #tpu.memory_space<vmem>>, vector<4x8x32xf32>
    tpu.vector_store %arg15[%c0_18, %c0_19, %c0_20], %22 {strides = array<i32>} : memref<4x8x32xf32, #tpu.memory_space<vmem>>, vector<4x8x32xf32>,
    %c2 = arith.constant 2 : index
    %c0_21 = arith.constant 0 : index
    %c0_22 = arith.constant 0 : index
    %24 = vector.load %arg4[%c2, %c0_21, %c0_22] : memref<3x32x32xbf16, #tpu.memory_space<vmem>>, vector<1x32x32xbf16>
    %25 = vector.shape_cast %24 : vector<1x32x32xbf16> to vector<32x32xbf16>
    %cst_23 = arith.constant dense<0.000000e+00> : vector<32x32xf32>
    %26 = tpu.matmul %5, %25, %cst_23 {dimension_numbers = #tpu.dot_dimension_numbers<[1], [0], [0], [1], [0, 0, 1, 1], [], []>} : vector<32x32xbf16>, vector<32x32xbf16>, vector<32x32xf32> -> vector<32x32xf32>
    %c2_24 = arith.constant 2 : index
    %c0_25 = arith.constant 0 : index
    %c0_26 = arith.constant 0 : index
    %27 = vector.load %arg5[%c2_24, %c0_25, %c0_26] : memref<3x1x32xf32, #tpu.memory_space<vmem>>, vector<1x1x32xf32>
    %28 = vector.shape_cast %27 : vector<1x1x32xf32> to vector<1x32xf32>
    %29 = vector.broadcast %28 : vector<1x32xf32> to vector<32x32xf32>
    %30 = arith.addf %26, %29 : vector<32x32xf32>
    %31 = vector.shape_cast %30 : vector<32x32xf32> to vector<4x8x32xf32>
    %c0_27 = arith.constant 0 : index
    %c0_28 = arith.constant 0 : index
    %c0_29 = arith.constant 0 : index
    %32 = vector.load %arg16[%c0_27, %c0_28, %c0_29] : memref<4x8x32xf32, #tpu.memory_space<vmem>>, vector<4x8x32xf32>
    tpu.vector_store %arg16[%c0_27, %c0_28, %c0_29], %31 {strides = array<i32>} : memref<4x8x32xf32, #tpu.memory_space<vmem>>, vector<4x8x32xf32>,
    %c0_30 = arith.constant 0 : index
    %c0_31 = arith.constant 0 : index
    %c0_32 = arith.constant 0 : index
    %33 = vector.load %arg6[%c0_30, %c0_31, %c0_32] : memref<3x32x32xbf16, #tpu.memory_space<vmem>>, vector<1x32x32xbf16>
    %34 = vector.shape_cast %33 : vector<1x32x32xbf16> to vector<32x32xbf16>
    %c1_33 = arith.constant 1 : index
    %c0_34 = arith.constant 0 : index
    %c0_35 = arith.constant 0 : index
    %35 = vector.load %arg6[%c1_33, %c0_34, %c0_35] : memref<3x32x32xbf16, #tpu.memory_space<vmem>>, vector<1x32x32xbf16>
    %36 = vector.shape_cast %35 : vector<1x32x32xbf16> to vector<32x32xbf16>
    %c2_36 = arith.constant 2 : index
    %c0_37 = arith.constant 0 : index
    %c0_38 = arith.constant 0 : index
    %37 = vector.load %arg6[%c2_36, %c0_37, %c0_38] : memref<3x32x32xbf16, #tpu.memory_space<vmem>>, vector<1x32x32xbf16>
    %38 = vector.shape_cast %37 : vector<1x32x32xbf16> to vector<32x32xbf16>
    %c0_39 = arith.constant 0 : index
    %c0_40 = arith.constant 0 : index
    %c0_41 = arith.constant 0 : index
    %39 = vector.load %arg7[%c0_39, %c0_40, %c0_41] : memref<3x1x32xf32, #tpu.memory_space<vmem>>, vector<1x1x32xf32>
    %40 = vector.shape_cast %39 : vector<1x1x32xf32> to vector<1x32xf32>
    %c1_42 = arith.constant 1 : index
    %c0_43 = arith.constant 0 : index
    %c0_44 = arith.constant 0 : index
    %41 = vector.load %arg7[%c1_42, %c0_43, %c0_44] : memref<3x1x32xf32, #tpu.memory_space<vmem>>, vector<1x1x32xf32>
    %42 = vector.shape_cast %41 : vector<1x1x32xf32> to vector<1x32xf32>
    %c2_45 = arith.constant 2 : index
    %c0_46 = arith.constant 0 : index
    %c0_47 = arith.constant 0 : index
    %43 = vector.load %arg7[%c2_45, %c0_46, %c0_47] : memref<3x1x32xf32, #tpu.memory_space<vmem>>, vector<1x1x32xf32>
    %44 = vector.shape_cast %43 : vector<1x1x32xf32> to vector<1x32xf32>
    %c0_48 = arith.constant 0 : index
    %c0_49 = arith.constant 0 : index
    %45 = vector.load %arg12[%c0_48, %c0_49] : memref<4x32xf32, #tpu.memory_space<vmem>>, vector<4x32xf32>
    %46 = arith.truncf %45 : vector<4x32xf32> to vector<4x32xbf16>
    %cst_50 = arith.constant dense<0.000000e+00> : vector<4x32xf32>
    %47 = tpu.matmul %46, %34, %cst_50 {dimension_numbers = #tpu.dot_dimension_numbers<[1], [0], [0], [1], [0, 0, 1, 1], [], []>} : vector<4x32xbf16>, vector<32x32xbf16>, vector<4x32xf32> -> vector<4x32xf32>
    %48 = vector.broadcast %40 : vector<1x32xf32> to vector<4x32xf32>
    %49 = arith.addf %47, %48 : vector<4x32xf32>
    %cst_51 = arith.constant dense<0.000000e+00> : vector<4x32xf32>
    %50 = tpu.matmul %46, %36, %cst_51 {dimension_numbers = #tpu.dot_dimension_numbers<[1], [0], [0], [1], [0, 0, 1, 1], [], []>} : vector<4x32xbf16>, vector<32x32xbf16>, vector<4x32xf32> -> vector<4x32xf32>
    %51 = vector.broadcast %42 : vector<1x32xf32> to vector<4x32xf32>
    %52 = arith.addf %50, %51 : vector<4x32xf32>
    %cst_52 = arith.constant dense<0.000000e+00> : vector<4x32xf32>
    %53 = tpu.matmul %46, %38, %cst_52 {dimension_numbers = #tpu.dot_dimension_numbers<[1], [0], [0], [1], [0, 0, 1, 1], [], []>} : vector<4x32xbf16>, vector<32x32xbf16>, vector<4x32xf32> -> vector<4x32xf32>
    %54 = vector.broadcast %44 : vector<1x32xf32> to vector<4x32xf32>
    %55 = arith.addf %53, %54 : vector<4x32xf32>
    %c0_53 = arith.constant 0 : index
    %c0_54 = arith.constant 0 : index
    %c0_55 = arith.constant 0 : index
    %56 = vector.load %arg14[%c0_53, %c0_54, %c0_55] : memref<4x8x32xf32, #tpu.memory_space<vmem>>, vector<4x1x32xf32>
    %57 = vector.shape_cast %56 : vector<4x1x32xf32> to vector<4x32xf32>
    %c0_56 = arith.constant 0 : index
    %c0_57 = arith.constant 0 : index
    %c0_58 = arith.constant 0 : index
    %58 = vector.load %arg15[%c0_56, %c0_57, %c0_58] : memref<4x8x32xf32, #tpu.memory_space<vmem>>, vector<4x1x32xf32>
    %59 = vector.shape_cast %58 : vector<4x1x32xf32> to vector<4x32xf32>
    %c0_59 = arith.constant 0 : index
    %c0_60 = arith.constant 0 : index
    %c0_61 = arith.constant 0 : index
    %60 = vector.load %arg16[%c0_59, %c0_60, %c0_61] : memref<4x8x32xf32, #tpu.memory_space<vmem>>, vector<4x1x32xf32>
    %61 = vector.shape_cast %60 : vector<4x1x32xf32> to vector<4x32xf32>
    %62 = arith.addf %57, %49 : vector<4x32xf32>
    %63 = arith.negf %62 : vector<4x32xf32>
    %64 = math.exp %63 : vector<4x32xf32>
    %cst_62 = arith.constant 1.000000e+00 : f32
    %65 = vector.broadcast %cst_62 : f32 to vector<4x32xf32>
    %66 = arith.addf %65, %64 : vector<4x32xf32>
    %67 = arith.divf %65, %66 : vector<4x32xf32>
    %68 = arith.addf %59, %52 : vector<4x32xf32>
    %69 = arith.negf %68 : vector<4x32xf32>
    %70 = math.exp %69 : vector<4x32xf32>
    %cst_63 = arith.constant 1.000000e+00 : f32
    %71 = vector.broadcast %cst_63 : f32 to vector<4x32xf32>
    %72 = arith.addf %71, %70 : vector<4x32xf32>
    %73 = arith.divf %71, %72 : vector<4x32xf32>
    %74 = arith.mulf %67, %55 : vector<4x32xf32>
    %75 = arith.addf %61, %74 : vector<4x32xf32>
    %76 = math.tanh %75 : vector<4x32xf32>
    %cst_64 = arith.constant 1.000000e+00 : f32
    %77 = vector.broadcast %cst_64 : f32 to vector<4x32xf32>
    %78 = arith.subf %77, %73 : vector<4x32xf32>
    %79 = arith.mulf %78, %76 : vector<4x32xf32>
    %80 = arith.mulf %73, %45 : vector<4x32xf32>
    %81 = arith.addf %79, %80 : vector<4x32xf32>
    %c0_65 = arith.constant 0 : index
    %c0_66 = arith.constant 0 : index
    %c0_67 = arith.constant 0 : index
    %82 = vector.load %arg13[%c0_65, %c0_66, %c0_67] : memref<4x8x32xf32, #tpu.memory_space<vmem>>, vector<4x1x32xf32>
    %83 = vector.shape_cast %82 : vector<4x1x32xf32> to vector<4x32xf32>
    %84 = vector.shape_cast %81 : vector<4x32xf32> to vector<4x1x32xf32>
    tpu.vector_store %arg13[%c0_65, %c0_66, %c0_67], %84 {strides = array<i32>} : memref<4x8x32xf32, #tpu.memory_space<vmem>>, vector<4x1x32xf32>,
    %85 = arith.truncf %81 : vector<4x32xf32> to vector<4x32xbf16>
    %cst_68 = arith.constant dense<0.000000e+00> : vector<4x32xf32>
    %86 = tpu.matmul %85, %34, %cst_68 {dimension_numbers = #tpu.dot_dimension_numbers<[1], [0], [0], [1], [0, 0, 1, 1], [], []>} : vector<4x32xbf16>, vector<32x32xbf16>, vector<4x32xf32> -> vector<4x32xf32>
    %87 = vector.broadcast %40 : vector<1x32xf32> to vector<4x32xf32>
    %88 = arith.addf %86, %87 : vector<4x32xf32>
    %cst_69 = arith.constant dense<0.000000e+00> : vector<4x32xf32>
    %89 = tpu.matmul %85, %36, %cst_69 {dimension_numbers = #tpu.dot_dimension_numbers<[1], [0], [0], [1], [0, 0, 1, 1], [], []>} : vector<4x32xbf16>, vector<32x32xbf16>, vector<4x32xf32> -> vector<4x32xf32>
    %90 = vector.broadcast %42 : vector<1x32xf32> to vector<4x32xf32>
    %91 = arith.addf %89, %90 : vector<4x32xf32>
    %cst_70 = arith.constant dense<0.000000e+00> : vector<4x32xf32>
    %92 = tpu.matmul %85, %38, %cst_70 {dimension_numbers = #tpu.dot_dimension_numbers<[1], [0], [0], [1], [0, 0, 1, 1], [], []>} : vector<4x32xbf16>, vector<32x32xbf16>, vector<4x32xf32> -> vector<4x32xf32>
    %93 = vector.broadcast %44 : vector<1x32xf32> to vector<4x32xf32>
    %94 = arith.addf %92, %93 : vector<4x32xf32>
    %c0_71 = arith.constant 0 : index
    %c1_72 = arith.constant 1 : index
    %c0_73 = arith.constant 0 : index
    %95 = vector.load %arg14[%c0_71, %c1_72, %c0_73] : memref<4x8x32xf32, #tpu.memory_space<vmem>>, vector<4x1x32xf32>
    %96 = vector.shape_cast %95 : vector<4x1x32xf32> to vector<4x32xf32>
    %c0_74 = arith.constant 0 : index
    %c1_75 = arith.constant 1 : index
    %c0_76 = arith.constant 0 : index
    %97 = vector.load %arg15[%c0_74, %c1_75, %c0_76] : memref<4x8x32xf32, #tpu.memory_space<vmem>>, vector<4x1x32xf32>
    %98 = vector.shape_cast %97 : vector<4x1x32xf32> to vector<4x32xf32>
    %c0_77 = arith.constant 0 : index
    %c1_78 = arith.constant 1 : index
    %c0_79 = arith.constant 0 : index
    %99 = vector.load %arg16[%c0_77, %c1_78, %c0_79] : memref<4x8x32xf32, #tpu.memory_space<vmem>>, vector<4x1x32xf32>
    %100 = vector.shape_cast %99 : vector<4x1x32xf32> to vector<4x32xf32>
    %101 = arith.addf %96, %88 : vector<4x32xf32>
    %102 = arith.negf %101 : vector<4x32xf32>
    %103 = math.exp %102 : vector<4x32xf32>
    %cst_80 = arith.constant 1.000000e+00 : f32
    %104 = vector.broadcast %cst_80 : f32 to vector<4x32xf32>
    %105 = arith.addf %104, %103 : vector<4x32xf32>
    %106 = arith.divf %104, %105 : vector<4x32xf32>
    %107 = arith.addf %98, %91 : vector<4x32xf32>
    %108 = arith.negf %107 : vector<4x32xf32>
    %109 = math.exp %108 : vector<4x32xf32>
    %cst_81 = arith.constant 1.000000e+00 : f32
    %110 = vector.broadcast %cst_81 : f32 to vector<4x32xf32>
    %111 = arith.addf %110, %109 : vector<4x32xf32>
    %112 = arith.divf %110, %111 : vector<4x32xf32>
    %113 = arith.mulf %106, %94 : vector<4x32xf32>
    %114 = arith.addf %100, %113 : vector<4x32xf32>
    %115 = math.tanh %114 : vector<4x32xf32>
    %cst_82 = arith.constant 1.000000e+00 : f32
    %116 = vector.broadcast %cst_82 : f32 to vector<4x32xf32>
    %117 = arith.subf %116, %112 : vector<4x32xf32>
    %118 = arith.mulf %117, %115 : vector<4x32xf32>
    %119 = arith.mulf %112, %81 : vector<4x32xf32>
    %120 = arith.addf %118, %119 : vector<4x32xf32>
    %c0_83 = arith.constant 0 : index
    %c1_84 = arith.constant 1 : index
    %c0_85 = arith.constant 0 : index
    %121 = vector.load %arg13[%c0_83, %c1_84, %c0_85] : memref<4x8x32xf32, #tpu.memory_space<vmem>>, vector<4x1x32xf32>
    %122 = vector.shape_cast %121 : vector<4x1x32xf32> to vector<4x32xf32>
    %123 = vector.shape_cast %120 : vector<4x32xf32> to vector<4x1x32xf32>
    tpu.vector_store %arg13[%c0_83, %c1_84, %c0_85], %123 {strides = array<i32>} : memref<4x8x32xf32, #tpu.memory_space<vmem>>, vector<4x1x32xf32>,
    %124 = arith.truncf %120 : vector<4x32xf32> to vector<4x32xbf16>
    %cst_86 = arith.constant dense<0.000000e+00> : vector<4x32xf32>
    %125 = tpu.matmul %124, %34, %cst_86 {dimension_numbers = #tpu.dot_dimension_numbers<[1], [0], [0], [1], [0, 0, 1, 1], [], []>} : vector<4x32xbf16>, vector<32x32xbf16>, vector<4x32xf32> -> vector<4x32xf32>
    %126 = vector.broadcast %40 : vector<1x32xf32> to vector<4x32xf32>
    %127 = arith.addf %125, %126 : vector<4x32xf32>
    %cst_87 = arith.constant dense<0.000000e+00> : vector<4x32xf32>
    %128 = tpu.matmul %124, %36, %cst_87 {dimension_numbers = #tpu.dot_dimension_numbers<[1], [0], [0], [1], [0, 0, 1, 1], [], []>} : vector<4x32xbf16>, vector<32x32xbf16>, vector<4x32xf32> -> vector<4x32xf32>
    %129 = vector.broadcast %42 : vector<1x32xf32> to vector<4x32xf32>
    %130 = arith.addf %128, %129 : vector<4x32xf32>
    %cst_88 = arith.constant dense<0.000000e+00> : vector<4x32xf32>
    %131 = tpu.matmul %124, %38, %cst_88 {dimension_numbers = #tpu.dot_dimension_numbers<[1], [0], [0], [1], [0, 0, 1, 1], [], []>} : vector<4x32xbf16>, vector<32x32xbf16>, vector<4x32xf32> -> vector<4x32xf32>
    %132 = vector.broadcast %44 : vector<1x32xf32> to vector<4x32xf32>
    %133 = arith.addf %131, %132 : vector<4x32xf32>
    %c0_89 = arith.constant 0 : index
    %c2_90 = arith.constant 2 : index
    %c0_91 = arith.constant 0 : index
    %134 = vector.load %arg14[%c0_89, %c2_90, %c0_91] : memref<4x8x32xf32, #tpu.memory_space<vmem>>, vector<4x1x32xf32>
    %135 = vector.shape_cast %134 : vector<4x1x32xf32> to vector<4x32xf32>
    %c0_92 = arith.constant 0 : index
    %c2_93 = arith.constant 2 : index
    %c0_94 = arith.constant 0 : index
    %136 = vector.load %arg15[%c0_92, %c2_93, %c0_94] : memref<4x8x32xf32, #tpu.memory_space<vmem>>, vector<4x1x32xf32>
    %137 = vector.shape_cast %136 : vector<4x1x32xf32> to vector<4x32xf32>
    %c0_95 = arith.constant 0 : index
    %c2_96 = arith.constant 2 : index
    %c0_97 = arith.constant 0 : index
    %138 = vector.load %arg16[%c0_95, %c2_96, %c0_97] : memref<4x8x32xf32, #tpu.memory_space<vmem>>, vector<4x1x32xf32>
    %139 = vector.shape_cast %138 : vector<4x1x32xf32> to vector<4x32xf32>
    %140 = arith.addf %135, %127 : vector<4x32xf32>
    %141 = arith.negf %140 : vector<4x32xf32>
    %142 = math.exp %141 : vector<4x32xf32>
    %cst_98 = arith.constant 1.000000e+00 : f32
    %143 = vector.broadcast %cst_98 : f32 to vector<4x32xf32>
    %144 = arith.addf %143, %142 : vector<4x32xf32>
    %145 = arith.divf %143, %144 : vector<4x32xf32>
    %146 = arith.addf %137, %130 : vector<4x32xf32>
    %147 = arith.negf %146 : vector<4x32xf32>
    %148 = math.exp %147 : vector<4x32xf32>
    %cst_99 = arith.constant 1.000000e+00 : f32
    %149 = vector.broadcast %cst_99 : f32 to vector<4x32xf32>
    %150 = arith.addf %149, %148 : vector<4x32xf32>
    %151 = arith.divf %149, %150 : vector<4x32xf32>
    %152 = arith.mulf %145, %133 : vector<4x32xf32>
    %153 = arith.addf %139, %152 : vector<4x32xf32>
    %154 = math.tanh %153 : vector<4x32xf32>
    %cst_100 = arith.constant 1.000000e+00 : f32
    %155 = vector.broadcast %cst_100 : f32 to vector<4x32xf32>
    %156 = arith.subf %155, %151 : vector<4x32xf32>
    %157 = arith.mulf %156, %154 : vector<4x32xf32>
    %158 = arith.mulf %151, %120 : vector<4x32xf32>
    %159 = arith.addf %157, %158 : vector<4x32xf32>
    %c0_101 = arith.constant 0 : index
    %c2_102 = arith.constant 2 : index
    %c0_103 = arith.constant 0 : index
    %160 = vector.load %arg13[%c0_101, %c2_102, %c0_103] : memref<4x8x32xf32, #tpu.memory_space<vmem>>, vector<4x1x32xf32>
    %161 = vector.shape_cast %160 : vector<4x1x32xf32> to vector<4x32xf32>
    %162 = vector.shape_cast %159 : vector<4x32xf32> to vector<4x1x32xf32>
    tpu.vector_store %arg13[%c0_101, %c2_102, %c0_103], %162 {strides = array<i32>} : memref<4x8x32xf32, #tpu.memory_space<vmem>>, vector<4x1x32xf32>,
    %163 = arith.truncf %159 : vector<4x32xf32> to vector<4x32xbf16>
    %cst_104 = arith.constant dense<0.000000e+00> : vector<4x32xf32>
    %164 = tpu.matmul %163, %34, %cst_104 {dimension_numbers = #tpu.dot_dimension_numbers<[1], [0], [0], [1], [0, 0, 1, 1], [], []>} : vector<4x32xbf16>, vector<32x32xbf16>, vector<4x32xf32> -> vector<4x32xf32>
    %165 = vector.broadcast %40 : vector<1x32xf32> to vector<4x32xf32>
    %166 = arith.addf %164, %165 : vector<4x32xf32>
    %cst_105 = arith.constant dense<0.000000e+00> : vector<4x32xf32>
    %167 = tpu.matmul %163, %36, %cst_105 {dimension_numbers = #tpu.dot_dimension_numbers<[1], [0], [0], [1], [0, 0, 1, 1], [], []>} : vector<4x32xbf16>, vector<32x32xbf16>, vector<4x32xf32> -> vector<4x32xf32>
    %168 = vector.broadcast %42 : vector<1x32xf32> to vector<4x32xf32>
    %169 = arith.addf %167, %168 : vector<4x32xf32>
    %cst_106 = arith.constant dense<0.000000e+00> : vector<4x32xf32>
    %170 = tpu.matmul %163, %38, %cst_106 {dimension_numbers = #tpu.dot_dimension_numbers<[1], [0], [0], [1], [0, 0, 1, 1], [], []>} : vector<4x32xbf16>, vector<32x32xbf16>, vector<4x32xf32> -> vector<4x32xf32>
    %171 = vector.broadcast %44 : vector<1x32xf32> to vector<4x32xf32>
    %172 = arith.addf %170, %171 : vector<4x32xf32>
    %c0_107 = arith.constant 0 : index
    %c3 = arith.constant 3 : index
    %c0_108 = arith.constant 0 : index
    %173 = vector.load %arg14[%c0_107, %c3, %c0_108] : memref<4x8x32xf32, #tpu.memory_space<vmem>>, vector<4x1x32xf32>
    %174 = vector.shape_cast %173 : vector<4x1x32xf32> to vector<4x32xf32>
    %c0_109 = arith.constant 0 : index
    %c3_110 = arith.constant 3 : index
    %c0_111 = arith.constant 0 : index
    %175 = vector.load %arg15[%c0_109, %c3_110, %c0_111] : memref<4x8x32xf32, #tpu.memory_space<vmem>>, vector<4x1x32xf32>
    %176 = vector.shape_cast %175 : vector<4x1x32xf32> to vector<4x32xf32>
    %c0_112 = arith.constant 0 : index
    %c3_113 = arith.constant 3 : index
    %c0_114 = arith.constant 0 : index
    %177 = vector.load %arg16[%c0_112, %c3_113, %c0_114] : memref<4x8x32xf32, #tpu.memory_space<vmem>>, vector<4x1x32xf32>
    %178 = vector.shape_cast %177 : vector<4x1x32xf32> to vector<4x32xf32>
    %179 = arith.addf %174, %166 : vector<4x32xf32>
    %180 = arith.negf %179 : vector<4x32xf32>
    %181 = math.exp %180 : vector<4x32xf32>
    %cst_115 = arith.constant 1.000000e+00 : f32
    %182 = vector.broadcast %cst_115 : f32 to vector<4x32xf32>
    %183 = arith.addf %182, %181 : vector<4x32xf32>
    %184 = arith.divf %182, %183 : vector<4x32xf32>
    %185 = arith.addf %176, %169 : vector<4x32xf32>
    %186 = arith.negf %185 : vector<4x32xf32>
    %187 = math.exp %186 : vector<4x32xf32>
    %cst_116 = arith.constant 1.000000e+00 : f32
    %188 = vector.broadcast %cst_116 : f32 to vector<4x32xf32>
    %189 = arith.addf %188, %187 : vector<4x32xf32>
    %190 = arith.divf %188, %189 : vector<4x32xf32>
    %191 = arith.mulf %184, %172 : vector<4x32xf32>
    %192 = arith.addf %178, %191 : vector<4x32xf32>
    %193 = math.tanh %192 : vector<4x32xf32>
    %cst_117 = arith.constant 1.000000e+00 : f32
    %194 = vector.broadcast %cst_117 : f32 to vector<4x32xf32>
    %195 = arith.subf %194, %190 : vector<4x32xf32>
    %196 = arith.mulf %195, %193 : vector<4x32xf32>
    %197 = arith.mulf %190, %159 : vector<4x32xf32>
    %198 = arith.addf %196, %197 : vector<4x32xf32>
    %c0_118 = arith.constant 0 : index
    %c3_119 = arith.constant 3 : index
    %c0_120 = arith.constant 0 : index
    %199 = vector.load %arg13[%c0_118, %c3_119, %c0_120] : memref<4x8x32xf32, #tpu.memory_space<vmem>>, vector<4x1x32xf32>
    %200 = vector.shape_cast %199 : vector<4x1x32xf32> to vector<4x32xf32>
    %201 = vector.shape_cast %198 : vector<4x32xf32> to vector<4x1x32xf32>
    tpu.vector_store %arg13[%c0_118, %c3_119, %c0_120], %201 {strides = array<i32>} : memref<4x8x32xf32, #tpu.memory_space<vmem>>, vector<4x1x32xf32>,
    %202 = arith.truncf %198 : vector<4x32xf32> to vector<4x32xbf16>
    %cst_121 = arith.constant dense<0.000000e+00> : vector<4x32xf32>
    %203 = tpu.matmul %202, %34, %cst_121 {dimension_numbers = #tpu.dot_dimension_numbers<[1], [0], [0], [1], [0, 0, 1, 1], [], []>} : vector<4x32xbf16>, vector<32x32xbf16>, vector<4x32xf32> -> vector<4x32xf32>
    %204 = vector.broadcast %40 : vector<1x32xf32> to vector<4x32xf32>
    %205 = arith.addf %203, %204 : vector<4x32xf32>
    %cst_122 = arith.constant dense<0.000000e+00> : vector<4x32xf32>
    %206 = tpu.matmul %202, %36, %cst_122 {dimension_numbers = #tpu.dot_dimension_numbers<[1], [0], [0], [1], [0, 0, 1, 1], [], []>} : vector<4x32xbf16>, vector<32x32xbf16>, vector<4x32xf32> -> vector<4x32xf32>
    %207 = vector.broadcast %42 : vector<1x32xf32> to vector<4x32xf32>
    %208 = arith.addf %206, %207 : vector<4x32xf32>
    %cst_123 = arith.constant dense<0.000000e+00> : vector<4x32xf32>
    %209 = tpu.matmul %202, %38, %cst_123 {dimension_numbers = #tpu.dot_dimension_numbers<[1], [0], [0], [1], [0, 0, 1, 1], [], []>} : vector<4x32xbf16>, vector<32x32xbf16>, vector<4x32xf32> -> vector<4x32xf32>
    %210 = vector.broadcast %44 : vector<1x32xf32> to vector<4x32xf32>
    %211 = arith.addf %209, %210 : vector<4x32xf32>
    %c0_124 = arith.constant 0 : index
    %c4 = arith.constant 4 : index
    %c0_125 = arith.constant 0 : index
    %212 = vector.load %arg14[%c0_124, %c4, %c0_125] : memref<4x8x32xf32, #tpu.memory_space<vmem>>, vector<4x1x32xf32>
    %213 = vector.shape_cast %212 : vector<4x1x32xf32> to vector<4x32xf32>
    %c0_126 = arith.constant 0 : index
    %c4_127 = arith.constant 4 : index
    %c0_128 = arith.constant 0 : index
    %214 = vector.load %arg15[%c0_126, %c4_127, %c0_128] : memref<4x8x32xf32, #tpu.memory_space<vmem>>, vector<4x1x32xf32>
    %215 = vector.shape_cast %214 : vector<4x1x32xf32> to vector<4x32xf32>
    %c0_129 = arith.constant 0 : index
    %c4_130 = arith.constant 4 : index
    %c0_131 = arith.constant 0 : index
    %216 = vector.load %arg16[%c0_129, %c4_130, %c0_131] : memref<4x8x32xf32, #tpu.memory_space<vmem>>, vector<4x1x32xf32>
    %217 = vector.shape_cast %216 : vector<4x1x32xf32> to vector<4x32xf32>
    %218 = arith.addf %213, %205 : vector<4x32xf32>
    %219 = arith.negf %218 : vector<4x32xf32>
    %220 = math.exp %219 : vector<4x32xf32>
    %cst_132 = arith.constant 1.000000e+00 : f32
    %221 = vector.broadcast %cst_132 : f32 to vector<4x32xf32>
    %222 = arith.addf %221, %220 : vector<4x32xf32>
    %223 = arith.divf %221, %222 : vector<4x32xf32>
    %224 = arith.addf %215, %208 : vector<4x32xf32>
    %225 = arith.negf %224 : vector<4x32xf32>
    %226 = math.exp %225 : vector<4x32xf32>
    %cst_133 = arith.constant 1.000000e+00 : f32
    %227 = vector.broadcast %cst_133 : f32 to vector<4x32xf32>
    %228 = arith.addf %227, %226 : vector<4x32xf32>
    %229 = arith.divf %227, %228 : vector<4x32xf32>
    %230 = arith.mulf %223, %211 : vector<4x32xf32>
    %231 = arith.addf %217, %230 : vector<4x32xf32>
    %232 = math.tanh %231 : vector<4x32xf32>
    %cst_134 = arith.constant 1.000000e+00 : f32
    %233 = vector.broadcast %cst_134 : f32 to vector<4x32xf32>
    %234 = arith.subf %233, %229 : vector<4x32xf32>
    %235 = arith.mulf %234, %232 : vector<4x32xf32>
    %236 = arith.mulf %229, %198 : vector<4x32xf32>
    %237 = arith.addf %235, %236 : vector<4x32xf32>
    %c0_135 = arith.constant 0 : index
    %c4_136 = arith.constant 4 : index
    %c0_137 = arith.constant 0 : index
    %238 = vector.load %arg13[%c0_135, %c4_136, %c0_137] : memref<4x8x32xf32, #tpu.memory_space<vmem>>, vector<4x1x32xf32>
    %239 = vector.shape_cast %238 : vector<4x1x32xf32> to vector<4x32xf32>
    %240 = vector.shape_cast %237 : vector<4x32xf32> to vector<4x1x32xf32>
    tpu.vector_store %arg13[%c0_135, %c4_136, %c0_137], %240 {strides = array<i32>} : memref<4x8x32xf32, #tpu.memory_space<vmem>>, vector<4x1x32xf32>,
    %241 = arith.truncf %237 : vector<4x32xf32> to vector<4x32xbf16>
    %cst_138 = arith.constant dense<0.000000e+00> : vector<4x32xf32>
    %242 = tpu.matmul %241, %34, %cst_138 {dimension_numbers = #tpu.dot_dimension_numbers<[1], [0], [0], [1], [0, 0, 1, 1], [], []>} : vector<4x32xbf16>, vector<32x32xbf16>, vector<4x32xf32> -> vector<4x32xf32>
    %243 = vector.broadcast %40 : vector<1x32xf32> to vector<4x32xf32>
    %244 = arith.addf %242, %243 : vector<4x32xf32>
    %cst_139 = arith.constant dense<0.000000e+00> : vector<4x32xf32>
    %245 = tpu.matmul %241, %36, %cst_139 {dimension_numbers = #tpu.dot_dimension_numbers<[1], [0], [0], [1], [0, 0, 1, 1], [], []>} : vector<4x32xbf16>, vector<32x32xbf16>, vector<4x32xf32> -> vector<4x32xf32>
    %246 = vector.broadcast %42 : vector<1x32xf32> to vector<4x32xf32>
    %247 = arith.addf %245, %246 : vector<4x32xf32>
    %cst_140 = arith.constant dense<0.000000e+00> : vector<4x32xf32>
    %248 = tpu.matmul %241, %38, %cst_140 {dimension_numbers = #tpu.dot_dimension_numbers<[1], [0], [0], [1], [0, 0, 1, 1], [], []>} : vector<4x32xbf16>, vector<32x32xbf16>, vector<4x32xf32> -> vector<4x32xf32>
    %249 = vector.broadcast %44 : vector<1x32xf32> to vector<4x32xf32>
    %250 = arith.addf %248, %249 : vector<4x32xf32>
    %c0_141 = arith.constant 0 : index
    %c5 = arith.constant 5 : index
    %c0_142 = arith.constant 0 : index
    %251 = vector.load %arg14[%c0_141, %c5, %c0_142] : memref<4x8x32xf32, #tpu.memory_space<vmem>>, vector<4x1x32xf32>
    %252 = vector.shape_cast %251 : vector<4x1x32xf32> to vector<4x32xf32>
    %c0_143 = arith.constant 0 : index
    %c5_144 = arith.constant 5 : index
    %c0_145 = arith.constant 0 : index
    %253 = vector.load %arg15[%c0_143, %c5_144, %c0_145] : memref<4x8x32xf32, #tpu.memory_space<vmem>>, vector<4x1x32xf32>
    %254 = vector.shape_cast %253 : vector<4x1x32xf32> to vector<4x32xf32>
    %c0_146 = arith.constant 0 : index
    %c5_147 = arith.constant 5 : index
    %c0_148 = arith.constant 0 : index
    %255 = vector.load %arg16[%c0_146, %c5_147, %c0_148] : memref<4x8x32xf32, #tpu.memory_space<vmem>>, vector<4x1x32xf32>
    %256 = vector.shape_cast %255 : vector<4x1x32xf32> to vector<4x32xf32>
    %257 = arith.addf %252, %244 : vector<4x32xf32>
    %258 = arith.negf %257 : vector<4x32xf32>
    %259 = math.exp %258 : vector<4x32xf32>
    %cst_149 = arith.constant 1.000000e+00 : f32
    %260 = vector.broadcast %cst_149 : f32 to vector<4x32xf32>
    %261 = arith.addf %260, %259 : vector<4x32xf32>
    %262 = arith.divf %260, %261 : vector<4x32xf32>
    %263 = arith.addf %254, %247 : vector<4x32xf32>
    %264 = arith.negf %263 : vector<4x32xf32>
    %265 = math.exp %264 : vector<4x32xf32>
    %cst_150 = arith.constant 1.000000e+00 : f32
    %266 = vector.broadcast %cst_150 : f32 to vector<4x32xf32>
    %267 = arith.addf %266, %265 : vector<4x32xf32>
    %268 = arith.divf %266, %267 : vector<4x32xf32>
    %269 = arith.mulf %262, %250 : vector<4x32xf32>
    %270 = arith.addf %256, %269 : vector<4x32xf32>
    %271 = math.tanh %270 : vector<4x32xf32>
    %cst_151 = arith.constant 1.000000e+00 : f32
    %272 = vector.broadcast %cst_151 : f32 to vector<4x32xf32>
    %273 = arith.subf %272, %268 : vector<4x32xf32>
    %274 = arith.mulf %273, %271 : vector<4x32xf32>
    %275 = arith.mulf %268, %237 : vector<4x32xf32>
    %276 = arith.addf %274, %275 : vector<4x32xf32>
    %c0_152 = arith.constant 0 : index
    %c5_153 = arith.constant 5 : index
    %c0_154 = arith.constant 0 : index
    %277 = vector.load %arg13[%c0_152, %c5_153, %c0_154] : memref<4x8x32xf32, #tpu.memory_space<vmem>>, vector<4x1x32xf32>
    %278 = vector.shape_cast %277 : vector<4x1x32xf32> to vector<4x32xf32>
    %279 = vector.shape_cast %276 : vector<4x32xf32> to vector<4x1x32xf32>
    tpu.vector_store %arg13[%c0_152, %c5_153, %c0_154], %279 {strides = array<i32>} : memref<4x8x32xf32, #tpu.memory_space<vmem>>, vector<4x1x32xf32>,
    %280 = arith.truncf %276 : vector<4x32xf32> to vector<4x32xbf16>
    %cst_155 = arith.constant dense<0.000000e+00> : vector<4x32xf32>
    %281 = tpu.matmul %280, %34, %cst_155 {dimension_numbers = #tpu.dot_dimension_numbers<[1], [0], [0], [1], [0, 0, 1, 1], [], []>} : vector<4x32xbf16>, vector<32x32xbf16>, vector<4x32xf32> -> vector<4x32xf32>
    %282 = vector.broadcast %40 : vector<1x32xf32> to vector<4x32xf32>
    %283 = arith.addf %281, %282 : vector<4x32xf32>
    %cst_156 = arith.constant dense<0.000000e+00> : vector<4x32xf32>
    %284 = tpu.matmul %280, %36, %cst_156 {dimension_numbers = #tpu.dot_dimension_numbers<[1], [0], [0], [1], [0, 0, 1, 1], [], []>} : vector<4x32xbf16>, vector<32x32xbf16>, vector<4x32xf32> -> vector<4x32xf32>
    %285 = vector.broadcast %42 : vector<1x32xf32> to vector<4x32xf32>
    %286 = arith.addf %284, %285 : vector<4x32xf32>
    %cst_157 = arith.constant dense<0.000000e+00> : vector<4x32xf32>
    %287 = tpu.matmul %280, %38, %cst_157 {dimension_numbers = #tpu.dot_dimension_numbers<[1], [0], [0], [1], [0, 0, 1, 1], [], []>} : vector<4x32xbf16>, vector<32x32xbf16>, vector<4x32xf32> -> vector<4x32xf32>
    %288 = vector.broadcast %44 : vector<1x32xf32> to vector<4x32xf32>
    %289 = arith.addf %287, %288 : vector<4x32xf32>
    %c0_158 = arith.constant 0 : index
    %c6 = arith.constant 6 : index
    %c0_159 = arith.constant 0 : index
    %290 = vector.load %arg14[%c0_158, %c6, %c0_159] : memref<4x8x32xf32, #tpu.memory_space<vmem>>, vector<4x1x32xf32>
    %291 = vector.shape_cast %290 : vector<4x1x32xf32> to vector<4x32xf32>
    %c0_160 = arith.constant 0 : index
    %c6_161 = arith.constant 6 : index
    %c0_162 = arith.constant 0 : index
    %292 = vector.load %arg15[%c0_160, %c6_161, %c0_162] : memref<4x8x32xf32, #tpu.memory_space<vmem>>, vector<4x1x32xf32>
    %293 = vector.shape_cast %292 : vector<4x1x32xf32> to vector<4x32xf32>
    %c0_163 = arith.constant 0 : index
    %c6_164 = arith.constant 6 : index
    %c0_165 = arith.constant 0 : index
    %294 = vector.load %arg16[%c0_163, %c6_164, %c0_165] : memref<4x8x32xf32, #tpu.memory_space<vmem>>, vector<4x1x32xf32>
    %295 = vector.shape_cast %294 : vector<4x1x32xf32> to vector<4x32xf32>
    %296 = arith.addf %291, %283 : vector<4x32xf32>
    %297 = arith.negf %296 : vector<4x32xf32>
    %298 = math.exp %297 : vector<4x32xf32>
    %cst_166 = arith.constant 1.000000e+00 : f32
    %299 = vector.broadcast %cst_166 : f32 to vector<4x32xf32>
    %300 = arith.addf %299, %298 : vector<4x32xf32>
    %301 = arith.divf %299, %300 : vector<4x32xf32>
    %302 = arith.addf %293, %286 : vector<4x32xf32>
    %303 = arith.negf %302 : vector<4x32xf32>
    %304 = math.exp %303 : vector<4x32xf32>
    %cst_167 = arith.constant 1.000000e+00 : f32
    %305 = vector.broadcast %cst_167 : f32 to vector<4x32xf32>
    %306 = arith.addf %305, %304 : vector<4x32xf32>
    %307 = arith.divf %305, %306 : vector<4x32xf32>
    %308 = arith.mulf %301, %289 : vector<4x32xf32>
    %309 = arith.addf %295, %308 : vector<4x32xf32>
    %310 = math.tanh %309 : vector<4x32xf32>
    %cst_168 = arith.constant 1.000000e+00 : f32
    %311 = vector.broadcast %cst_168 : f32 to vector<4x32xf32>
    %312 = arith.subf %311, %307 : vector<4x32xf32>
    %313 = arith.mulf %312, %310 : vector<4x32xf32>
    %314 = arith.mulf %307, %276 : vector<4x32xf32>
    %315 = arith.addf %313, %314 : vector<4x32xf32>
    %c0_169 = arith.constant 0 : index
    %c6_170 = arith.constant 6 : index
    %c0_171 = arith.constant 0 : index
    %316 = vector.load %arg13[%c0_169, %c6_170, %c0_171] : memref<4x8x32xf32, #tpu.memory_space<vmem>>, vector<4x1x32xf32>
    %317 = vector.shape_cast %316 : vector<4x1x32xf32> to vector<4x32xf32>
    %318 = vector.shape_cast %315 : vector<4x32xf32> to vector<4x1x32xf32>
    tpu.vector_store %arg13[%c0_169, %c6_170, %c0_171], %318 {strides = array<i32>} : memref<4x8x32xf32, #tpu.memory_space<vmem>>, vector<4x1x32xf32>,
    %319 = arith.truncf %315 : vector<4x32xf32> to vector<4x32xbf16>
    %cst_172 = arith.constant dense<0.000000e+00> : vector<4x32xf32>
    %320 = tpu.matmul %319, %34, %cst_172 {dimension_numbers = #tpu.dot_dimension_numbers<[1], [0], [0], [1], [0, 0, 1, 1], [], []>} : vector<4x32xbf16>, vector<32x32xbf16>, vector<4x32xf32> -> vector<4x32xf32>
    %321 = vector.broadcast %40 : vector<1x32xf32> to vector<4x32xf32>
    %322 = arith.addf %320, %321 : vector<4x32xf32>
    %cst_173 = arith.constant dense<0.000000e+00> : vector<4x32xf32>
    %323 = tpu.matmul %319, %36, %cst_173 {dimension_numbers = #tpu.dot_dimension_numbers<[1], [0], [0], [1], [0, 0, 1, 1], [], []>} : vector<4x32xbf16>, vector<32x32xbf16>, vector<4x32xf32> -> vector<4x32xf32>
    %324 = vector.broadcast %42 : vector<1x32xf32> to vector<4x32xf32>
    %325 = arith.addf %323, %324 : vector<4x32xf32>
    %cst_174 = arith.constant dense<0.000000e+00> : vector<4x32xf32>
    %326 = tpu.matmul %319, %38, %cst_174 {dimension_numbers = #tpu.dot_dimension_numbers<[1], [0], [0], [1], [0, 0, 1, 1], [], []>} : vector<4x32xbf16>, vector<32x32xbf16>, vector<4x32xf32> -> vector<4x32xf32>
    %327 = vector.broadcast %44 : vector<1x32xf32> to vector<4x32xf32>
    %328 = arith.addf %326, %327 : vector<4x32xf32>
    %c0_175 = arith.constant 0 : index
    %c7 = arith.constant 7 : index
    %c0_176 = arith.constant 0 : index
    %329 = vector.load %arg14[%c0_175, %c7, %c0_176] : memref<4x8x32xf32, #tpu.memory_space<vmem>>, vector<4x1x32xf32>
    %330 = vector.shape_cast %329 : vector<4x1x32xf32> to vector<4x32xf32>
    %c0_177 = arith.constant 0 : index
    %c7_178 = arith.constant 7 : index
    %c0_179 = arith.constant 0 : index
    %331 = vector.load %arg15[%c0_177, %c7_178, %c0_179] : memref<4x8x32xf32, #tpu.memory_space<vmem>>, vector<4x1x32xf32>
    %332 = vector.shape_cast %331 : vector<4x1x32xf32> to vector<4x32xf32>
    %c0_180 = arith.constant 0 : index
    %c7_181 = arith.constant 7 : index
    %c0_182 = arith.constant 0 : index
    %333 = vector.load %arg16[%c0_180, %c7_181, %c0_182] : memref<4x8x32xf32, #tpu.memory_space<vmem>>, vector<4x1x32xf32>
    %334 = vector.shape_cast %333 : vector<4x1x32xf32> to vector<4x32xf32>
    %335 = arith.addf %330, %322 : vector<4x32xf32>
    %336 = arith.negf %335 : vector<4x32xf32>
    %337 = math.exp %336 : vector<4x32xf32>
    %cst_183 = arith.constant 1.000000e+00 : f32
    %338 = vector.broadcast %cst_183 : f32 to vector<4x32xf32>
    %339 = arith.addf %338, %337 : vector<4x32xf32>
    %340 = arith.divf %338, %339 : vector<4x32xf32>
    %341 = arith.addf %332, %325 : vector<4x32xf32>
    %342 = arith.negf %341 : vector<4x32xf32>
    %343 = math.exp %342 : vector<4x32xf32>
    %cst_184 = arith.constant 1.000000e+00 : f32
    %344 = vector.broadcast %cst_184 : f32 to vector<4x32xf32>
    %345 = arith.addf %344, %343 : vector<4x32xf32>
    %346 = arith.divf %344, %345 : vector<4x32xf32>
    %347 = arith.mulf %340, %328 : vector<4x32xf32>
    %348 = arith.addf %334, %347 : vector<4x32xf32>
    %349 = math.tanh %348 : vector<4x32xf32>
    %cst_185 = arith.constant 1.000000e+00 : f32
    %350 = vector.broadcast %cst_185 : f32 to vector<4x32xf32>
    %351 = arith.subf %350, %346 : vector<4x32xf32>
    %352 = arith.mulf %351, %349 : vector<4x32xf32>
    %353 = arith.mulf %346, %315 : vector<4x32xf32>
    %354 = arith.addf %352, %353 : vector<4x32xf32>
    %c0_186 = arith.constant 0 : index
    %c7_187 = arith.constant 7 : index
    %c0_188 = arith.constant 0 : index
    %355 = vector.load %arg13[%c0_186, %c7_187, %c0_188] : memref<4x8x32xf32, #tpu.memory_space<vmem>>, vector<4x1x32xf32>
    %356 = vector.shape_cast %355 : vector<4x1x32xf32> to vector<4x32xf32>
    %357 = vector.shape_cast %354 : vector<4x32xf32> to vector<4x1x32xf32>
    tpu.vector_store %arg13[%c0_186, %c7_187, %c0_188], %357 {strides = array<i32>} : memref<4x8x32xf32, #tpu.memory_space<vmem>>, vector<4x1x32xf32>,
    %c0_189 = arith.constant 0 : index
    %c0_190 = arith.constant 0 : index
    %358 = vector.load %arg12[%c0_189, %c0_190] : memref<4x32xf32, #tpu.memory_space<vmem>>, vector<4x32xf32>
    tpu.vector_store %arg12[%c0_189, %c0_190], %354 {strides = array<i32>} : memref<4x32xf32, #tpu.memory_space<vmem>>, vector<4x32xf32>,
    %c0_191 = arith.constant 0 : index
    %c0_192 = arith.constant 0 : index
    %c0_193 = arith.constant 0 : index
    %359 = vector.load %arg13[%c0_191, %c0_192, %c0_193] : memref<4x8x32xf32, #tpu.memory_space<vmem>>, vector<4x8x32xf32>
    %360 = arith.truncf %359 : vector<4x8x32xf32> to vector<4x8x32xbf16>
    %361 = vector.shape_cast %360 : vector<4x8x32xbf16> to vector<32x32xbf16>
    %c0_194 = arith.constant 0 : index
    %c0_195 = arith.constant 0 : index
    %362 = vector.load %arg8[%c0_194, %c0_195] : memref<32x16xbf16, #tpu.memory_space<vmem>>, vector<32x16xbf16>
    %cst_196 = arith.constant dense<0.000000e+00> : vector<32x16xf32>
    %363 = tpu.matmul %361, %362, %cst_196 {dimension_numbers = #tpu.dot_dimension_numbers<[1], [0], [0], [1], [0, 0, 1, 1], [], []>} : vector<32x32xbf16>, vector<32x16xbf16>, vector<32x16xf32> -> vector<32x16xf32>
    %c0_197 = arith.constant 0 : index
    %c0_198 = arith.constant 0 : index
    %364 = vector.load %arg9[%c0_197, %c0_198] : memref<1x16xf32, #tpu.memory_space<vmem>>, vector<1x16xf32>
    %365 = vector.broadcast %364 : vector<1x16xf32> to vector<32x16xf32>
    %366 = arith.addf %363, %365 : vector<32x16xf32>
    %cst_199 = arith.constant dense<0xFF800000> : vector<32xf32>
    %367 = vector.multi_reduction <maximumf>, %366, %cst_199 [1] : vector<32x16xf32> to vector<32xf32>
    %368 = vector.shape_cast %367 : vector<32xf32> to vector<32x1xf32>
    %369 = vector.broadcast %368 : vector<32x1xf32> to vector<32x16xf32>
    %370 = arith.subf %366, %369 : vector<32x16xf32>
    %371 = math.exp %370 : vector<32x16xf32>
    %cst_200 = arith.constant dense<0.000000e+00> : vector<32xf32>
    %372 = vector.multi_reduction <add>, %371, %cst_200 [1] : vector<32x16xf32> to vector<32xf32>
    %373 = vector.shape_cast %372 : vector<32xf32> to vector<32x1xf32>
    %374 = math.log %373 : vector<32x1xf32>
    %375 = vector.broadcast %374 : vector<32x1xf32> to vector<32x16xf32>
    %376 = arith.subf %370, %375 : vector<32x16xf32>
    %377 = vector.shape_cast %376 : vector<32x16xf32> to vector<4x8x16xf32>
    %c0_201 = arith.constant 0 : index
    %c0_202 = arith.constant 0 : index
    %c0_203 = arith.constant 0 : index
    %378 = vector.load %arg10[%c0_201, %c0_202, %c0_203] : memref<4x8x16xf32, #tpu.memory_space<vmem>>, vector<4x8x16xf32>
    tpu.vector_store %arg10[%c0_201, %c0_202, %c0_203], %377 {strides = array<i32>} : memref<4x8x16xf32, #tpu.memory_space<vmem>>, vector<4x8x16xf32>,
    %c0_i32_204 = arith.constant 0 : i32
    %379 = arith.cmpi eq, %arg1, %c0_i32_204 : i32
    %380 = arith.extui %379 : i1 to i32
    %c0_i32_205 = arith.constant 0 : i32
    %381 = arith.cmpi ne, %380, %c0_i32_205 : i32
    scf.if %381 {
      %c0_206 = arith.constant 0 : index
      %c0_207 = arith.constant 0 : index
      %382 = vector.load %arg11[%c0_206, %c0_207] : memref<4x32xf32, #tpu.memory_space<vmem>>, vector<4x32xf32>
      tpu.vector_store %arg11[%c0_206, %c0_207], %354 {strides = array<i32>} : memref<4x32xf32, #tpu.memory_space<vmem>>, vector<4x32xf32>,
    } else {
    }
    return
  }
  func.func @transform_0(%arg0: i32, %arg1: i32) -> (i32, i32, i32) {
    %c0_i32 = arith.constant 0 : i32
    %c0_i32_0 = arith.constant 0 : i32
    return %arg0, %arg1, %c0_i32 : i32, i32, i32
  }
  func.func @transform_1(%arg0: i32, %arg1: i32) -> (i32, i32) {
    %c0_i32 = arith.constant 0 : i32
    %c0_i32_0 = arith.constant 0 : i32
    return %arg0, %c0_i32 : i32, i32
  }
  func.func @transform_2(%arg0: i32, %arg1: i32) -> (i32, i32, i32) {
    %c0_i32 = arith.constant 0 : i32
    %c0_i32_0 = arith.constant 0 : i32
    %c0_i32_1 = arith.constant 0 : i32
    %c0_i32_2 = arith.constant 0 : i32
    return %c0_i32, %c0_i32_0, %c0_i32_1 : i32, i32, i32
  }
  func.func @transform_3(%arg0: i32, %arg1: i32) -> (i32, i32, i32) {
    %c0_i32 = arith.constant 0 : i32
    %c0_i32_0 = arith.constant 0 : i32
    %c0_i32_1 = arith.constant 0 : i32
    %c0_i32_2 = arith.constant 0 : i32
    return %c0_i32, %c0_i32_0, %c0_i32_1 : i32, i32, i32
  }
  func.func @transform_4(%arg0: i32, %arg1: i32) -> (i32, i32, i32) {
    %c0_i32 = arith.constant 0 : i32
    %c0_i32_0 = arith.constant 0 : i32
    %c0_i32_1 = arith.constant 0 : i32
    %c0_i32_2 = arith.constant 0 : i32
    return %c0_i32, %c0_i32_0, %c0_i32_1 : i32, i32, i32
  }
  func.func @transform_5(%arg0: i32, %arg1: i32) -> (i32, i32, i32) {
    %c0_i32 = arith.constant 0 : i32
    %c0_i32_0 = arith.constant 0 : i32
    %c0_i32_1 = arith.constant 0 : i32
    %c0_i32_2 = arith.constant 0 : i32
    return %c0_i32, %c0_i32_0, %c0_i32_1 : i32, i32, i32
  }
  func.func @transform_6(%arg0: i32, %arg1: i32) -> (i32, i32) {
    %c0_i32 = arith.constant 0 : i32
    %c0_i32_0 = arith.constant 0 : i32
    %c0_i32_1 = arith.constant 0 : i32
    return %c0_i32, %c0_i32_0 : i32, i32
  }
  func.func @transform_7(%arg0: i32, %arg1: i32) -> (i32, i32) {
    %c0_i32 = arith.constant 0 : i32
    %c0_i32_0 = arith.constant 0 : i32
    %c0_i32_1 = arith.constant 0 : i32
    return %c0_i32, %c0_i32_0 : i32, i32
  }
  func.func @transform_8(%arg0: i32, %arg1: i32) -> (i32, i32, i32) {
    %c0_i32 = arith.constant 0 : i32
    %c0_i32_0 = arith.constant 0 : i32
    return %arg0, %arg1, %c0_i32 : i32, i32, i32
  }
  func.func @transform_9(%arg0: i32, %arg1: i32) -> (i32, i32) {
    %c0_i32 = arith.constant 0 : i32
    %c0_i32_0 = arith.constant 0 : i32
    return %arg0, %c0_i32 : i32, i32
  }
}

</mosaic_0001>

<bundles_post_ra>
// kernel: seq_decoder_forward.1
= control target key start
LH: loop header
LB: loop body
LE: loop exit
PB: predicated region body
PF: predicated region fallthrough
CT: control target
= control target key end

     0   :  { %15 = vsyncpa [#allocation8], 0  ;;  %s4337_s0 = inlined_call_operand.hbm [shape: f32[4,8,32], index: 0, kind: input, shape index: {}]   ;;  %s4338_s1 = inlined_call_operand.vmem [shape: f32[4,32], index: 1, kind: input, shape index: {}]   ;;  %s4339_s2 = inlined_call_operand.hbm [shape: bf16[3,32,32], index: 2, kind: input, shape index: {}]   ;;  %s4340_s3 = inlined_call_operand.vmem [shape: f32[3,1,32], index: 3, kind: input, shape index: {}]   ;;  %s4341_s4 = inlined_call_operand.hbm [shape: bf16[3,32,32], index: 4, kind: input, shape index: {}]   ;;  %s4342_s5 = inlined_call_operand.vmem [shape: f32[3,1,32], index: 5, kind: input, shape index: {}]   ;;  %s4343_s6 = inlined_call_operand.vmem [shape: bf16[32,16], index: 6, kind: input, shape index: {}]   ;;  %s4344_s7 = inlined_call_operand.vmem [shape: f32[1,16], index: 7, kind: input, shape index: {}]   ;;  %s4345_s8 = inlined_call_operand.hbm [shape: f32[4,8,16], index: 8, kind: output, shape index: {0}]   ;;  %s4346_s9 = inlined_call_operand.hbm [shape: f32[4,32], index: 9, kind: output, shape index: {1}]  }
   0x1   :  { %16 = vsyncpa [#allocation11], 0 }
   0x2   :  { %17 = vsyncpa [#allocation9], 0 }
   0x3   :  { %18 = vsyncpa [#allocation15], 0  ;;  %s3664_s30 = smov [#allocation10]   ;;  %s3546_s13 = scalar_lea.hbm %s4339_s2, 768 }
   0x4   :  { %s38_s10 = sshll.u32 %s3664_s30, 4  ;;  %p3547_p0 = scmp.ne.s32.totalorder %s4339_s2, %s3546_s13  ;;  %s39_s10 = int_to_ptr.vmem [resolvable:$true] %s38_s10 }
   0x5   :  { %p3550_p1 = scmp.lt.u32.totalorder %s3546_s13, %s4339_s2 }
   0x7   :  { %p3552_p2 = pnand %p3550_p1, %p3547_p0 }
   0x9   :  { %3555 = shalt.err (!%p3552_p2)
}
   0xa   :  { %s3556_s18 = scalar_lea.vmem %s39_s10, 768  ;;  %p3561_p4 = scmp.lt.s32.totalorder %s39_s10, %s39_s10 }
   0xb   :  { %p3557_p3 = scmp.ne.s32.totalorder %s39_s10, %s3556_s18  ;;  %p3562_p5 = scmp.lt.s32.totalorder %s3556_s18, %s3556_s18 }
   0xd   :  { %p3563_p6 = por %p3562_p5, %p3561_p4 }
   0xf   :  { %p3564_p7 = pnand %p3563_p6, %p3557_p3 }
  0x11   :  { %3567 = shalt.err (!%p3564_p7)
}
  0x12   :  { %s3665_s19 = smov 64   ;;  %s3666_s20 = smov 4  }
  0x13   :  { %44 = dma.hbm_to_vmem [thread:$0]  %s4339_s2, 768, %s39_s10, [#allocation11], %s3665_s19, %s3665_s19, %s3666_s20  }
  0x14   :  { %s3667_s23 = smov [#allocation7]   ;;  %s3568_s27 = scalar_lea.hbm %s4337_s0, 512 }
  0x15   :  { %s24_s24 = sshll.u32 %s3667_s23, 4  ;;  %p3569_p8 = scmp.ne.s32.totalorder %s4337_s0, %s3568_s27  ;;  %s25_s24 = int_to_ptr.vmem [resolvable:$true] %s24_s24 }
  0x16   :  { %p3572_p9 = scmp.lt.u32.totalorder %s3568_s27, %s4337_s0 }
  0x18   :  { %p3574_p10 = pnand %p3572_p9, %p3569_p8 }
  0x1a   :  { %3577 = shalt.err (!%p3574_p10)
}
  0x1b   :  { %s3578_s12 = scalar_lea.vmem %s25_s24, 512  ;;  %p3583_p12 = scmp.lt.s32.totalorder %s25_s24, %s25_s24 }
  0x1c   :  { %p3579_p11 = scmp.ne.s32.totalorder %s25_s24, %s3578_s12  ;;  %p3584_p13 = scmp.lt.s32.totalorder %s3578_s12, %s3578_s12 }
  0x1e   :  { %p3585_p0 = por %p3584_p13, %p3583_p12 }
  0x20   :  { %p3586_p1 = pnand %p3585_p0, %p3579_p11 }
  0x22   :  { %3589 = shalt.err (!%p3586_p1)
}
  0x23   :  { %s3668_s2 = smov 128   ;;  %s3669_s10 = smov 8  }
  0x24   :  { %30 = dma.hbm_to_vmem [thread:$0]  %s4337_s0, 512, %s25_s24, [#allocation8], %s3668_s2, %s3668_s2, %s3669_s10  }
  0x25   :  { %s3670_s15 = smov [#allocation12]   ;;  %s3590_s21 = scalar_lea.hbm %s4341_s4, 768 }
  0x26   :  { %s52_s16 = sshll.u32 %s3670_s15, 4  ;;  %p3591_p2 = scmp.ne.s32.totalorder %s4341_s4, %s3590_s21  ;;  %s53_s16 = int_to_ptr.vmem [resolvable:$true] %s52_s16 }
  0x27   :  { %p3594_p3 = scmp.lt.u32.totalorder %s3590_s21, %s4341_s4 }
  0x29   :  { %p3596_p4 = pnand %p3594_p3, %p3591_p2 }
  0x2b   :  { %3599 = shalt.err (!%p3596_p4)
}
  0x2c   :  { %s3600_s27 = scalar_lea.vmem %s53_s16, 768  ;;  %p3605_p6 = scmp.lt.s32.totalorder %s53_s16, %s53_s16 }
  0x2d   :  { %p3601_p5 = scmp.ne.s32.totalorder %s53_s16, %s3600_s27  ;;  %p3606_p7 = scmp.lt.s32.totalorder %s3600_s27, %s3600_s27 }
  0x2f   :  { %p3607_p8 = por %p3606_p7, %p3605_p6 }
  0x31   :  { %p3608_p9 = pnand %p3607_p8, %p3601_p5 }
  0x33   :  { %3611 = shalt.err (!%p3608_p9)
}
  0x34   :  { %58 = dma.hbm_to_vmem [thread:$0]  %s4341_s4, 768, %s53_s16, [#allocation11], %s3665_s19, %s3665_s19, %s3666_s20  }
  0x35   :  { %3656 = dma.done.wait [#allocation8], 512  }
  0x36   :  { %3657 = vsyncadd [#allocation8], 4294966784 }
  0x37   :  { %3658 = dma.done.wait [#allocation11], 1536  }
  0x38   :  { %3659 = vsyncadd [#allocation11], 4294965760  ;;  %v3185_v0 = vld [vmem:[#allocation10] sm:$0xff]   ;;  %v3186_v1 = vld [vmem:[#allocation10 + $0x10] sm:$0xff]   ;;  %vm123_vm0 = vcmask 261120   ;;  %vm80_vm1 = vcmask 257024  }
  0x39   :  { %2950 = vmatprep.subr.bf16.mxu0 %v3185_v0  ;;  %v3187_v2 = vld [vmem:[#allocation10 + $0x8] sm:$0xff]   ;;  %2958 = vmatprep.subr.bf16.mxu1 %v3186_v1  ;;  %v3188_v3 = vld [vmem:[#allocation10 + $0x18] sm:$0xff]   ;;  %v82_v4 = vld [vmem:[#allocation7] sm:$0xff]  ;;  %v3671_v13 = vmov 0.0   ;;  %vm3672_vm2 = vmmov 0   ;;  %vm665_vm3 = vcmask 253952  }
  0x3a   :  { %2951 = vmatpush3.bf16.msra.mxu0 %v3185_v0  ;;  %2959 = vmatpush3.bf16.msra.mxu1 %v3186_v1  ;;  %v83_v5 = vld [vmem:[#allocation7 + $0x8] sm:$0xff]  ;;  %v84_v6 = vld [vmem:[#allocation7 + $0x10] sm:$0xff]  ;;  %v85_v8 = vld [vmem:[#allocation7 + $0x18] sm:$0xff]  ;;  %vm683_vm4 = vcmask 1041409   ;;  %vm686_vm5 = vcmask 1042434   ;;  %vm689_vm6 = vcmask 1043459  }
  0x3b   :  { %2952 = vmatprep.subr.bf16.mxu0 %v3187_v2  ;;  %2960 = vmatprep.subr.bf16.mxu1 %v3188_v3  ;;  %v2858_v7 = vpack.c.bf16 %v83_v5, %v82_v4  ;;  %v2859_v9 = vpack.c.bf16 %v85_v8, %v84_v6  ;;  %v3189_v10 = vld [vmem:[#allocation10 + $0x20] sm:$0xff]   ;;  %v3771_v11 = vld [vmem:[#allocation12] sm:$0xff]   ;;  %v3191_v12 = vld [vmem:[#allocation10 + $0x28] sm:$0xff]   ;;  %vm2644_vm7 = vcmask 130048  }
  0x3c   :  { %v79_v14 = vld [vmem:[%s4338_s1] sm:$0xf]  ;;  %v3788_v16 = vld [vmem:[#allocation12 + $0x10] sm:$0xff]   ;;  %v3795_v18 = vld [vmem:[#allocation12 + $0x20] sm:$0xff]  }
  0x3d   :  { %2954 = vmatprep.mubr.msk.bf16.mxu0 %vm123_vm0, %v2858_v7  ;;  %2962 = vmatprep.mubr.msk.bf16.mxu1 %vm123_vm0, %v2858_v7  ;;  %81 = vst.msk [vmem:[#allocation2] sm:$0xf] %vm80_vm1, %v79_v14  ;;  %v3782_v15 = vld [vmem:[#allocation12 + $0x8] sm:$0xff]   ;;  %v3801_v20 = vld [vmem:[#allocation12 + $0x18] sm:$0xff]  }
  0x3e   :  { %2953 = vmatpush3.bf16.msra.mxu0 %v3187_v2  ;;  %2961 = vmatpush3.bf16.msra.mxu1 %v3188_v3  ;;  %v3808_v21 = vld [vmem:[#allocation12 + $0x28] sm:$0xff]  }
  0x3f   :  { %2966 = vmatprep.subr.bf16.mxu0 %v3189_v10  ;;  %2974 = vmatprep.subr.bf16.mxu1 %v3671_v13  ;;  %v2733_v22 = vld [vmem:[%s4340_s3] ss:$0 sm:$0xff]  ;;  %v2741_v23 = vld [vmem:[%s4340_s3 + $0x1] ss:$0 sm:$0xff]  ;;  %v2747_v40 = vld [vmem:[%s4340_s3 + $0x2] ss:$0 sm:$0xff] }
  0x40   :  { %v3851_v41 = vld [vmem:[%s4342_s5] ss:$0 sm:$0xff]  ;;  %v3861_v3 = vld [vmem:[%s4342_s5 + $0x1] ss:$0 sm:$0xff] }
  0x41   :  { %2955 = vmatmul.mubr.msk.bf16.vlgmr.msra.gmra.mrb[0].mxu0 %vm123_vm0, %v2859_v9  ;;  %2963 = vmatmul.mubr.msk.bf16.vlgmr.msra.gmra.mrb[0].mxu1 %vm123_vm0, %v2859_v9 }
  0x42   :  { %2967 = vmatpush3.bf16.msra.mxu0 %v3189_v10  ;;  %2975 = vmatpush3.bf16.msra.mxu1 %v3771_v11 }
  0x43   :  { %2968 = vmatprep.subr.bf16.mxu0 %v3191_v12  ;;  %2976 = vmatprep.subr.bf16.mxu1 %v3671_v13 }
  0x44   :  { %2970 = vmatprep.mubr.msk.bf16.mxu0 %vm123_vm0, %v2858_v7  ;;  %2978 = vmatprep.mubr.msk.bf16.mxu1 %vm3672_vm2, %v3671_v13  ;;  %v3792_v17 = vld [vmem:[#allocation2] sm:$0xf] }
  0x45   :  { %v359_v19 = vpack.c.bf16 %v3792_v17, %v3792_v17 }
  0x46   :  { %2969 = vmatpush3.bf16.msra.mxu0 %v3191_v12  ;;  %2977 = vmatpush3.bf16.msra.mxu1 %v3782_v15 }
  0x47   :  { %2982 = vmatprep.subr.bf16.mxu0 %v3671_v13  ;;  %2990 = vmatprep.subr.bf16.mxu1 %v3671_v13 }
  0x49   :  { %2971 = vmatmul.mubr.msk.bf16.vlgmr.msra.gmra.mrb[4].mxu0 %vm123_vm0, %v2859_v9  ;;  %2979 = vmatmul.mubr.msk.bf16.vlgmr.msra.gmra.mrb[4].mxu1 %vm123_vm0, %v359_v19 }
  0x4a   :  { %2983 = vmatpush3.bf16.msra.mxu0 %v3788_v16  ;;  %2986 = vmatprep.mubr.msk.bf16.mxu0 %vm3672_vm2, %v3671_v13 }
  0x4b   :  { %2984 = vmatprep.subr.bf16.mxu0 %v3671_v13  ;;  %2991 = vmatpush3.bf16.msra.mxu1 %v3795_v18 }
  0x4c   :  { %2994 = vmatprep.mubr.msk.bf16.mxu1 %vm3672_vm2, %v3671_v13  ;;  %2992 = vmatprep.subr.bf16.mxu1 %v3671_v13 }
  0x4e   :  { %2985 = vmatpush3.bf16.msra.mxu0 %v3801_v20 }
  0x4f   :  { %2998 = vmatprep.subr.bf16.mxu0 %v3671_v13  ;;  %2993 = vmatpush3.bf16.msra.mxu1 %v3808_v21 }
  0x50   :  { %3006 = vmatprep.subr.bf16.mxu1 %v3671_v13 }
  0x51   :  { %2987 = vmatmul.mubr.msk.bf16.vlgmr.msra.gmra.mrb[8].mxu0 %vm123_vm0, %v359_v19 }
  0x52   :  { %2999 = vmatpush3.bf16.msra.mxu0 %v3771_v11  ;;  %3002 = vmatprep.mubr.msk.bf16.mxu0 %vm3672_vm2, %v3671_v13 }
  0x53   :  { %2995 = vmatmul.mubr.msk.bf16.vlgmr.msra.gmra.mrb[8].mxu1 %vm123_vm0, %v359_v19  ;;  %3000 = vmatprep.subr.bf16.mxu0 %v3671_v13 }
  0x54   :  { %3007 = vmatpush3.bf16.msra.mxu1 %v3788_v16  ;;  %3010 = vmatprep.mubr.msk.bf16.mxu1 %vm3672_vm2, %v3671_v13 }
  0x55   :  { %3008 = vmatprep.subr.bf16.mxu1 %v3671_v13 }
  0x56   :  { %3001 = vmatpush3.bf16.msra.mxu0 %v3782_v15 }
  0x57   :  { %3014 = vmatprep.subr.bf16.mxu0 %v3671_v13 }
  0x58   :  { %3009 = vmatpush3.bf16.msra.mxu1 %v3801_v20 }
  0x59   :  { %3022 = vmatprep.subr.bf16.mxu1 %v3671_v13 }
 0x114   :  { %v2956_v24 = vpop.f32.mrb[0].mxu0  ;;  %v2964_v26 = vpop.f32.mrb[0].mxu1 }
 0x115   :  { %v173_v25 = vadd.f32 %v2956_v24, %v2733_v22  ;;  %v164_v27 = vpop.f32.mrb[1].mxu0  ;;  %v251_v28 = vadd.f32 %v2964_v26, %v2741_v23  ;;  %v242_v30 = vpop.f32.mrb[1].mxu1 }
 0x116   :  { %v165_v29 = vadd.f32 %v2733_v22, %v164_v27  ;;  %v2957_v31 = vpop.f32.mrb[2].mxu0  ;;  %v243_v32 = vadd.f32 %v2741_v23, %v242_v30  ;;  %v2965_v34 = vpop.f32.mrb[2].mxu1 }
 0x117   :  { %181 = vst.msk [vmem:[#allocation4 + $0x10] sm:$0xff] %vm123_vm0, %v173_v25  ;;  %v176_v33 = vadd.f32 %v2957_v31, %v2733_v22  ;;  %v167_v35 = vpop.f32.mrb[3].mxu0  ;;  %259 = vst.msk [vmem:[#allocation5 + $0x10] sm:$0xff] %vm123_vm0, %v251_v28  ;;  %v254_v36 = vadd.f32 %v2965_v34, %v2741_v23  ;;  %v245_v38 = vpop.f32.mrb[3].mxu1 }
 0x118   :  { %179 = vst.msk [vmem:[#allocation4] sm:$0xff] %vm123_vm0, %v165_v29  ;;  %v168_v37 = vadd.f32 %v2733_v22, %v167_v35  ;;  %257 = vst.msk [vmem:[#allocation5] sm:$0xff] %vm123_vm0, %v243_v32  ;;  %v246_v39 = vadd.f32 %v2741_v23, %v245_v38 }
 0x119   :  { %182 = vst.msk [vmem:[#allocation4 + $0x18] sm:$0xff] %vm123_vm0, %v176_v33  ;;  %260 = vst.msk [vmem:[#allocation5 + $0x18] sm:$0xff] %vm123_vm0, %v254_v36 }
 0x11a   :  { %180 = vst.msk [vmem:[#allocation4 + $0x8] sm:$0xff] %vm123_vm0, %v168_v37  ;;  %258 = vst.msk [vmem:[#allocation5 + $0x8] sm:$0xff] %vm123_vm0, %v246_v39 }
 0x11c   :  { %v2972_v42 = vpop.f32.mrb[4].mxu0  ;;  %v415_v45 = vpop.f32.mrb[4].mxu1 }
 0x11d   :  { %v329_v43 = vadd.f32 %v2972_v42, %v2747_v40  ;;  %v320_v44 = vpop.f32.mrb[5].mxu0  ;;  %v416_v48 = vadd.f32 %v3851_v41, %v415_v45  ;;  %v2980_v50 = vpop.f32.mrb[5].mxu1 }
 0x11e   :  { %v321_v46 = vadd.f32 %v2747_v40, %v320_v44  ;;  %v2973_v47 = vpop.f32.mrb[6].mxu0  ;;  %v418_v54 = vpop.f32.mrb[6].mxu1  ;;  %v539_v62 = vld [vmem:[#allocation4 + $0x10] sm:$0x1] }
 0x11f   :  { %v537_v49 = vld [vmem:[#allocation4] sm:$0x1]  ;;  %337 = vst.msk [vmem:[#allocation6 + $0x10] sm:$0xff] %vm123_vm0, %v329_v43  ;;  %v332_v51 = vadd.f32 %v2973_v47, %v2747_v40  ;;  %v323_v52 = vpop.f32.mrb[7].mxu0  ;;  %v550_v57 = vrot.slane %v416_v48, 1  ;;  %v551_v58 = vrot.slane %v416_v48, 2 }
 0x120   :  { %v540_v53 = vld [vmem:[#allocation4 + $0x18] sm:$0x1]  ;;  %335 = vst.msk [vmem:[#allocation6] sm:$0xff] %vm123_vm0, %v321_v46  ;;  %v324_v55 = vadd.f32 %v2747_v40, %v323_v52  ;;  %v552_v59 = vrot.slane %v416_v48, 3  ;;  %v557_v60 = vadd.f32 %v537_v49, %v416_v48  ;;  %v2981_v61 = vpop.f32.mrb[7].mxu1 }
 0x121   :  { %v538_v56 = vld [vmem:[#allocation4 + $0x8] sm:$0x1]  ;;  %338 = vst.msk [vmem:[#allocation6 + $0x18] sm:$0xff] %vm123_vm0, %v332_v51  ;;  %v559_v0 = vadd.f32 %v551_v58, %v539_v62  ;;  %v543_v12 = vld [vmem:[#allocation5 + $0x10] sm:$0x1] }
 0x122   :  { %336 = vst.msk [vmem:[#allocation6 + $0x8] sm:$0xff] %vm123_vm0, %v324_v55  ;;  %v558_v63 = vadd.f32 %v550_v57, %v538_v56  ;;  %v560_v1 = vadd.f32 %v552_v59, %v540_v53  ;;  %v2766_v2 = vmul.f32 -1.442695, %v557_v60  ;;  %v541_v22 = vld [vmem:[#allocation5] sm:$0x1] }
 0x123   :  { %v2768_v6 = vmul.f32 -1.442695, %v559_v0  ;;  %v542_v27 = vld [vmem:[#allocation5 + $0x8] sm:$0x1]  ;;  %v544_v28 = vld [vmem:[#allocation5 + $0x18] sm:$0x1] }
 0x124   :  { %v473_v4 = vpop.f32.mrb[8].mxu0  ;;  %3199 = vpow2.f32 %v2766_v2  ;;  %v2767_v5 = vmul.f32 -1.442695, %v558_v63  ;;  %v2769_v7 = vmul.f32 -1.442695, %v560_v1 }
 0x125   :  { %v474_v8 = vadd.f32 %v3861_v3, %v473_v4  ;;  %v2988_v9 = vpop.f32.mrb[9].mxu0  ;;  %v3867_v48 = vld [vmem:[%s4342_s5 + $0x2] ss:$0 sm:$0xff] }
 0x126   :  { %v531_v10 = vpop.f32.mrb[8].mxu1  ;;  %3201 = vpow2.f32 %v2767_v5  ;;  %v476_v14 = vpop.f32.mrb[10].mxu0 }
 0x127   :  { %v2996_v19 = vpop.f32.mrb[9].mxu1  ;;  %3203 = vpow2.f32 %v2768_v6  ;;  %v586_v23 = vrot.slane %v474_v8, 1  ;;  %v587_v24 = vrot.slane %v474_v8, 2  ;;  %v588_v25 = vrot.slane %v474_v8, 3  ;;  %v2989_v26 = vpop.f32.mrb[11].mxu0 }
 0x128   :  { %3205 = vpow2.f32 %v2769_v7  ;;  %v593_v29 = vadd.f32 %v541_v22, %v474_v8  ;;  %v534_v30 = vpop.f32.mrb[10].mxu1  ;;  %v532_v50 = vadd.f32 %v3867_v48, %v531_v10  ;;  %v545_v0 = vld [vmem:[#allocation6] sm:$0x1]  ;;  %v547_v8 = vld [vmem:[#allocation6 + $0x10] sm:$0x1] }
 0x129   :  { %v594_v31 = vadd.f32 %v586_v23, %v542_v27  ;;  %v595_v32 = vadd.f32 %v587_v24, %v543_v12  ;;  %v596_v33 = vadd.f32 %v588_v25, %v544_v28  ;;  %v2997_v34 = vpop.f32.mrb[11].mxu1  ;;  %v546_v6 = vld [vmem:[#allocation6 + $0x8] sm:$0x1]  ;;  %v548_v12 = vld [vmem:[#allocation6 + $0x18] sm:$0x1]  ;;  %v650_v27 = vrot.slane %v3792_v17, 1 }
 0x12a   :  { %v2770_v35 = vmul.f32 -1.442695, %v593_v29  ;;  %v622_v57 = vrot.slane %v532_v50, 1  ;;  %v623_v60 = vrot.slane %v532_v50, 2  ;;  %v624_v61 = vrot.slane %v532_v50, 3 }
 0x12b   :  { %v2771_v36 = vmul.f32 -1.442695, %v594_v31  ;;  %v2772_v37 = vmul.f32 -1.442695, %v595_v32  ;;  %v2773_v38 = vmul.f32 -1.442695, %v596_v33 }
 0x12c   :  { %3207 = vpow2.f32 %v2770_v35  ;;  %v651_v29 = vrot.slane %v3792_v17, 2  ;;  %v652_v33 = vrot.slane %v3792_v17, 3 }
 0x12d   :  { %3209 = vpow2.f32 %v2771_v36 }
 0x12e   :  { %v3200_v39 = vpop.eup %3199  ;;  %3211 = vpow2.f32 %v2772_v37 }
 0x12f   :  { %v573_v40 = vadd.f32 1.0, %v3200_v39  ;;  %3213 = vpow2.f32 %v2773_v38 }
 0x130   :  { %v3202_v42 = vpop.eup %3201 }
 0x131   :  { %v3204_v43 = vpop.eup %3203  ;;  %v574_v44 = vadd.f32 1.0, %v3202_v42  ;;  %3215 = vrcp.f32 %v573_v40 }
 0x132   :  { %v3206_v45 = vpop.eup %3205  ;;  %v575_v46 = vadd.f32 1.0, %v3204_v43 }
 0x133   :  { %v576_v47 = vadd.f32 1.0, %v3206_v45  ;;  %3217 = vrcp.f32 %v574_v44 }
 0x134   :  { %3219 = vrcp.f32 %v575_v46 }
 0x135   :  { %3221 = vrcp.f32 %v576_v47 }
 0x136   :  { %v3208_v49 = vpop.eup %3207 }
 0x137   :  { %v3210_v51 = vpop.eup %3209  ;;  %v609_v53 = vadd.f32 1.0, %v3208_v49 }
 0x138   :  { %v3212_v52 = vpop.eup %3211  ;;  %v610_v55 = vadd.f32 1.0, %v3210_v51 }
 0x139   :  { %v3214_v54 = vpop.eup %3213  ;;  %v611_v56 = vadd.f32 1.0, %v3212_v52  ;;  %3223 = vrcp.f32 %v609_v53 }
 0x13a   :  { %v612_v59 = vadd.f32 1.0, %v3214_v54  ;;  %3225 = vrcp.f32 %v610_v55 }
 0x13b   :  { %v3216_v58 = vpop.eup %3215  ;;  %3227 = vrcp.f32 %v611_v56 }
 0x13c   :  { %v629_v62 = vmul.f32 %v3216_v58, %v532_v50  ;;  %3229 = vrcp.f32 %v612_v59 }
 0x13d   :  { %v3218_v63 = vpop.eup %3217 }
 0x13e   :  { %v3220_v1 = vpop.eup %3219  ;;  %v630_v2 = vmul.f32 %v3218_v63, %v622_v57  ;;  %v633_v4 = vadd.f32 %v629_v62, %v545_v0 }
 0x13f   :  { %v3222_v5 = vpop.eup %3221  ;;  %v631_v7 = vmul.f32 %v3220_v1, %v623_v60 }
 0x140   :  { %v632_v9 = vmul.f32 %v3222_v5, %v624_v61  ;;  %v634_v10 = vadd.f32 %v630_v2, %v546_v6  ;;  %3231 = vtanh.f32 %v633_v4 }
 0x141   :  { %v635_v14 = vadd.f32 %v631_v7, %v547_v8  ;;  %v815_v8 = vld [vmem:[#allocation4 + $0x1] sm:$0x1] }
 0x142   :  { %v636_v19 = vadd.f32 %v632_v9, %v548_v12  ;;  %3233 = vtanh.f32 %v634_v10  ;;  %v816_v9 = vld [vmem:[#allocation4 + $0x9] sm:$0x1]  ;;  %v817_v10 = vld [vmem:[#allocation4 + $0x11] sm:$0x1] }
 0x143   :  { %3235 = vtanh.f32 %v635_v14  ;;  %v3224_v22 = vpop.eup %3223 }
 0x144   :  { %3237 = vtanh.f32 %v636_v19  ;;  %v3226_v23 = vpop.eup %3225  ;;  %v641_v26 = vsub.f32 1.0, %v3224_v22  ;;  %v657_v31 = vmul.f32 %v3224_v22, %v3792_v17 }
 0x145   :  { %v3228_v24 = vpop.eup %3227  ;;  %v642_v30 = vsub.f32 1.0, %v3226_v23  ;;  %v658_v38 = vmul.f32 %v3226_v23, %v650_v27  ;;  %v818_v27 = vld [vmem:[#allocation4 + $0x19] sm:$0x1] }
 0x146   :  { %v3230_v25 = vpop.eup %3229  ;;  %v643_v35 = vsub.f32 1.0, %v3228_v24  ;;  %v659_v43 = vmul.f32 %v3228_v24, %v651_v29 }
 0x147   :  { %v644_v37 = vsub.f32 1.0, %v3230_v25  ;;  %v660_v47 = vmul.f32 %v3230_v25, %v652_v33 }
 0x14a   :  { %v3232_v28 = vpop.eup %3231 }
 0x14b   :  { %v645_v32 = vmul.f32 %v3232_v28, %v641_v26 }
 0x14c   :  { %v3234_v34 = vpop.eup %3233 }
 0x14d   :  { %v3236_v36 = vpop.eup %3235  ;;  %v646_v39 = vmul.f32 %v3234_v34, %v642_v30  ;;  %v3874_v40 = vadd.f32 %v657_v31, %v645_v32 }
 0x14e   :  { %v3238_v42 = vpop.eup %3237  ;;  %v647_v44 = vmul.f32 %v3236_v36, %v643_v35  ;;  %v819_v35 = vld [vmem:[#allocation5 + $0x1] sm:$0x1]  ;;  %v820_v36 = vld [vmem:[#allocation5 + $0x9] sm:$0x1] }
 0x14f   :  { %v648_v45 = vmul.f32 %v3238_v42, %v644_v37  ;;  %v3876_v46 = vadd.f32 %v658_v38, %v646_v39  ;;  %666 = vst.msk [vmem:[#allocation3] sm:$0x1] %vm665_vm3, %v3874_v40  ;;  %v670_v50 = vpack.c.bf16 %v3874_v40, %v3874_v40  ;;  %v821_v37 = vld [vmem:[#allocation5 + $0x11] sm:$0x1] }
 0x150   :  { %v3880_v17 = vadd.f32 %v659_v43, %v647_v44 }
 0x151   :  { %667 = vst.msk [vmem:[#allocation3 + $0x8] sm:$0x1] %vm665_vm3, %v3876_v46  ;;  %v3884_v49 = vadd.f32 %v660_v47, %v648_v45  ;;  %v671_v51 = vpack.c.bf16 %v3876_v46, %v3876_v46  ;;  %v678_v56 = vunpack.c.l.b16 %v670_v50  ;;  %v822_v45 = vld [vmem:[#allocation5 + $0x19] sm:$0x1] }
 0x152   :  { %668 = vst.msk [vmem:[#allocation3 + $0x10] sm:$0x1] %vm665_vm3, %v3880_v17  ;;  %v672_v52 = vpack.c.bf16 %v3880_v17, %v3880_v17 }
 0x153   :  { %669 = vst.msk [vmem:[#allocation3 + $0x18] sm:$0x1] %vm665_vm3, %v3884_v49  ;;  %v673_v53 = vpack.c.bf16 %v3884_v49, %v3884_v49  ;;  %v679_v54 = vunpack.c.l.b16 %v671_v51 }
 0x154   :  { %v680_v55 = vunpack.c.l.b16 %v672_v52 }
 0x155   :  { %v681_v57 = vunpack.c.l.b16 %v673_v53  ;;  %v682_v58 = vrot.slane %v679_v54, 7 }
 0x156   :  { %v685_v59 = vrot.slane %v680_v55, 6 }
 0x157   :  { %v684_v60 = vsel %vm683_vm4, %v682_v58, %v678_v56  ;;  %v688_v61 = vrot.slane %v681_v57, 5 }
 0x158   :  { %v687_v62 = vsel %vm686_vm5, %v685_v59, %v684_v60 }
 0x159   :  { %v690_v63 = vsel %vm689_vm6, %v688_v61, %v687_v62 }
 0x15a   :  { %v691_v0 = vpack.c.b16 %v690_v63, %v690_v63 }
 0x15c   :  { %3003 = vmatmul.mubr.msk.bf16.vlgmr.msra.gmra.mrb[12].mxu0 %vm123_vm0, %v691_v0  ;;  %3011 = vmatmul.mubr.msk.bf16.vlgmr.msra.gmra.mrb[12].mxu1 %vm123_vm0, %v691_v0 }
 0x15d   :  { %3015 = vmatpush3.bf16.msra.mxu0 %v3795_v18  ;;  %3018 = vmatprep.mubr.msk.bf16.mxu0 %vm3672_vm2, %v3671_v13 }
 0x15e   :  { %3016 = vmatprep.subr.bf16.mxu0 %v3671_v13  ;;  %3023 = vmatpush3.bf16.msra.mxu1 %v3771_v11 }
 0x15f   :  { %3024 = vmatprep.subr.bf16.mxu1 %v3671_v13  ;;  %3026 = vmatprep.mubr.msk.bf16.mxu1 %vm3672_vm2, %v3671_v13 }
 0x161   :  { %3017 = vmatpush3.bf16.msra.mxu0 %v3808_v21 }
 0x162   :  { %3030 = vmatprep.subr.bf16.mxu0 %v3671_v13  ;;  %3025 = vmatpush3.bf16.msra.mxu1 %v3782_v15 }
 0x163   :  { %3038 = vmatprep.subr.bf16.mxu1 %v3671_v13 }
 0x164   :  { %3019 = vmatmul.mubr.msk.bf16.vlgmr.msra.gmra.mrb[16].mxu0 %vm123_vm0, %v691_v0 }
 0x165   :  { %3031 = vmatpush3.bf16.msra.mxu0 %v3788_v16  ;;  %3034 = vmatprep.mubr.msk.bf16.mxu0 %vm3672_vm2, %v3671_v13 }
 0x166   :  { %3032 = vmatprep.subr.bf16.mxu0 %v3671_v13 }
 0x169   :  { %3033 = vmatpush3.bf16.msra.mxu0 %v3801_v20 }
 0x16a   :  { %3046 = vmatprep.subr.bf16.mxu0 %v3671_v13 }
 0x22f   :  { %v729_v1 = vpop.f32.mrb[12].mxu0  ;;  %v769_v2 = vpop.f32.mrb[12].mxu1 }
 0x230   :  { %v730_v4 = vadd.f32 %v3851_v41, %v729_v1  ;;  %v770_v5 = vadd.f32 %v3861_v3, %v769_v2  ;;  %v3004_v6 = vpop.f32.mrb[13].mxu0  ;;  %v3012_v7 = vpop.f32.mrb[13].mxu1 }
 0x231   :  { %v732_v12 = vpop.f32.mrb[14].mxu0  ;;  %v772_v14 = vpop.f32.mrb[14].mxu1 }
 0x232   :  { %v828_v19 = vrot.slane %v730_v4, 1  ;;  %v829_v22 = vrot.slane %v730_v4, 2  ;;  %v830_v23 = vrot.slane %v730_v4, 3  ;;  %v835_v24 = vadd.f32 %v815_v8, %v730_v4  ;;  %v3005_v25 = vpop.f32.mrb[15].mxu0  ;;  %v3013_v26 = vpop.f32.mrb[15].mxu1 }
 0x233   :  { %v864_v28 = vrot.slane %v770_v5, 1  ;;  %v865_v29 = vrot.slane %v770_v5, 2  ;;  %v866_v30 = vrot.slane %v770_v5, 3  ;;  %v871_v38 = vadd.f32 %v819_v35, %v770_v5  ;;  %v823_v25 = vld [vmem:[#allocation6 + $0x1] sm:$0x1] }
 0x234   :  { %v836_v31 = vadd.f32 %v828_v19, %v816_v9  ;;  %v837_v32 = vadd.f32 %v829_v22, %v817_v10  ;;  %v838_v33 = vadd.f32 %v830_v23, %v818_v27  ;;  %v2777_v34 = vmul.f32 -1.442695, %v835_v24 }
 0x235   :  { %v872_v39 = vadd.f32 %v864_v28, %v820_v36  ;;  %v873_v47 = vadd.f32 %v865_v29, %v821_v37  ;;  %v874_v50 = vadd.f32 %v866_v30, %v822_v45  ;;  %v2781_v52 = vmul.f32 -1.442695, %v871_v38  ;;  %v826_v37 = vld [vmem:[#allocation6 + $0x19] sm:$0x1] }
 0x236   :  { %3239 = vpow2.f32 %v2777_v34  ;;  %v2778_v42 = vmul.f32 -1.442695, %v836_v31  ;;  %v2779_v43 = vmul.f32 -1.442695, %v837_v32  ;;  %v2780_v44 = vmul.f32 -1.442695, %v838_v33 }
 0x237   :  { %v809_v51 = vpop.f32.mrb[16].mxu0  ;;  %v2782_v54 = vmul.f32 -1.442695, %v872_v39  ;;  %v2783_v56 = vmul.f32 -1.442695, %v873_v47 }
 0x238   :  { %3241 = vpow2.f32 %v2778_v42  ;;  %v3020_v53 = vpop.f32.mrb[17].mxu0  ;;  %v2784_v58 = vmul.f32 -1.442695, %v874_v50  ;;  %v810_v9 = vadd.f32 %v3867_v48, %v809_v51  ;;  %v824_v32 = vld [vmem:[#allocation6 + $0x9] sm:$0x1] }
 0x239   :  { %3243 = vpow2.f32 %v2779_v43  ;;  %v812_v55 = vpop.f32.mrb[18].mxu0  ;;  %v825_v34 = vld [vmem:[#allocation6 + $0x11] sm:$0x1] }
 0x23a   :  { %3245 = vpow2.f32 %v2780_v44  ;;  %v3021_v57 = vpop.f32.mrb[19].mxu0  ;;  %v900_v22 = vrot.slane %v810_v9, 1  ;;  %v901_v26 = vrot.slane %v810_v9, 2  ;;  %v902_v28 = vrot.slane %v810_v9, 3 }
 0x23b   :  { %3247 = vpow2.f32 %v2781_v52 }
 0x23c   :  { %3249 = vpow2.f32 %v2782_v54 }
 0x23d   :  { %3251 = vpow2.f32 %v2783_v56 }
 0x23e   :  { %3253 = vpow2.f32 %v2784_v58 }
 0x240   :  { %v3240_v59 = vpop.eup %3239 }
 0x241   :  { %v851_v60 = vadd.f32 1.0, %v3240_v59 }
 0x242   :  { %v3242_v61 = vpop.eup %3241 }
 0x243   :  { %v3244_v62 = vpop.eup %3243  ;;  %v852_v63 = vadd.f32 1.0, %v3242_v61  ;;  %3255 = vrcp.f32 %v851_v60 }
 0x244   :  { %v3246_v0 = vpop.eup %3245  ;;  %v853_v1 = vadd.f32 1.0, %v3244_v62 }
 0x245   :  { %v854_v2 = vadd.f32 1.0, %v3246_v0  ;;  %3257 = vrcp.f32 %v852_v63  ;;  %v3248_v4 = vpop.eup %3247 }
 0x246   :  { %3259 = vrcp.f32 %v853_v1  ;;  %v3250_v5 = vpop.eup %3249  ;;  %v887_v8 = vadd.f32 1.0, %v3248_v4 }
 0x247   :  { %3261 = vrcp.f32 %v854_v2  ;;  %v3252_v6 = vpop.eup %3251  ;;  %v888_v10 = vadd.f32 1.0, %v3250_v5 }
 0x248   :  { %v3254_v7 = vpop.eup %3253  ;;  %v889_v12 = vadd.f32 1.0, %v3252_v6  ;;  %3263 = vrcp.f32 %v887_v8 }
 0x249   :  { %v890_v19 = vadd.f32 1.0, %v3254_v7  ;;  %3265 = vrcp.f32 %v888_v10 }
 0x24a   :  { %3267 = vrcp.f32 %v889_v12 }
 0x24b   :  { %3269 = vrcp.f32 %v890_v19 }
 0x24d   :  { %v3256_v14 = vpop.eup %3255 }
 0x24e   :  { %v907_v23 = vmul.f32 %v3256_v14, %v810_v9 }
 0x24f   :  { %v3258_v24 = vpop.eup %3257 }
 0x250   :  { %v3260_v27 = vpop.eup %3259  ;;  %v908_v29 = vmul.f32 %v3258_v24, %v900_v22  ;;  %v911_v30 = vadd.f32 %v907_v23, %v823_v25 }
 0x251   :  { %v3262_v31 = vpop.eup %3261  ;;  %v909_v33 = vmul.f32 %v3260_v27, %v901_v26 }
 0x252   :  { %v910_v35 = vmul.f32 %v3262_v31, %v902_v28  ;;  %v912_v36 = vadd.f32 %v908_v29, %v824_v32  ;;  %3271 = vtanh.f32 %v911_v30  ;;  %v3264_v42 = vpop.eup %3263  ;;  %v1082_v28 = vld [vmem:[#allocation4 + $0xa] sm:$0x1] }
 0x253   :  { %v913_v38 = vadd.f32 %v909_v33, %v825_v34  ;;  %v3266_v43 = vpop.eup %3265  ;;  %v919_v47 = vsub.f32 1.0, %v3264_v42  ;;  %v927_v52 = vmul.f32 %v3264_v42, %v3874_v40 }
 0x254   :  { %v914_v39 = vadd.f32 %v910_v35, %v826_v37  ;;  %3273 = vtanh.f32 %v912_v36  ;;  %v3268_v44 = vpop.eup %3267  ;;  %v920_v51 = vsub.f32 1.0, %v3266_v43  ;;  %v928_v58 = vmul.f32 %v3266_v43, %v3876_v46  ;;  %v1084_v36 = vld [vmem:[#allocation4 + $0x1a] sm:$0x1] }
 0x255   :  { %3275 = vtanh.f32 %v913_v38  ;;  %v3270_v45 = vpop.eup %3269  ;;  %v921_v55 = vsub.f32 1.0, %v3268_v44  ;;  %v929_v62 = vmul.f32 %v3268_v44, %v3880_v17 }
 0x256   :  { %3277 = vtanh.f32 %v914_v39  ;;  %v922_v57 = vsub.f32 1.0, %v3270_v45  ;;  %v930_v40 = vmul.f32 %v3270_v45, %v3884_v49 }
 0x25c   :  { %v3272_v50 = vpop.eup %3271 }
 0x25d   :  { %v923_v53 = vmul.f32 %v3272_v50, %v919_v47  ;;  %v1085_v47 = vld [vmem:[#allocation5 + $0x2] sm:$0x1]  ;;  %v1086_v50 = vld [vmem:[#allocation5 + $0xa] sm:$0x1] }
 0x25e   :  { %v3274_v54 = vpop.eup %3273 }
 0x25f   :  { %v3276_v56 = vpop.eup %3275  ;;  %v924_v59 = vmul.f32 %v3274_v54, %v920_v51  ;;  %v3927_v60 = vadd.f32 %v927_v52, %v923_v53  ;;  %v1087_v51 = vld [vmem:[#allocation5 + $0x12] sm:$0x1] }
 0x260   :  { %v3278_v61 = vpop.eup %3277  ;;  %v925_v63 = vmul.f32 %v3276_v56, %v921_v55 }
 0x261   :  { %v926_v0 = vmul.f32 %v3278_v61, %v922_v57  ;;  %v3930_v1 = vadd.f32 %v928_v58, %v924_v59  ;;  %935 = vst.msk [vmem:[#allocation3 + $0x1] sm:$0x1] %vm665_vm3, %v3927_v60  ;;  %v939_v4 = vpack.c.bf16 %v3927_v60, %v3927_v60  ;;  %v1088_v57 = vld [vmem:[#allocation5 + $0x1a] sm:$0x1] }
 0x262   :  { %v3935_v2 = vadd.f32 %v929_v62, %v925_v63 }
 0x263   :  { %936 = vst.msk [vmem:[#allocation3 + $0x9] sm:$0x1] %vm665_vm3, %v3930_v1  ;;  %v3939_v46 = vadd.f32 %v930_v40, %v926_v0  ;;  %v940_v17 = vpack.c.bf16 %v3930_v1, %v3930_v1  ;;  %v947_v8 = vunpack.c.l.b16 %v939_v4 }
 0x264   :  { %937 = vst.msk [vmem:[#allocation3 + $0x11] sm:$0x1] %vm665_vm3, %v3935_v2  ;;  %v941_v5 = vpack.c.bf16 %v3935_v2, %v3935_v2 }
 0x265   :  { %938 = vst.msk [vmem:[#allocation3 + $0x19] sm:$0x1] %vm665_vm3, %v3939_v46  ;;  %v942_v49 = vpack.c.bf16 %v3939_v46, %v3939_v46  ;;  %v948_v6 = vunpack.c.l.b16 %v940_v17 }
 0x266   :  { %v949_v7 = vunpack.c.l.b16 %v941_v5 }
 0x267   :  { %v950_v9 = vunpack.c.l.b16 %v942_v49  ;;  %v951_v10 = vrot.slane %v948_v6, 7 }
 0x268   :  { %v953_v12 = vrot.slane %v949_v7, 6 }
 0x269   :  { %v952_v14 = vsel %vm683_vm4, %v951_v10, %v947_v8  ;;  %v955_v19 = vrot.slane %v950_v9, 5 }
 0x26a   :  { %v954_v22 = vsel %vm686_vm5, %v953_v12, %v952_v14 }
 0x26b   :  { %v956_v23 = vsel %vm689_vm6, %v955_v19, %v954_v22 }
 0x26c   :  { %v957_v24 = vpack.c.b16 %v956_v23, %v956_v23 }
 0x26e   :  { %3027 = vmatmul.mubr.msk.bf16.vlgmr.msra.gmra.mrb[16].mxu1 %vm123_vm0, %v957_v24  ;;  %3035 = vmatmul.mubr.msk.bf16.vlgmr.msra.gmra.mrb[20].mxu0 %vm123_vm0, %v957_v24 }
 0x26f   :  { %3039 = vmatpush3.bf16.msra.mxu1 %v3795_v18  ;;  %3042 = vmatprep.mubr.msk.bf16.mxu1 %vm3672_vm2, %v3671_v13 }
 0x270   :  { %3040 = vmatprep.subr.bf16.mxu1 %v3671_v13  ;;  %3047 = vmatpush3.bf16.msra.mxu0 %v3771_v11 }
 0x271   :  { %3048 = vmatprep.subr.bf16.mxu0 %v3671_v13  ;;  %3050 = vmatprep.mubr.msk.bf16.mxu0 %vm3672_vm2, %v3671_v13 }
 0x273   :  { %3041 = vmatpush3.bf16.msra.mxu1 %v3808_v21 }
 0x274   :  { %3054 = vmatprep.subr.bf16.mxu1 %v3671_v13  ;;  %3049 = vmatpush3.bf16.msra.mxu0 %v3782_v15  ;;  %v1081_v15 = vld [vmem:[#allocation4 + $0x2] sm:$0x1] }
 0x275   :  { %3062 = vmatprep.subr.bf16.mxu0 %v3671_v13 }
 0x276   :  { %3043 = vmatmul.mubr.msk.bf16.vlgmr.msra.gmra.mrb[20].mxu1 %vm123_vm0, %v957_v24 }
 0x277   :  { %3055 = vmatpush3.bf16.msra.mxu1 %v3788_v16  ;;  %3058 = vmatprep.mubr.msk.bf16.mxu1 %vm3672_vm2, %v3671_v13  ;;  %v1083_v16 = vld [vmem:[#allocation4 + $0x12] sm:$0x1] }
 0x278   :  { %3056 = vmatprep.subr.bf16.mxu1 %v3671_v13 }
 0x27b   :  { %3057 = vmatpush3.bf16.msra.mxu1 %v3801_v20 }
 0x27c   :  { %3070 = vmatprep.subr.bf16.mxu1 %v3671_v13 }
 0x341   :  { %v995_v11 = vpop.f32.mrb[16].mxu1  ;;  %v1035_v18 = vpop.f32.mrb[20].mxu0 }
 0x342   :  { %v996_v21 = vadd.f32 %v3851_v41, %v995_v11  ;;  %v1036_v25 = vadd.f32 %v3861_v3, %v1035_v18  ;;  %v3028_v26 = vpop.f32.mrb[17].mxu1  ;;  %v3036_v27 = vpop.f32.mrb[21].mxu0 }
 0x343   :  { %v998_v29 = vpop.f32.mrb[18].mxu1  ;;  %v1038_v30 = vpop.f32.mrb[22].mxu0 }
 0x344   :  { %v1094_v31 = vrot.slane %v996_v21, 1  ;;  %v1095_v32 = vrot.slane %v996_v21, 2  ;;  %v1096_v33 = vrot.slane %v996_v21, 3  ;;  %v1101_v34 = vadd.f32 %v1081_v15, %v996_v21  ;;  %v3029_v20 = vpop.f32.mrb[19].mxu1  ;;  %v3037_v35 = vpop.f32.mrb[23].mxu0 }
 0x345   :  { %v1130_v37 = vrot.slane %v1036_v25, 1  ;;  %v1131_v38 = vrot.slane %v1036_v25, 2  ;;  %v1132_v39 = vrot.slane %v1036_v25, 3  ;;  %v1137_v52 = vadd.f32 %v1085_v47, %v1036_v25  ;;  %v1089_v29 = vld [vmem:[#allocation6 + $0x2] sm:$0x1] }
 0x346   :  { %v1102_v42 = vadd.f32 %v1094_v31, %v1082_v28  ;;  %v1103_v43 = vadd.f32 %v1095_v32, %v1083_v16  ;;  %v1104_v44 = vadd.f32 %v1096_v33, %v1084_v36  ;;  %v2788_v45 = vmul.f32 -1.442695, %v1101_v34  ;;  %v1090_v35 = vld [vmem:[#allocation6 + $0xa] sm:$0x1] }
 0x347   :  { %v1138_v53 = vadd.f32 %v1130_v37, %v1086_v50  ;;  %v1139_v58 = vadd.f32 %v1131_v38, %v1087_v51  ;;  %v1140_v59 = vadd.f32 %v1132_v39, %v1088_v57  ;;  %v2792_v62 = vmul.f32 -1.442695, %v1137_v52  ;;  %v1091_v37 = vld [vmem:[#allocation6 + $0x12] sm:$0x1] }
 0x348   :  { %3279 = vpow2.f32 %v2788_v45  ;;  %v2789_v54 = vmul.f32 -1.442695, %v1102_v42  ;;  %v2790_v55 = vmul.f32 -1.442695, %v1103_v43  ;;  %v2791_v56 = vmul.f32 -1.442695, %v1104_v44 }
 0x349   :  { %v1075_v61 = vpop.f32.mrb[20].mxu1  ;;  %v2793_v0 = vmul.f32 -1.442695, %v1138_v53  ;;  %v2794_v4 = vmul.f32 -1.442695, %v1139_v58 }
 0x34a   :  { %3281 = vpow2.f32 %v2789_v54  ;;  %v3044_v63 = vpop.f32.mrb[21].mxu1  ;;  %v2795_v5 = vmul.f32 -1.442695, %v1140_v59  ;;  %v1076_v18 = vadd.f32 %v3867_v48, %v1075_v61  ;;  %v1092_v42 = vld [vmem:[#allocation6 + $0x1a] sm:$0x1] }
 0x34b   :  { %3283 = vpow2.f32 %v2790_v55  ;;  %v1078_v40 = vpop.f32.mrb[22].mxu1 }
 0x34c   :  { %3285 = vpow2.f32 %v2791_v56  ;;  %v3045_v17 = vpop.f32.mrb[23].mxu1  ;;  %v1166_v27 = vrot.slane %v1076_v18, 1  ;;  %v1167_v30 = vrot.slane %v1076_v18, 2  ;;  %v1168_v32 = vrot.slane %v1076_v18, 3 }
 0x34d   :  { %3287 = vpow2.f32 %v2792_v62 }
 0x34e   :  { %3289 = vpow2.f32 %v2793_v0 }
 0x34f   :  { %3291 = vpow2.f32 %v2794_v4 }
 0x350   :  { %3293 = vpow2.f32 %v2795_v5 }
 0x352   :  { %v3280_v49 = vpop.eup %3279 }
 0x353   :  { %v1117_v6 = vadd.f32 1.0, %v3280_v49 }
 0x354   :  { %v3282_v7 = vpop.eup %3281 }
 0x355   :  { %v3284_v8 = vpop.eup %3283  ;;  %v1118_v9 = vadd.f32 1.0, %v3282_v7  ;;  %3295 = vrcp.f32 %v1117_v6 }
 0x356   :  { %v3286_v10 = vpop.eup %3285  ;;  %v1119_v12 = vadd.f32 1.0, %v3284_v8 }
 0x357   :  { %v1120_v14 = vadd.f32 1.0, %v3286_v10  ;;  %3297 = vrcp.f32 %v1118_v9  ;;  %v3288_v19 = vpop.eup %3287 }
 0x358   :  { %3299 = vrcp.f32 %v1119_v12  ;;  %v3290_v22 = vpop.eup %3289  ;;  %v1153_v11 = vadd.f32 1.0, %v3288_v19 }
 0x359   :  { %3301 = vrcp.f32 %v1120_v14  ;;  %v3292_v23 = vpop.eup %3291  ;;  %v1154_v21 = vadd.f32 1.0, %v3290_v22 }
 0x35a   :  { %v3294_v24 = vpop.eup %3293  ;;  %v1155_v15 = vadd.f32 1.0, %v3292_v23  ;;  %3303 = vrcp.f32 %v1153_v11 }
 0x35b   :  { %v1156_v26 = vadd.f32 1.0, %v3294_v24  ;;  %3305 = vrcp.f32 %v1154_v21 }
 0x35c   :  { %3307 = vrcp.f32 %v1155_v15  ;;  %v4013_v15 = vld [vmem:[#allocation12 + $0x20] sm:$0xff]  }
 0x35d   :  { %3309 = vrcp.f32 %v1156_v26  ;;  %v4025_v26 = vld [vmem:[#allocation12 + $0x28] sm:$0xff]  }
 0x35f   :  { %v3296_v25 = vpop.eup %3295 }
 0x360   :  { %v1173_v28 = vmul.f32 %v3296_v25, %v1076_v18  ;;  %v4019_v25 = vld [vmem:[#allocation12] sm:$0xff]  }
 0x361   :  { %v3298_v16 = vpop.eup %3297 }
 0x362   :  { %v3300_v31 = vpop.eup %3299  ;;  %v1174_v33 = vmul.f32 %v3298_v16, %v1166_v27  ;;  %v1177_v34 = vadd.f32 %v1173_v28, %v1089_v29  ;;  %v4029_v27 = vld [vmem:[#allocation12 + $0x8] sm:$0xff]   ;;  %v4034_v28 = vld [vmem:[#allocation12 + $0x10] sm:$0xff]   ;;  %v4040_v16 = vld [vmem:[#allocation12 + $0x18] sm:$0xff]  }
 0x363   :  { %v3302_v20 = vpop.eup %3301  ;;  %v1175_v36 = vmul.f32 %v3300_v31, %v1167_v30 }
 0x364   :  { %v1176_v38 = vmul.f32 %v3302_v20, %v1168_v32  ;;  %v1178_v39 = vadd.f32 %v1174_v33, %v1090_v35  ;;  %3311 = vtanh.f32 %v1177_v34  ;;  %v3304_v45 = vpop.eup %3303  ;;  %v1347_v32 = vld [vmem:[#allocation4 + $0x3] sm:$0x1]  ;;  %v1348_v35 = vld [vmem:[#allocation4 + $0xb] sm:$0x1] }
 0x365   :  { %v1179_v43 = vadd.f32 %v1175_v36, %v1091_v37  ;;  %v3306_v47 = vpop.eup %3305  ;;  %v1185_v52 = vsub.f32 1.0, %v3304_v45  ;;  %v1193_v55 = vmul.f32 %v3304_v45, %v3927_v60  ;;  %v1349_v36 = vld [vmem:[#allocation4 + $0x13] sm:$0x1] }
 0x366   :  { %v1180_v44 = vadd.f32 %v1176_v38, %v1092_v42  ;;  %3313 = vtanh.f32 %v1178_v39  ;;  %v3308_v50 = vpop.eup %3307  ;;  %v1186_v54 = vsub.f32 1.0, %v3306_v47  ;;  %v1194_v62 = vmul.f32 %v3306_v47, %v3930_v1 }
 0x367   :  { %3315 = vtanh.f32 %v1179_v43  ;;  %v3310_v51 = vpop.eup %3309  ;;  %v1187_v58 = vsub.f32 1.0, %v3308_v50  ;;  %v1195_v4 = vmul.f32 %v3308_v50, %v3935_v2  ;;  %v1350_v50 = vld [vmem:[#allocation4 + $0x1b] sm:$0x1] }
 0x368   :  { %3317 = vtanh.f32 %v1180_v44  ;;  %v1188_v61 = vsub.f32 1.0, %v3310_v51  ;;  %v1196_v60 = vmul.f32 %v3310_v51, %v3939_v46 }
 0x36e   :  { %v3312_v53 = vpop.eup %3311 }
 0x36f   :  { %v1189_v56 = vmul.f32 %v3312_v53, %v1185_v52 }
 0x370   :  { %v3314_v57 = vpop.eup %3313 }
 0x371   :  { %v3316_v59 = vpop.eup %3315  ;;  %v1190_v63 = vmul.f32 %v3314_v57, %v1186_v54  ;;  %v3982_v0 = vadd.f32 %v1193_v55, %v1189_v56  ;;  %v1351_v56 = vld [vmem:[#allocation5 + $0x3] sm:$0x1]  ;;  %v1352_v57 = vld [vmem:[#allocation5 + $0xb] sm:$0x1] }
 0x372   :  { %v3318_v40 = vpop.eup %3317  ;;  %v1191_v17 = vmul.f32 %v3316_v59, %v1187_v58  ;;  %v1353_v58 = vld [vmem:[#allocation5 + $0x13] sm:$0x1] }
 0x373   :  { %v1192_v5 = vmul.f32 %v3318_v40, %v1188_v61  ;;  %v3985_v49 = vadd.f32 %v1194_v62, %v1190_v63  ;;  %1201 = vst.msk [vmem:[#allocation3 + $0x2] sm:$0x1] %vm665_vm3, %v3982_v0  ;;  %v1205_v7 = vpack.c.bf16 %v3982_v0, %v3982_v0 }
 0x374   :  { %v3990_v6 = vadd.f32 %v1195_v4, %v1191_v17  ;;  %v1354_v4 = vld [vmem:[#allocation5 + $0x1b] sm:$0x1] }
 0x375   :  { %1202 = vst.msk [vmem:[#allocation3 + $0xa] sm:$0x1] %vm665_vm3, %v3985_v49  ;;  %v3994_v1 = vadd.f32 %v1196_v60, %v1192_v5  ;;  %v1206_v2 = vpack.c.bf16 %v3985_v49, %v3985_v49  ;;  %v1213_v12 = vunpack.c.l.b16 %v1205_v7 }
 0x376   :  { %1203 = vst.msk [vmem:[#allocation3 + $0x12] sm:$0x1] %vm665_vm3, %v3990_v6  ;;  %v1207_v8 = vpack.c.bf16 %v3990_v6, %v3990_v6 }
 0x377   :  { %1204 = vst.msk [vmem:[#allocation3 + $0x1a] sm:$0x1] %vm665_vm3, %v3994_v1  ;;  %v1208_v46 = vpack.c.bf16 %v3994_v1, %v3994_v1  ;;  %v1214_v9 = vunpack.c.l.b16 %v1206_v2 }
 0x378   :  { %v1215_v10 = vunpack.c.l.b16 %v1207_v8 }
 0x379   :  { %v1216_v14 = vunpack.c.l.b16 %v1208_v46  ;;  %v1217_v19 = vrot.slane %v1214_v9, 7 }
 0x37a   :  { %v1219_v22 = vrot.slane %v1215_v10, 6 }
 0x37b   :  { %v1218_v23 = vsel %vm683_vm4, %v1217_v19, %v1213_v12  ;;  %v1221_v24 = vrot.slane %v1216_v14, 5 }
 0x37c   :  { %v1220_v11 = vsel %vm686_vm5, %v1219_v22, %v1218_v23 }
 0x37d   :  { %v1222_v18 = vsel %vm689_vm6, %v1221_v24, %v1220_v11 }
 0x37e   :  { %v1223_v21 = vpack.c.b16 %v1222_v18, %v1222_v18 }
 0x380   :  { %3051 = vmatmul.mubr.msk.bf16.vlgmr.msra.gmra.mrb[24].mxu0 %vm123_vm0, %v1223_v21  ;;  %3059 = vmatmul.mubr.msk.bf16.vlgmr.msra.gmra.mrb[24].mxu1 %vm123_vm0, %v1223_v21 }
 0x381   :  { %3063 = vmatpush3.bf16.msra.mxu0 %v4013_v15  ;;  %3066 = vmatprep.mubr.msk.bf16.mxu0 %vm3672_vm2, %v3671_v13 }
 0x382   :  { %3064 = vmatprep.subr.bf16.mxu0 %v3671_v13  ;;  %3071 = vmatpush3.bf16.msra.mxu1 %v4019_v25 }
 0x383   :  { %3072 = vmatprep.subr.bf16.mxu1 %v3671_v13  ;;  %3074 = vmatprep.mubr.msk.bf16.mxu1 %vm3672_vm2, %v3671_v13 }
 0x385   :  { %3065 = vmatpush3.bf16.msra.mxu0 %v4025_v26 }
 0x386   :  { %3078 = vmatprep.subr.bf16.mxu0 %v3671_v13  ;;  %3073 = vmatpush3.bf16.msra.mxu1 %v4029_v27 }
 0x387   :  { %3086 = vmatprep.subr.bf16.mxu1 %v3671_v13 }
 0x388   :  { %3067 = vmatmul.mubr.msk.bf16.vlgmr.msra.gmra.mrb[28].mxu0 %vm123_vm0, %v1223_v21 }
 0x389   :  { %3079 = vmatpush3.bf16.msra.mxu0 %v4034_v28  ;;  %3082 = vmatprep.mubr.msk.bf16.mxu0 %vm3672_vm2, %v3671_v13 }
 0x38a   :  { %3080 = vmatprep.subr.bf16.mxu0 %v3671_v13 }
 0x38d   :  { %3081 = vmatpush3.bf16.msra.mxu0 %v4040_v16 }
 0x38e   :  { %3094 = vmatprep.subr.bf16.mxu0 %v3671_v13 }
 0x453   :  { %v1261_v29 = vpop.f32.mrb[24].mxu0  ;;  %v1301_v30 = vpop.f32.mrb[24].mxu1 }
 0x454   :  { %v1262_v31 = vadd.f32 %v3851_v41, %v1261_v29  ;;  %v1302_v33 = vadd.f32 %v3861_v3, %v1301_v30  ;;  %v3052_v34 = vpop.f32.mrb[25].mxu0  ;;  %v3060_v20 = vpop.f32.mrb[25].mxu1 }
 0x455   :  { %v1264_v37 = vpop.f32.mrb[26].mxu0  ;;  %v1304_v38 = vpop.f32.mrb[26].mxu1 }
 0x456   :  { %v1360_v39 = vrot.slane %v1262_v31, 1  ;;  %v1361_v42 = vrot.slane %v1262_v31, 2  ;;  %v1362_v43 = vrot.slane %v1262_v31, 3  ;;  %v1367_v44 = vadd.f32 %v1347_v32, %v1262_v31  ;;  %v3053_v45 = vpop.f32.mrb[27].mxu0  ;;  %v3061_v47 = vpop.f32.mrb[27].mxu1 }
 0x457   :  { %v1396_v51 = vrot.slane %v1302_v33, 1  ;;  %v1397_v52 = vrot.slane %v1302_v33, 2  ;;  %v1398_v53 = vrot.slane %v1302_v33, 3  ;;  %v1403_v59 = vadd.f32 %v1351_v56, %v1302_v33 }
 0x458   :  { %v1368_v41 = vadd.f32 %v1360_v39, %v1348_v35  ;;  %v1369_v54 = vadd.f32 %v1361_v42, %v1349_v36  ;;  %v1370_v55 = vadd.f32 %v1362_v43, %v1350_v50  ;;  %v2799_v3 = vmul.f32 -1.442695, %v1367_v44  ;;  %v1355_v43 = vld [vmem:[#allocation6 + $0x3] sm:$0x1] }
 0x459   :  { %v1404_v61 = vadd.f32 %v1396_v51, %v1352_v57  ;;  %v1405_v17 = vadd.f32 %v1397_v52, %v1353_v58  ;;  %v1406_v5 = vadd.f32 %v1398_v53, %v1354_v4  ;;  %v2803_v7 = vmul.f32 -1.442695, %v1403_v59  ;;  %v1356_v53 = vld [vmem:[#allocation6 + $0xb] sm:$0x1] }
 0x45a   :  { %3319 = vpow2.f32 %v2799_v3  ;;  %v2800_v62 = vmul.f32 -1.442695, %v1368_v41  ;;  %v2801_v63 = vmul.f32 -1.442695, %v1369_v54  ;;  %v2802_v40 = vmul.f32 -1.442695, %v1370_v55 }
 0x45b   :  { %v1341_v60 = vpop.f32.mrb[28].mxu0  ;;  %v2804_v8 = vmul.f32 -1.442695, %v1404_v61  ;;  %v2805_v9 = vmul.f32 -1.442695, %v1405_v17 }
 0x45c   :  { %3321 = vpow2.f32 %v2800_v62  ;;  %v3068_v2 = vpop.f32.mrb[29].mxu0  ;;  %v2806_v12 = vmul.f32 -1.442695, %v1406_v5  ;;  %v1342_v34 = vadd.f32 %v3867_v48, %v1341_v60  ;;  %v1357_v41 = vld [vmem:[#allocation6 + $0x13] sm:$0x1] }
 0x45d   :  { %3323 = vpow2.f32 %v2801_v63  ;;  %v1344_v46 = vpop.f32.mrb[30].mxu0  ;;  %v1358_v3 = vld [vmem:[#allocation6 + $0x1b] sm:$0x1] }
 0x45e   :  { %3325 = vpow2.f32 %v2802_v40  ;;  %v3069_v10 = vpop.f32.mrb[31].mxu0  ;;  %v1432_v38 = vrot.slane %v1342_v34, 1  ;;  %v1433_v44 = vrot.slane %v1342_v34, 2  ;;  %v1434_v47 = vrot.slane %v1342_v34, 3 }
 0x45f   :  { %3327 = vpow2.f32 %v2803_v7 }
 0x460   :  { %3329 = vpow2.f32 %v2804_v8 }
 0x461   :  { %3331 = vpow2.f32 %v2805_v9 }
 0x462   :  { %3333 = vpow2.f32 %v2806_v12 }
 0x464   :  { %v3320_v14 = vpop.eup %3319 }
 0x465   :  { %v1383_v19 = vadd.f32 1.0, %v3320_v14 }
 0x466   :  { %v3322_v22 = vpop.eup %3321 }
 0x467   :  { %v3324_v23 = vpop.eup %3323  ;;  %v1384_v24 = vadd.f32 1.0, %v3322_v22  ;;  %3335 = vrcp.f32 %v1383_v19 }
 0x468   :  { %v3326_v11 = vpop.eup %3325  ;;  %v1385_v18 = vadd.f32 1.0, %v3324_v23 }
 0x469   :  { %v1386_v21 = vadd.f32 1.0, %v3326_v11  ;;  %3337 = vrcp.f32 %v1384_v24  ;;  %v3328_v29 = vpop.eup %3327 }
 0x46a   :  { %3339 = vrcp.f32 %v1385_v18  ;;  %v3330_v30 = vpop.eup %3329  ;;  %v1419_v33 = vadd.f32 1.0, %v3328_v29 }
 0x46b   :  { %3341 = vrcp.f32 %v1386_v21  ;;  %v3332_v31 = vpop.eup %3331  ;;  %v1420_v20 = vadd.f32 1.0, %v3330_v30 }
 0x46c   :  { %v3334_v32 = vpop.eup %3333  ;;  %v1421_v35 = vadd.f32 1.0, %v3332_v31  ;;  %3343 = vrcp.f32 %v1419_v33 }
 0x46d   :  { %v1422_v37 = vadd.f32 1.0, %v3334_v32  ;;  %3345 = vrcp.f32 %v1420_v20 }
 0x46e   :  { %3347 = vrcp.f32 %v1421_v35 }
 0x46f   :  { %3349 = vrcp.f32 %v1422_v37 }
 0x471   :  { %v3336_v36 = vpop.eup %3335 }
 0x472   :  { %v1439_v39 = vmul.f32 %v3336_v36, %v1342_v34 }
 0x473   :  { %v3338_v42 = vpop.eup %3337 }
 0x474   :  { %v3340_v45 = vpop.eup %3339  ;;  %v1440_v50 = vmul.f32 %v3338_v42, %v1432_v38  ;;  %v1443_v51 = vadd.f32 %v1439_v39, %v1355_v43  ;;  %v4102_v42 = vld [vmem:[%s4342_s5] ss:$0 sm:$0xff] }
 0x475   :  { %v3342_v52 = vpop.eup %3341  ;;  %v1441_v48 = vmul.f32 %v3340_v45, %v1433_v44  ;;  %v1613_v44 = vld [vmem:[#allocation4 + $0x4] sm:$0x1]  ;;  %v4108_v45 = vld [vmem:[%s4342_s5 + $0x1] ss:$0 sm:$0xff] }
 0x476   :  { %v1442_v54 = vmul.f32 %v3342_v52, %v1434_v47  ;;  %v1444_v55 = vadd.f32 %v1440_v50, %v1356_v53  ;;  %3351 = vtanh.f32 %v1443_v51  ;;  %v3344_v58 = vpop.eup %3343  ;;  %v1614_v52 = vld [vmem:[#allocation4 + $0xc] sm:$0x1]  ;;  %v1615_v53 = vld [vmem:[#allocation4 + $0x14] sm:$0x1] }
 0x477   :  { %v1445_v56 = vadd.f32 %v1441_v48, %v1357_v41  ;;  %v3346_v59 = vpop.eup %3345  ;;  %v1451_v63 = vsub.f32 1.0, %v3344_v58  ;;  %v1459_v17 = vmul.f32 %v3344_v58, %v3982_v0 }
 0x478   :  { %v1446_v57 = vadd.f32 %v1442_v54, %v1358_v3  ;;  %3353 = vtanh.f32 %v1444_v55  ;;  %v3348_v61 = vpop.eup %3347  ;;  %v1452_v4 = vsub.f32 1.0, %v3346_v59  ;;  %v1460_v46 = vmul.f32 %v3346_v59, %v3985_v49  ;;  %v1616_v59 = vld [vmem:[#allocation4 + $0x1c] sm:$0x1] }
 0x479   :  { %3355 = vtanh.f32 %v1445_v56  ;;  %v3350_v62 = vpop.eup %3349  ;;  %v1453_v7 = vsub.f32 1.0, %v3348_v61  ;;  %v1461_v14 = vmul.f32 %v3348_v61, %v3990_v6 }
 0x47a   :  { %3357 = vtanh.f32 %v1446_v57  ;;  %v1454_v8 = vsub.f32 1.0, %v3350_v62  ;;  %v1462_v0 = vmul.f32 %v3350_v62, %v3994_v1 }
 0x480   :  { %v3352_v40 = vpop.eup %3351 }
 0x481   :  { %v1455_v5 = vmul.f32 %v3352_v40, %v1451_v63 }
 0x482   :  { %v3354_v60 = vpop.eup %3353 }
 0x483   :  { %v3356_v2 = vpop.eup %3355  ;;  %v1456_v9 = vmul.f32 %v3354_v60, %v1452_v4  ;;  %v4049_v10 = vadd.f32 %v1459_v17, %v1455_v5  ;;  %v1617_v60 = vld [vmem:[#allocation5 + $0x4] sm:$0x1] }
 0x484   :  { %v3358_v12 = vpop.eup %3357  ;;  %v1457_v19 = vmul.f32 %v3356_v2, %v1453_v7  ;;  %v1618_v7 = vld [vmem:[#allocation5 + $0xc] sm:$0x1]  ;;  %v1619_v2 = vld [vmem:[#allocation5 + $0x14] sm:$0x1] }
 0x485   :  { %v1458_v22 = vmul.f32 %v3358_v12, %v1454_v8  ;;  %v4052_v23 = vadd.f32 %v1460_v46, %v1456_v9  ;;  %1467 = vst.msk [vmem:[#allocation3 + $0x3] sm:$0x1] %vm665_vm3, %v4049_v10  ;;  %v1471_v11 = vpack.c.bf16 %v4049_v10, %v4049_v10 }
 0x486   :  { %v4057_v24 = vadd.f32 %v1461_v14, %v1457_v19  ;;  %v1620_v19 = vld [vmem:[#allocation5 + $0x1c] sm:$0x1] }
 0x487   :  { %1468 = vst.msk [vmem:[#allocation3 + $0xb] sm:$0x1] %vm665_vm3, %v4052_v23  ;;  %v4061_v49 = vadd.f32 %v1462_v0, %v1458_v22  ;;  %v1472_v6 = vpack.c.bf16 %v4052_v23, %v4052_v23  ;;  %v1479_v30 = vunpack.c.l.b16 %v1471_v11 }
 0x488   :  { %1469 = vst.msk [vmem:[#allocation3 + $0x13] sm:$0x1] %vm665_vm3, %v4057_v24  ;;  %v1473_v18 = vpack.c.bf16 %v4057_v24, %v4057_v24 }
 0x489   :  { %1470 = vst.msk [vmem:[#allocation3 + $0x1b] sm:$0x1] %vm665_vm3, %v4061_v49  ;;  %v1474_v1 = vpack.c.bf16 %v4061_v49, %v4061_v49  ;;  %v1480_v21 = vunpack.c.l.b16 %v1472_v6 }
 0x48a   :  { %v1481_v29 = vunpack.c.l.b16 %v1473_v18 }
 0x48b   :  { %v1482_v31 = vunpack.c.l.b16 %v1474_v1  ;;  %v1483_v32 = vrot.slane %v1480_v21, 7 }
 0x48c   :  { %v1485_v33 = vrot.slane %v1481_v29, 6 }
 0x48d   :  { %v1484_v34 = vsel %vm683_vm4, %v1483_v32, %v1479_v30  ;;  %v1487_v20 = vrot.slane %v1482_v31, 5 }
 0x48e   :  { %v1486_v35 = vsel %vm686_vm5, %v1485_v33, %v1484_v34 }
 0x48f   :  { %v1488_v36 = vsel %vm689_vm6, %v1487_v20, %v1486_v35 }
 0x490   :  { %v1489_v37 = vpack.c.b16 %v1488_v36, %v1488_v36 }
 0x492   :  { %3075 = vmatmul.mubr.msk.bf16.vlgmr.msra.gmra.mrb[28].mxu1 %vm123_vm0, %v1489_v37  ;;  %3083 = vmatmul.mubr.msk.bf16.vlgmr.msra.gmra.mrb[32].mxu0 %vm123_vm0, %v1489_v37 }
 0x493   :  { %3087 = vmatpush3.bf16.msra.mxu1 %v4013_v15  ;;  %3090 = vmatprep.mubr.msk.bf16.mxu1 %vm3672_vm2, %v3671_v13 }
 0x494   :  { %3088 = vmatprep.subr.bf16.mxu1 %v3671_v13  ;;  %3095 = vmatpush3.bf16.msra.mxu0 %v4019_v25 }
 0x495   :  { %3096 = vmatprep.subr.bf16.mxu0 %v3671_v13  ;;  %3098 = vmatprep.mubr.msk.bf16.mxu0 %vm3672_vm2, %v3671_v13 }
 0x497   :  { %3089 = vmatpush3.bf16.msra.mxu1 %v4025_v26 }
 0x498   :  { %3102 = vmatprep.subr.bf16.mxu1 %v3671_v13  ;;  %3097 = vmatpush3.bf16.msra.mxu0 %v4029_v27 }
 0x499   :  { %3110 = vmatprep.subr.bf16.mxu0 %v3671_v13 }
 0x49a   :  { %3091 = vmatmul.mubr.msk.bf16.vlgmr.msra.gmra.mrb[32].mxu1 %vm123_vm0, %v1489_v37 }
 0x49b   :  { %3103 = vmatpush3.bf16.msra.mxu1 %v4034_v28  ;;  %3106 = vmatprep.mubr.msk.bf16.mxu1 %vm3672_vm2, %v3671_v13 }
 0x49c   :  { %3104 = vmatprep.subr.bf16.mxu1 %v3671_v13 }
 0x49f   :  { %3105 = vmatpush3.bf16.msra.mxu1 %v4040_v16 }
 0x4a0   :  { %3118 = vmatprep.subr.bf16.mxu1 %v3671_v13 }
 0x565   :  { %v1527_v38 = vpop.f32.mrb[28].mxu1  ;;  %v1567_v39 = vpop.f32.mrb[32].mxu0 }
 0x566   :  { %v1528_v43 = vadd.f32 %v4102_v42, %v1527_v38  ;;  %v1568_v47 = vadd.f32 %v4108_v45, %v1567_v39  ;;  %v3076_v50 = vpop.f32.mrb[29].mxu1  ;;  %v3084_v51 = vpop.f32.mrb[33].mxu0 }
 0x567   :  { %v1530_v48 = vpop.f32.mrb[30].mxu1  ;;  %v1570_v41 = vpop.f32.mrb[34].mxu0  ;;  %v4114_v51 = vld [vmem:[%s4342_s5 + $0x2] ss:$0 sm:$0xff] }
 0x568   :  { %v1626_v54 = vrot.slane %v1528_v43, 1  ;;  %v1627_v55 = vrot.slane %v1528_v43, 2  ;;  %v1628_v3 = vrot.slane %v1528_v43, 3  ;;  %v1633_v56 = vadd.f32 %v1613_v44, %v1528_v43  ;;  %v3077_v57 = vpop.f32.mrb[31].mxu1  ;;  %v3085_v58 = vpop.f32.mrb[35].mxu0 }
 0x569   :  { %v1662_v61 = vrot.slane %v1568_v47, 1  ;;  %v1663_v62 = vrot.slane %v1568_v47, 2  ;;  %v1664_v63 = vrot.slane %v1568_v47, 3  ;;  %v1669_v8 = vadd.f32 %v1617_v60, %v1568_v47  ;;  %v1621_v57 = vld [vmem:[#allocation6 + $0x4] sm:$0x1] }
 0x56a   :  { %v1634_v40 = vadd.f32 %v1626_v54, %v1614_v52  ;;  %v1635_v4 = vadd.f32 %v1627_v55, %v1615_v53  ;;  %v1636_v17 = vadd.f32 %v1628_v3, %v1616_v59  ;;  %v2810_v5 = vmul.f32 -1.442695, %v1633_v56 }
 0x56b   :  { %v1670_v46 = vadd.f32 %v1662_v61, %v1618_v7  ;;  %v1671_v22 = vadd.f32 %v1663_v62, %v1619_v2  ;;  %v1672_v0 = vadd.f32 %v1664_v63, %v1620_v19  ;;  %v2814_v6 = vmul.f32 -1.442695, %v1669_v8  ;;  %v1624_v2 = vld [vmem:[#allocation6 + $0x1c] sm:$0x1] }
 0x56c   :  { %3359 = vpow2.f32 %v2810_v5  ;;  %v2811_v9 = vmul.f32 -1.442695, %v1634_v40  ;;  %v2812_v12 = vmul.f32 -1.442695, %v1635_v4  ;;  %v2813_v14 = vmul.f32 -1.442695, %v1636_v17 }
 0x56d   :  { %v1607_v11 = vpop.f32.mrb[32].mxu1  ;;  %v2815_v1 = vmul.f32 -1.442695, %v1670_v46  ;;  %v2816_v29 = vmul.f32 -1.442695, %v1671_v22 }
 0x56e   :  { %3361 = vpow2.f32 %v2811_v9  ;;  %v3092_v18 = vpop.f32.mrb[33].mxu1  ;;  %v2817_v31 = vmul.f32 -1.442695, %v1672_v0  ;;  %v1608_v52 = vadd.f32 %v4114_v51, %v1607_v11  ;;  %v1622_v4 = vld [vmem:[#allocation6 + $0xc] sm:$0x1] }
 0x56f   :  { %3363 = vpow2.f32 %v2812_v12  ;;  %v1610_v21 = vpop.f32.mrb[34].mxu1  ;;  %v1623_v5 = vld [vmem:[#allocation6 + $0x14] sm:$0x1] }
 0x570   :  { %3365 = vpow2.f32 %v2813_v14  ;;  %v3093_v30 = vpop.f32.mrb[35].mxu1  ;;  %v1698_v55 = vrot.slane %v1608_v52, 1  ;;  %v1699_v58 = vrot.slane %v1608_v52, 2  ;;  %v1700_v61 = vrot.slane %v1608_v52, 3 }
 0x571   :  { %3367 = vpow2.f32 %v2814_v6 }
 0x572   :  { %3369 = vpow2.f32 %v2815_v1 }
 0x573   :  { %3371 = vpow2.f32 %v2816_v29 }
 0x574   :  { %3373 = vpow2.f32 %v2817_v31 }
 0x576   :  { %v3360_v32 = vpop.eup %3359 }
 0x577   :  { %v1649_v33 = vadd.f32 1.0, %v3360_v32 }
 0x578   :  { %v3362_v34 = vpop.eup %3361 }
 0x579   :  { %v3364_v20 = vpop.eup %3363  ;;  %v1650_v35 = vadd.f32 1.0, %v3362_v34  ;;  %3375 = vrcp.f32 %v1649_v33 }
 0x57a   :  { %v3366_v36 = vpop.eup %3365  ;;  %v1651_v37 = vadd.f32 1.0, %v3364_v20 }
 0x57b   :  { %v1652_v38 = vadd.f32 1.0, %v3366_v36  ;;  %3377 = vrcp.f32 %v1650_v35  ;;  %v3368_v39 = vpop.eup %3367 }
 0x57c   :  { %3379 = vrcp.f32 %v1651_v37  ;;  %v3370_v43 = vpop.eup %3369  ;;  %v1685_v50 = vadd.f32 1.0, %v3368_v39 }
 0x57d   :  { %3381 = vrcp.f32 %v1652_v38  ;;  %v3372_v44 = vpop.eup %3371  ;;  %v1686_v53 = vadd.f32 1.0, %v3370_v43 }
 0x57e   :  { %v3374_v47 = vpop.eup %3373  ;;  %v1687_v48 = vadd.f32 1.0, %v3372_v44  ;;  %3383 = vrcp.f32 %v1685_v50 }
 0x57f   :  { %v1688_v54 = vadd.f32 1.0, %v3374_v47  ;;  %3385 = vrcp.f32 %v1686_v53 }
 0x580   :  { %3387 = vrcp.f32 %v1687_v48 }
 0x581   :  { %3389 = vrcp.f32 %v1688_v54 }
 0x583   :  { %v3376_v41 = vpop.eup %3375 }
 0x584   :  { %v1705_v3 = vmul.f32 %v3376_v41, %v1608_v52 }
 0x585   :  { %v3378_v56 = vpop.eup %3377 }
 0x586   :  { %v3380_v59 = vpop.eup %3379  ;;  %v1706_v62 = vmul.f32 %v3378_v56, %v1698_v55  ;;  %v1709_v63 = vadd.f32 %v1705_v3, %v1621_v57 }
 0x587   :  { %v3382_v40 = vpop.eup %3381  ;;  %v1707_v17 = vmul.f32 %v3380_v59, %v1699_v58 }
 0x588   :  { %v1708_v60 = vmul.f32 %v3382_v40, %v1700_v61  ;;  %v1710_v7 = vadd.f32 %v1706_v62, %v1622_v4  ;;  %3391 = vtanh.f32 %v1709_v63  ;;  %v3384_v9 = vpop.eup %3383  ;;  %v1879_v61 = vld [vmem:[#allocation4 + $0x5] sm:$0x1]  ;;  %v1880_v4 = vld [vmem:[#allocation4 + $0xd] sm:$0x1] }
 0x589   :  { %v1711_v8 = vadd.f32 %v1707_v17, %v1623_v5  ;;  %v3386_v12 = vpop.eup %3385  ;;  %v1717_v22 = vsub.f32 1.0, %v3384_v9  ;;  %v1725_v6 = vmul.f32 %v3384_v9, %v4049_v10  ;;  %v1881_v17 = vld [vmem:[#allocation4 + $0x15] sm:$0x1] }
 0x58a   :  { %v1712_v46 = vadd.f32 %v1708_v60, %v1624_v2  ;;  %3393 = vtanh.f32 %v1710_v7  ;;  %v3388_v14 = vpop.eup %3387  ;;  %v1718_v11 = vsub.f32 1.0, %v3386_v12  ;;  %v1726_v31 = vmul.f32 %v3386_v12, %v4052_v23 }
 0x58b   :  { %3395 = vtanh.f32 %v1711_v8  ;;  %v3390_v19 = vpop.eup %3389  ;;  %v1719_v21 = vsub.f32 1.0, %v3388_v14  ;;  %v1727_v20 = vmul.f32 %v3388_v14, %v4057_v24  ;;  %v1882_v14 = vld [vmem:[#allocation4 + $0x1d] sm:$0x1] }
 0x58c   :  { %3397 = vtanh.f32 %v1712_v46  ;;  %v1720_v30 = vsub.f32 1.0, %v3390_v19  ;;  %v1728_v10 = vmul.f32 %v3390_v19, %v4061_v49 }
 0x592   :  { %v3392_v0 = vpop.eup %3391 }
 0x593   :  { %v1721_v18 = vmul.f32 %v3392_v0, %v1717_v22 }
 0x594   :  { %v3394_v1 = vpop.eup %3393 }
 0x595   :  { %v3396_v29 = vpop.eup %3395  ;;  %v1722_v32 = vmul.f32 %v3394_v1, %v1718_v11  ;;  %v4119_v33 = vadd.f32 %v1725_v6, %v1721_v18 }
 0x596   :  { %v3398_v34 = vpop.eup %3397  ;;  %v1723_v35 = vmul.f32 %v3396_v29, %v1719_v21  ;;  %v1883_v21 = vld [vmem:[#allocation5 + $0x5] sm:$0x1]  ;;  %v1884_v29 = vld [vmem:[#allocation5 + $0xd] sm:$0x1] }
 0x597   :  { %v1724_v36 = vmul.f32 %v3398_v34, %v1720_v30  ;;  %v4122_v37 = vadd.f32 %v1726_v31, %v1722_v32  ;;  %1733 = vst.msk [vmem:[#allocation3 + $0x4] sm:$0x1] %vm665_vm3, %v4119_v33  ;;  %v1737_v39 = vpack.c.bf16 %v4119_v33, %v4119_v33  ;;  %v1885_v30 = vld [vmem:[#allocation5 + $0x15] sm:$0x1] }
 0x598   :  { %v4127_v38 = vadd.f32 %v1727_v20, %v1723_v35 }
 0x599   :  { %1734 = vst.msk [vmem:[#allocation3 + $0xc] sm:$0x1] %vm665_vm3, %v4122_v37  ;;  %v4131_v23 = vadd.f32 %v1728_v10, %v1724_v36  ;;  %v1738_v24 = vpack.c.bf16 %v4122_v37, %v4122_v37  ;;  %v1745_v50 = vunpack.c.l.b16 %v1737_v39  ;;  %v1886_v36 = vld [vmem:[#allocation5 + $0x1d] sm:$0x1] }
 0x59a   :  { %1735 = vst.msk [vmem:[#allocation3 + $0x14] sm:$0x1] %vm665_vm3, %v4127_v38  ;;  %v1739_v43 = vpack.c.bf16 %v4127_v38, %v4127_v38 }
 0x59b   :  { %1736 = vst.msk [vmem:[#allocation3 + $0x1c] sm:$0x1] %vm665_vm3, %v4131_v23  ;;  %v1740_v49 = vpack.c.bf16 %v4131_v23, %v4131_v23  ;;  %v1746_v44 = vunpack.c.l.b16 %v1738_v24 }
 0x59c   :  { %v1747_v47 = vunpack.c.l.b16 %v1739_v43 }
 0x59d   :  { %v1748_v52 = vunpack.c.l.b16 %v1740_v49  ;;  %v1749_v53 = vrot.slane %v1746_v44, 7 }
 0x59e   :  { %v1751_v48 = vrot.slane %v1747_v47, 6 }
 0x59f   :  { %v1750_v41 = vsel %vm683_vm4, %v1749_v53, %v1745_v50  ;;  %v1753_v54 = vrot.slane %v1748_v52, 5 }
 0x5a0   :  { %v1752_v55 = vsel %vm686_vm5, %v1751_v48, %v1750_v41 }
 0x5a1   :  { %v1754_v3 = vsel %vm689_vm6, %v1753_v54, %v1752_v55 }
 0x5a2   :  { %v1755_v56 = vpack.c.b16 %v1754_v3, %v1754_v3 }
 0x5a4   :  { %3099 = vmatmul.mubr.msk.bf16.vlgmr.msra.gmra.mrb[36].mxu0 %vm123_vm0, %v1755_v56  ;;  %3107 = vmatmul.mubr.msk.bf16.vlgmr.msra.gmra.mrb[36].mxu1 %vm123_vm0, %v1755_v56 }
 0x5a5   :  { %3111 = vmatpush3.bf16.msra.mxu0 %v4013_v15  ;;  %3114 = vmatprep.mubr.msk.bf16.mxu0 %vm3672_vm2, %v3671_v13 }
 0x5a6   :  { %3112 = vmatprep.subr.bf16.mxu0 %v3671_v13  ;;  %3119 = vmatpush3.bf16.msra.mxu1 %v4019_v25 }
 0x5a7   :  { %3120 = vmatprep.subr.bf16.mxu1 %v3671_v13  ;;  %3122 = vmatprep.mubr.msk.bf16.mxu1 %vm3672_vm2, %v3671_v13 }
 0x5a9   :  { %3113 = vmatpush3.bf16.msra.mxu0 %v4025_v26 }
 0x5aa   :  { %3126 = vmatprep.subr.bf16.mxu0 %v3671_v13  ;;  %3121 = vmatpush3.bf16.msra.mxu1 %v4029_v27 }
 0x5ab   :  { %3134 = vmatprep.subr.bf16.mxu1 %v3671_v13 }
 0x5ac   :  { %3115 = vmatmul.mubr.msk.bf16.vlgmr.msra.gmra.mrb[40].mxu0 %vm123_vm0, %v1755_v56 }
 0x5ad   :  { %3127 = vmatpush3.bf16.msra.mxu0 %v4034_v28  ;;  %3130 = vmatprep.mubr.msk.bf16.mxu0 %vm3672_vm2, %v3671_v13 }
 0x5ae   :  { %3128 = vmatprep.subr.bf16.mxu0 %v3671_v13 }
 0x5b1   :  { %3129 = vmatpush3.bf16.msra.mxu0 %v4040_v16 }
 0x5b2   :  { %3142 = vmatprep.subr.bf16.mxu0 %v3671_v13 }
 0x677   :  { %v1793_v57 = vpop.f32.mrb[36].mxu0  ;;  %v1833_v58 = vpop.f32.mrb[36].mxu1 }
 0x678   :  { %v1794_v59 = vadd.f32 %v4102_v42, %v1793_v57  ;;  %v1834_v62 = vadd.f32 %v4108_v45, %v1833_v58  ;;  %v3100_v63 = vpop.f32.mrb[37].mxu0  ;;  %v3108_v40 = vpop.f32.mrb[37].mxu1 }
 0x679   :  { %v1796_v5 = vpop.f32.mrb[38].mxu0  ;;  %v1836_v60 = vpop.f32.mrb[38].mxu1 }
 0x67a   :  { %v1892_v7 = vrot.slane %v1794_v59, 1  ;;  %v1893_v2 = vrot.slane %v1794_v59, 2  ;;  %v1894_v8 = vrot.slane %v1794_v59, 3  ;;  %v1899_v46 = vadd.f32 %v1879_v61, %v1794_v59  ;;  %v3101_v9 = vpop.f32.mrb[39].mxu0  ;;  %v3109_v12 = vpop.f32.mrb[39].mxu1 }
 0x67b   :  { %v1928_v19 = vrot.slane %v1834_v62, 1  ;;  %v1929_v22 = vrot.slane %v1834_v62, 2  ;;  %v1930_v0 = vrot.slane %v1834_v62, 3  ;;  %v1935_v31 = vadd.f32 %v1883_v21, %v1834_v62  ;;  %v1887_v9 = vld [vmem:[#allocation6 + $0x5] sm:$0x1] }
 0x67c   :  { %v1900_v11 = vadd.f32 %v1892_v7, %v1880_v4  ;;  %v1901_v6 = vadd.f32 %v1893_v2, %v1881_v17  ;;  %v1902_v18 = vadd.f32 %v1894_v8, %v1882_v14  ;;  %v2821_v1 = vmul.f32 -1.442695, %v1899_v46 }
 0x67d   :  { %v1936_v32 = vadd.f32 %v1928_v19, %v1884_v29  ;;  %v1937_v10 = vadd.f32 %v1929_v22, %v1885_v30  ;;  %v1938_v39 = vadd.f32 %v1930_v0, %v1886_v36  ;;  %v2825_v43 = vmul.f32 -1.442695, %v1935_v31  ;;  %v1890_v30 = vld [vmem:[#allocation6 + $0x1d] sm:$0x1] }
 0x67e   :  { %3399 = vpow2.f32 %v2821_v1  ;;  %v2822_v34 = vmul.f32 -1.442695, %v1900_v11  ;;  %v2823_v20 = vmul.f32 -1.442695, %v1901_v6  ;;  %v2824_v35 = vmul.f32 -1.442695, %v1902_v18 }
 0x67f   :  { %v1873_v24 = vpop.f32.mrb[40].mxu0  ;;  %v2826_v44 = vmul.f32 -1.442695, %v1936_v32  ;;  %v2827_v50 = vmul.f32 -1.442695, %v1937_v10 }
 0x680   :  { %3401 = vpow2.f32 %v2822_v34  ;;  %v3116_v49 = vpop.f32.mrb[41].mxu0  ;;  %v2828_v53 = vmul.f32 -1.442695, %v1938_v39  ;;  %v1874_v4 = vadd.f32 %v4114_v51, %v1873_v24  ;;  %v1888_v6 = vld [vmem:[#allocation6 + $0xd] sm:$0x1] }
 0x681   :  { %3403 = vpow2.f32 %v2823_v20  ;;  %v1876_v47 = vpop.f32.mrb[42].mxu0  ;;  %v1889_v1 = vld [vmem:[#allocation6 + $0x15] sm:$0x1] }
 0x682   :  { %3405 = vpow2.f32 %v2824_v35  ;;  %v3117_v52 = vpop.f32.mrb[43].mxu0  ;;  %v1964_v2 = vrot.slane %v1874_v4, 1  ;;  %v1965_v12 = vrot.slane %v1874_v4, 2  ;;  %v1966_v19 = vrot.slane %v1874_v4, 3 }
 0x683   :  { %3407 = vpow2.f32 %v2825_v43 }
 0x684   :  { %3409 = vpow2.f32 %v2826_v44 }
 0x685   :  { %3411 = vpow2.f32 %v2827_v50 }
 0x686   :  { %3413 = vpow2.f32 %v2828_v53 }
 0x688   :  { %v3400_v48 = vpop.eup %3399 }
 0x689   :  { %v1915_v41 = vadd.f32 1.0, %v3400_v48 }
 0x68a   :  { %v3402_v54 = vpop.eup %3401 }
 0x68b   :  { %v3404_v55 = vpop.eup %3403  ;;  %v1916_v3 = vadd.f32 1.0, %v3402_v54  ;;  %3415 = vrcp.f32 %v1915_v41 }
 0x68c   :  { %v3406_v56 = vpop.eup %3405  ;;  %v1917_v57 = vadd.f32 1.0, %v3404_v55 }
 0x68d   :  { %v1918_v58 = vadd.f32 1.0, %v3406_v56  ;;  %3417 = vrcp.f32 %v1916_v3  ;;  %v3408_v59 = vpop.eup %3407 }
 0x68e   :  { %3419 = vrcp.f32 %v1917_v57  ;;  %v3410_v61 = vpop.eup %3409  ;;  %v1951_v40 = vadd.f32 1.0, %v3408_v59 }
 0x68f   :  { %3421 = vrcp.f32 %v1918_v58  ;;  %v3412_v62 = vpop.eup %3411  ;;  %v1952_v17 = vadd.f32 1.0, %v3410_v61 }
 0x690   :  { %v3414_v63 = vpop.eup %3413  ;;  %v1953_v5 = vadd.f32 1.0, %v3412_v62  ;;  %3423 = vrcp.f32 %v1951_v40 }
 0x691   :  { %v1954_v7 = vadd.f32 1.0, %v3414_v63  ;;  %3425 = vrcp.f32 %v1952_v17 }
 0x692   :  { %3427 = vrcp.f32 %v1953_v5 }
 0x693   :  { %3429 = vrcp.f32 %v1954_v7 }
 0x695   :  { %v3416_v60 = vpop.eup %3415 }
 0x696   :  { %v1971_v8 = vmul.f32 %v3416_v60, %v1874_v4 }
 0x697   :  { %v3418_v46 = vpop.eup %3417 }
 0x698   :  { %v3420_v14 = vpop.eup %3419  ;;  %v1972_v22 = vmul.f32 %v3418_v46, %v1964_v2  ;;  %v1975_v0 = vadd.f32 %v1971_v8, %v1887_v9  ;;  %v2145_v9 = vld [vmem:[#allocation4 + $0x6] sm:$0x1] }
 0x699   :  { %v3422_v11 = vpop.eup %3421  ;;  %v1973_v18 = vmul.f32 %v3420_v14, %v1965_v12 }
 0x69a   :  { %v1974_v21 = vmul.f32 %v3422_v11, %v1966_v19  ;;  %v1976_v29 = vadd.f32 %v1972_v22, %v1888_v6  ;;  %3431 = vtanh.f32 %v1975_v0  ;;  %v3424_v34 = vpop.eup %3423  ;;  %v2146_v19 = vld [vmem:[#allocation4 + $0xe] sm:$0x1]  ;;  %v2147_v22 = vld [vmem:[#allocation4 + $0x16] sm:$0x1] }
 0x69b   :  { %v1977_v31 = vadd.f32 %v1973_v18, %v1889_v1  ;;  %v3426_v20 = vpop.eup %3425  ;;  %v1983_v10 = vsub.f32 1.0, %v3424_v34  ;;  %v1991_v43 = vmul.f32 %v3424_v34, %v4119_v33 }
 0x69c   :  { %v1978_v32 = vadd.f32 %v1974_v21, %v1890_v30  ;;  %3433 = vtanh.f32 %v1976_v29  ;;  %v3428_v35 = vpop.eup %3427  ;;  %v1984_v24 = vsub.f32 1.0, %v3426_v20  ;;  %v1992_v53 = vmul.f32 %v3426_v20, %v4122_v37 }
 0x69d   :  { %3435 = vtanh.f32 %v1977_v31  ;;  %v3430_v36 = vpop.eup %3429  ;;  %v1985_v47 = vsub.f32 1.0, %v3428_v35  ;;  %v1993_v55 = vmul.f32 %v3428_v35, %v4127_v38 }
 0x69e   :  { %3437 = vtanh.f32 %v1978_v32  ;;  %v1986_v52 = vsub.f32 1.0, %v3430_v36  ;;  %v1994_v33 = vmul.f32 %v3430_v36, %v4131_v23 }
 0x6a4   :  { %v3432_v39 = vpop.eup %3431 }
 0x6a5   :  { %v1987_v49 = vmul.f32 %v3432_v39, %v1983_v10  ;;  %v2149_v10 = vld [vmem:[#allocation5 + $0x6] sm:$0x1]  ;;  %v2150_v39 = vld [vmem:[#allocation5 + $0xe] sm:$0x1] }
 0x6a6   :  { %v3434_v44 = vpop.eup %3433 }
 0x6a7   :  { %v3436_v50 = vpop.eup %3435  ;;  %v1988_v48 = vmul.f32 %v3434_v44, %v1984_v24  ;;  %v4174_v41 = vadd.f32 %v1991_v43, %v1987_v49  ;;  %v2151_v24 = vld [vmem:[#allocation5 + $0x16] sm:$0x1] }
 0x6a8   :  { %v3438_v54 = vpop.eup %3437  ;;  %v1989_v3 = vmul.f32 %v3436_v50, %v1985_v47 }
 0x6a9   :  { %v1990_v56 = vmul.f32 %v3438_v54, %v1986_v52  ;;  %v4177_v57 = vadd.f32 %v1992_v53, %v1988_v48  ;;  %1999 = vst.msk [vmem:[#allocation3 + $0x5] sm:$0x1] %vm665_vm3, %v4174_v41  ;;  %v2003_v59 = vpack.c.bf16 %v4174_v41, %v4174_v41  ;;  %v2152_v52 = vld [vmem:[#allocation5 + $0x1e] sm:$0x1] }
 0x6aa   :  { %v4182_v58 = vadd.f32 %v1993_v55, %v1989_v3 }
 0x6ab   :  { %2000 = vst.msk [vmem:[#allocation3 + $0xd] sm:$0x1] %vm665_vm3, %v4177_v57  ;;  %v4186_v37 = vadd.f32 %v1994_v33, %v1990_v56  ;;  %v2004_v38 = vpack.c.bf16 %v4177_v57, %v4177_v57  ;;  %v2011_v40 = vunpack.c.l.b16 %v2003_v59 }
 0x6ac   :  { %2001 = vst.msk [vmem:[#allocation3 + $0x15] sm:$0x1] %vm665_vm3, %v4182_v58  ;;  %v2005_v61 = vpack.c.bf16 %v4182_v58, %v4182_v58 }
 0x6ad   :  { %2002 = vst.msk [vmem:[#allocation3 + $0x1d] sm:$0x1] %vm665_vm3, %v4186_v37  ;;  %v2006_v23 = vpack.c.bf16 %v4186_v37, %v4186_v37  ;;  %v2012_v62 = vunpack.c.l.b16 %v2004_v38 }
 0x6ae   :  { %v2013_v63 = vunpack.c.l.b16 %v2005_v61 }
 0x6af   :  { %v2014_v4 = vunpack.c.l.b16 %v2006_v23  ;;  %v2015_v17 = vrot.slane %v2012_v62, 7 }
 0x6b0   :  { %v2017_v5 = vrot.slane %v2013_v63, 6 }
 0x6b1   :  { %v2016_v60 = vsel %vm683_vm4, %v2015_v17, %v2011_v40  ;;  %v2019_v7 = vrot.slane %v2014_v4, 5 }
 0x6b2   :  { %v2018_v2 = vsel %vm686_vm5, %v2017_v5, %v2016_v60 }
 0x6b3   :  { %v2020_v8 = vsel %vm689_vm6, %v2019_v7, %v2018_v2 }
 0x6b4   :  { %v2021_v46 = vpack.c.b16 %v2020_v8, %v2020_v8 }
 0x6b6   :  { %3123 = vmatmul.mubr.msk.bf16.vlgmr.msra.gmra.mrb[40].mxu1 %vm123_vm0, %v2021_v46  ;;  %3131 = vmatmul.mubr.msk.bf16.vlgmr.msra.gmra.mrb[44].mxu0 %vm123_vm0, %v2021_v46 }
 0x6b7   :  { %3135 = vmatpush3.bf16.msra.mxu1 %v4013_v15  ;;  %3138 = vmatprep.mubr.msk.bf16.mxu1 %vm3672_vm2, %v3671_v13 }
 0x6b8   :  { %3136 = vmatprep.subr.bf16.mxu1 %v3671_v13  ;;  %3143 = vmatpush3.bf16.msra.mxu0 %v4019_v25 }
 0x6b9   :  { %3144 = vmatprep.subr.bf16.mxu0 %v3671_v13  ;;  %3146 = vmatprep.mubr.msk.bf16.mxu0 %vm3672_vm2, %v3671_v13 }
 0x6bb   :  { %3137 = vmatpush3.bf16.msra.mxu1 %v4025_v26 }
 0x6bc   :  { %3150 = vmatprep.subr.bf16.mxu1 %v3671_v13  ;;  %3145 = vmatpush3.bf16.msra.mxu0 %v4029_v27 }
 0x6bd   :  { %3158 = vmatprep.subr.bf16.mxu0 %v3671_v13 }
 0x6be   :  { %3139 = vmatmul.mubr.msk.bf16.vlgmr.msra.gmra.mrb[44].mxu1 %vm123_vm0, %v2021_v46 }
 0x6bf   :  { %3151 = vmatpush3.bf16.msra.mxu1 %v4034_v28  ;;  %3154 = vmatprep.mubr.msk.bf16.mxu1 %vm3672_vm2, %v3671_v13 }
 0x6c0   :  { %3152 = vmatprep.subr.bf16.mxu1 %v3671_v13 }
 0x6c3   :  { %3153 = vmatpush3.bf16.msra.mxu1 %v4040_v16  ;;  %v2148_v16 = vld [vmem:[#allocation4 + $0x1e] sm:$0x1] }
 0x789   :  { %v2059_v15 = vpop.f32.mrb[40].mxu1  ;;  %v2099_v25 = vpop.f32.mrb[44].mxu0 }
 0x78a   :  { %v2060_v26 = vadd.f32 %v4102_v42, %v2059_v15  ;;  %v2100_v27 = vadd.f32 %v4108_v45, %v2099_v25  ;;  %v3124_v12 = vpop.f32.mrb[41].mxu1  ;;  %v3132_v14 = vpop.f32.mrb[45].mxu0 }
 0x78b   :  { %v2062_v0 = vpop.f32.mrb[42].mxu1  ;;  %v2102_v28 = vpop.f32.mrb[46].mxu0 }
 0x78c   :  { %v2158_v11 = vrot.slane %v2060_v26, 1  ;;  %v2159_v6 = vrot.slane %v2060_v26, 2  ;;  %v2160_v18 = vrot.slane %v2060_v26, 3  ;;  %v2165_v1 = vadd.f32 %v2145_v9, %v2060_v26  ;;  %v3125_v21 = vpop.f32.mrb[43].mxu1  ;;  %v3133_v29 = vpop.f32.mrb[47].mxu0 }
 0x78d   :  { %v2194_v30 = vrot.slane %v2100_v27, 1  ;;  %v2195_v31 = vrot.slane %v2100_v27, 2  ;;  %v2196_v32 = vrot.slane %v2100_v27, 3  ;;  %v2201_v43 = vadd.f32 %v2149_v10, %v2100_v27  ;;  %v2153_v0 = vld [vmem:[#allocation6 + $0x6] sm:$0x1] }
 0x78e   :  { %v2166_v34 = vadd.f32 %v2158_v11, %v2146_v19  ;;  %v2167_v20 = vadd.f32 %v2159_v6, %v2147_v22  ;;  %v2168_v35 = vadd.f32 %v2160_v18, %v2148_v16  ;;  %v2832_v36 = vmul.f32 -1.442695, %v2165_v1  ;;  %v2154_v29 = vld [vmem:[#allocation6 + $0xe] sm:$0x1] }
 0x78f   :  { %v2202_v49 = vadd.f32 %v2194_v30, %v2150_v39  ;;  %v2203_v53 = vadd.f32 %v2195_v31, %v2151_v24  ;;  %v2204_v48 = vadd.f32 %v2196_v32, %v2152_v52  ;;  %v2836_v55 = vmul.f32 -1.442695, %v2201_v43  ;;  %v2155_v30 = vld [vmem:[#allocation6 + $0x16] sm:$0x1] }
 0x790   :  { %3439 = vpow2.f32 %v2832_v36  ;;  %v2833_v44 = vmul.f32 -1.442695, %v2166_v34  ;;  %v2834_v47 = vmul.f32 -1.442695, %v2167_v20  ;;  %v2835_v50 = vmul.f32 -1.442695, %v2168_v35 }
 0x791   :  { %v2139_v54 = vpop.f32.mrb[44].mxu1  ;;  %v2837_v56 = vmul.f32 -1.442695, %v2202_v49  ;;  %v2838_v59 = vmul.f32 -1.442695, %v2203_v53 }
 0x792   :  { %3441 = vpow2.f32 %v2833_v44  ;;  %v3140_v3 = vpop.f32.mrb[45].mxu1  ;;  %v2839_v61 = vmul.f32 -1.442695, %v2204_v48  ;;  %v2140_v25 = vadd.f32 %v4114_v51, %v2139_v54  ;;  %v2156_v34 = vld [vmem:[#allocation6 + $0x1e] sm:$0x1] }
 0x793   :  { %3443 = vpow2.f32 %v2834_v47  ;;  %v2142_v33 = vpop.f32.mrb[46].mxu1 }
 0x794   :  { %3445 = vpow2.f32 %v2835_v50  ;;  %v3141_v38 = vpop.f32.mrb[47].mxu1  ;;  %v2230_v14 = vrot.slane %v2140_v25, 1  ;;  %v2231_v28 = vrot.slane %v2140_v25, 2  ;;  %v2232_v6 = vrot.slane %v2140_v25, 3 }
 0x795   :  { %3447 = vpow2.f32 %v2836_v55 }
 0x796   :  { %3449 = vpow2.f32 %v2837_v56 }
 0x797   :  { %3451 = vpow2.f32 %v2838_v59 }
 0x798   :  { %3453 = vpow2.f32 %v2839_v61 }
 0x79a   :  { %v3440_v23 = vpop.eup %3439 }
 0x79b   :  { %v2181_v62 = vadd.f32 1.0, %v3440_v23 }
 0x79c   :  { %v3442_v63 = vpop.eup %3441 }
 0x79d   :  { %v3444_v40 = vpop.eup %3443  ;;  %v2182_v4 = vadd.f32 1.0, %v3442_v63  ;;  %3455 = vrcp.f32 %v2181_v62 }
 0x79e   :  { %v3446_v17 = vpop.eup %3445  ;;  %v2183_v5 = vadd.f32 1.0, %v3444_v40 }
 0x79f   :  { %v2184_v60 = vadd.f32 1.0, %v3446_v17  ;;  %3457 = vrcp.f32 %v2182_v4  ;;  %v3448_v7 = vpop.eup %3447 }
 0x7a0   :  { %3459 = vrcp.f32 %v2183_v5  ;;  %v3450_v2 = vpop.eup %3449  ;;  %v2217_v15 = vadd.f32 1.0, %v3448_v7 }
 0x7a1   :  { %3461 = vrcp.f32 %v2184_v60  ;;  %v3452_v8 = vpop.eup %3451  ;;  %v2218_v26 = vadd.f32 1.0, %v3450_v2 }
 0x7a2   :  { %v3454_v46 = vpop.eup %3453  ;;  %v2219_v9 = vadd.f32 1.0, %v3452_v8  ;;  %3463 = vrcp.f32 %v2217_v15 }
 0x7a3   :  { %v2220_v12 = vadd.f32 1.0, %v3454_v46  ;;  %3465 = vrcp.f32 %v2218_v26 }
 0x7a4   :  { %3467 = vrcp.f32 %v2219_v9  ;;  %v3544_v9 = vld [vmem:[#allocation12 + $0x20] sm:$0xff]  }
 0x7a5   :  { %3469 = vrcp.f32 %v2220_v12  ;;  %v3197_v12 = vld [vmem:[%s4343_s6] sm:$0xff]  }
 0x7a6   :  { %3166 = vmatprep.subr.bf16.mxu1 %v3197_v12 }
 0x7a7   :  { %v3456_v27 = vpop.eup %3455 }
 0x7a8   :  { %v2237_v19 = vmul.f32 %v3456_v27, %v2140_v25  ;;  %v3545_v27 = vld [vmem:[#allocation12 + $0x28] sm:$0xff]  }
 0x7a9   :  { %v3458_v22 = vpop.eup %3457 }
 0x7aa   :  { %v3460_v11 = vpop.eup %3459  ;;  %v2238_v18 = vmul.f32 %v3458_v22, %v2230_v14  ;;  %v2241_v1 = vadd.f32 %v2237_v19, %v2153_v0  ;;  %v3198_v14 = vld [vmem:[%s4343_s6 + $0x8] sm:$0xff]  }
 0x7ab   :  { %v3462_v21 = vpop.eup %3461  ;;  %v2239_v16 = vmul.f32 %v3460_v11, %v2231_v28  ;;  %v2411_v0 = vld [vmem:[#allocation4 + $0x7] sm:$0x1] }
 0x7ac   :  { %v2240_v31 = vmul.f32 %v3462_v21, %v2232_v6  ;;  %v2242_v32 = vadd.f32 %v2238_v18, %v2154_v29  ;;  %3471 = vtanh.f32 %v2241_v1  ;;  %v3464_v36 = vpop.eup %3463  ;;  %v2412_v18 = vld [vmem:[#allocation4 + $0xf] sm:$0x1]  ;;  %v2413_v1 = vld [vmem:[#allocation4 + $0x17] sm:$0x1] }
 0x7ad   :  { %v2243_v20 = vadd.f32 %v2239_v16, %v2155_v30  ;;  %v3466_v10 = vpop.eup %3465  ;;  %v2249_v43 = vsub.f32 1.0, %v3464_v36  ;;  %v2257_v47 = vmul.f32 %v3464_v36, %v4174_v41 }
 0x7ae   :  { %v2244_v35 = vadd.f32 %v2240_v31, %v2156_v34  ;;  %3473 = vtanh.f32 %v2242_v32  ;;  %v3468_v39 = vpop.eup %3467  ;;  %v2250_v44 = vsub.f32 1.0, %v3466_v10  ;;  %v2258_v55 = vmul.f32 %v3466_v10, %v4177_v57 }
 0x7af   :  { %3475 = vtanh.f32 %v2243_v20  ;;  %v3470_v24 = vpop.eup %3469  ;;  %v2251_v53 = vsub.f32 1.0, %v3468_v39  ;;  %v2259_v59 = vmul.f32 %v3468_v39, %v4182_v58 }
 0x7b0   :  { %3477 = vtanh.f32 %v2244_v35  ;;  %v2252_v54 = vsub.f32 1.0, %v3470_v24  ;;  %v2260_v41 = vmul.f32 %v3470_v24, %v4186_v37  ;;  %v2414_v35 = vld [vmem:[#allocation4 + $0x1f] sm:$0x1] }
 0x7b6   :  { %v3472_v49 = vpop.eup %3471 }
 0x7b7   :  { %v2253_v50 = vmul.f32 %v3472_v49, %v2249_v43  ;;  %v2415_v49 = vld [vmem:[#allocation5 + $0x7] sm:$0x1] }
 0x7b8   :  { %v3474_v52 = vpop.eup %3473 }
 0x7b9   :  { %v3476_v48 = vpop.eup %3475  ;;  %v2254_v3 = vmul.f32 %v3474_v52, %v2250_v44  ;;  %v4228_v56 = vadd.f32 %v2257_v47, %v2253_v50  ;;  %v2416_v44 = vld [vmem:[#allocation5 + $0xf] sm:$0x1]  ;;  %v2417_v47 = vld [vmem:[#allocation5 + $0x17] sm:$0x1] }
 0x7ba   :  { %v3478_v33 = vpop.eup %3477  ;;  %v2255_v38 = vmul.f32 %v3476_v48, %v2251_v53 }
 0x7bb   :  { %v2256_v61 = vmul.f32 %v3478_v33, %v2252_v54  ;;  %v4231_v23 = vadd.f32 %v2258_v55, %v2254_v3  ;;  %2265 = vst.msk [vmem:[#allocation3 + $0x6] sm:$0x1] %vm665_vm3, %v4228_v56  ;;  %v2269_v63 = vpack.c.bf16 %v4228_v56, %v4228_v56  ;;  %v2418_v55 = vld [vmem:[#allocation5 + $0x1f] sm:$0x1] }
 0x7bc   :  { %v4236_v62 = vadd.f32 %v2259_v59, %v2255_v38 }
 0x7bd   :  { %2266 = vst.msk [vmem:[#allocation3 + $0xe] sm:$0x1] %vm665_vm3, %v4231_v23  ;;  %v4240_v57 = vadd.f32 %v2260_v41, %v2256_v61  ;;  %v2270_v58 = vpack.c.bf16 %v4231_v23, %v4231_v23  ;;  %v2277_v5 = vunpack.c.l.b16 %v2269_v63 }
 0x7be   :  { %2267 = vst.msk [vmem:[#allocation3 + $0x16] sm:$0x1] %vm665_vm3, %v4236_v62  ;;  %v2271_v40 = vpack.c.bf16 %v4236_v62, %v4236_v62 }
 0x7bf   :  { %2268 = vst.msk [vmem:[#allocation3 + $0x1e] sm:$0x1] %vm665_vm3, %v4240_v57  ;;  %v2272_v37 = vpack.c.bf16 %v4240_v57, %v4240_v57  ;;  %v2278_v4 = vunpack.c.l.b16 %v2270_v58 }
 0x7c0   :  { %v2279_v17 = vunpack.c.l.b16 %v2271_v40 }
 0x7c1   :  { %v2280_v60 = vunpack.c.l.b16 %v2272_v37  ;;  %v2281_v7 = vrot.slane %v2278_v4, 7 }
 0x7c2   :  { %v2283_v2 = vrot.slane %v2279_v17, 6 }
 0x7c3   :  { %v2282_v8 = vsel %vm683_vm4, %v2281_v7, %v2277_v5  ;;  %v2285_v46 = vrot.slane %v2280_v60, 5 }
 0x7c4   :  { %v2284_v15 = vsel %vm686_vm5, %v2283_v2, %v2282_v8 }
 0x7c5   :  { %v2286_v25 = vsel %vm689_vm6, %v2285_v46, %v2284_v15 }
 0x7c6   :  { %v2287_v26 = vpack.c.b16 %v2286_v25, %v2286_v25 }
 0x7c8   :  { %3147 = vmatmul.mubr.msk.bf16.vlgmr.msra.gmra.mrb[48].mxu0 %vm123_vm0, %v2287_v26  ;;  %3155 = vmatmul.mubr.msk.bf16.vlgmr.msra.gmra.mrb[48].mxu1 %vm123_vm0, %v2287_v26 }
 0x7c9   :  { %3159 = vmatpush3.bf16.msra.mxu0 %v3544_v9  ;;  %3162 = vmatprep.mubr.msk.bf16.mxu0 %vm3672_vm2, %v3671_v13 }
 0x7ca   :  { %3160 = vmatprep.subr.bf16.mxu0 %v3671_v13  ;;  %3167 = vmatpush3.bf16.msra.mxu1 %v3197_v12 }
 0x7cb   :  { %3168 = vmatprep.subr.bf16.mxu1 %v3198_v14 }
 0x7cd   :  { %3161 = vmatpush3.bf16.msra.mxu0 %v3545_v27 }
 0x7ce   :  { %3169 = vmatpush3.bf16.msra.mxu1 %v3198_v14 }
 0x7d0   :  { %3163 = vmatmul.mubr.msk.bf16.vlgmr.msra.gmra.mrb[52].mxu0 %vm123_vm0, %v2287_v26 }
 0x89b   :  { %v2325_v19 = vpop.f32.mrb[48].mxu0  ;;  %v2365_v22 = vpop.f32.mrb[48].mxu1 }
 0x89c   :  { %v2326_v13 = vadd.f32 %v4102_v42, %v2325_v19  ;;  %v2366_v28 = vadd.f32 %v4108_v45, %v2365_v22  ;;  %v3148_v11 = vpop.f32.mrb[49].mxu0  ;;  %v3156_v6 = vpop.f32.mrb[49].mxu1 }
 0x89d   :  { %v2328_v21 = vpop.f32.mrb[50].mxu0  ;;  %v2368_v29 = vpop.f32.mrb[50].mxu1  ;;  %v2419_v6 = vld [vmem:[#allocation6 + $0x7] sm:$0x1] }
 0x89e   :  { %v2424_v16 = vrot.slane %v2326_v13, 1  ;;  %v2425_v30 = vrot.slane %v2326_v13, 2  ;;  %v2426_v31 = vrot.slane %v2326_v13, 3  ;;  %v2431_v32 = vadd.f32 %v2411_v0, %v2326_v13  ;;  %v3149_v34 = vpop.f32.mrb[51].mxu0  ;;  %v3157_v20 = vpop.f32.mrb[51].mxu1 }
 0x89f   :  { %v2460_v36 = vrot.slane %v2366_v28, 1  ;;  %v2461_v10 = vrot.slane %v2366_v28, 2  ;;  %v2462_v39 = vrot.slane %v2366_v28, 3  ;;  %v2467_v50 = vadd.f32 %v2415_v49, %v2366_v28 }
 0x8a0   :  { %v2432_v42 = vadd.f32 %v2424_v16, %v2412_v18  ;;  %v2433_v24 = vadd.f32 %v2425_v30, %v2413_v1  ;;  %v2434_v43 = vadd.f32 %v2426_v31, %v2414_v35  ;;  %v2843_v45 = vmul.f32 -1.442695, %v2431_v32  ;;  %v2420_v31 = vld [vmem:[#allocation6 + $0xf] sm:$0x1]  ;;  %v2421_v32 = vld [vmem:[#allocation6 + $0x17] sm:$0x1] }
 0x8a1   :  { %v2468_v52 = vadd.f32 %v2460_v36, %v2416_v44  ;;  %v2469_v3 = vadd.f32 %v2461_v10, %v2417_v47  ;;  %v2470_v33 = vadd.f32 %v2462_v39, %v2418_v55  ;;  %v2847_v38 = vmul.f32 -1.442695, %v2467_v50  ;;  %v2422_v35 = vld [vmem:[#allocation6 + $0x1f] sm:$0x1] }
 0x8a2   :  { %3479 = vpow2.f32 %v2843_v45  ;;  %v2844_v53 = vmul.f32 -1.442695, %v2432_v42  ;;  %v2845_v48 = vmul.f32 -1.442695, %v2433_v24  ;;  %v2846_v54 = vmul.f32 -1.442695, %v2434_v43 }
 0x8a3   :  { %v2405_v59 = vpop.f32.mrb[52].mxu0  ;;  %v2848_v41 = vmul.f32 -1.442695, %v2468_v52  ;;  %v2849_v58 = vmul.f32 -1.442695, %v2469_v3 }
 0x8a4   :  { %3481 = vpow2.f32 %v2844_v53  ;;  %v3164_v61 = vpop.f32.mrb[53].mxu0  ;;  %v2850_v37 = vmul.f32 -1.442695, %v2470_v33  ;;  %v2406_v12 = vadd.f32 %v4114_v51, %v2405_v59 }
 0x8a5   :  { %3483 = vpow2.f32 %v2845_v48  ;;  %v2408_v63 = vpop.f32.mrb[54].mxu0 }
 0x8a6   :  { %3485 = vpow2.f32 %v2846_v54  ;;  %v3165_v40 = vpop.f32.mrb[55].mxu0  ;;  %v2496_v0 = vrot.slane %v2406_v12, 1  ;;  %v2497_v18 = vrot.slane %v2406_v12, 2  ;;  %v2498_v21 = vrot.slane %v2406_v12, 3 }
 0x8a7   :  { %3487 = vpow2.f32 %v2847_v38 }
 0x8a8   :  { %3489 = vpow2.f32 %v2848_v41 }
 0x8a9   :  { %3491 = vpow2.f32 %v2849_v58 }
 0x8aa   :  { %3493 = vpow2.f32 %v2850_v37 }
 0x8ac   :  { %v3480_v4 = vpop.eup %3479 }
 0x8ad   :  { %v2447_v17 = vadd.f32 1.0, %v3480_v4 }
 0x8ae   :  { %v3482_v5 = vpop.eup %3481 }
 0x8af   :  { %v3484_v60 = vpop.eup %3483  ;;  %v2448_v7 = vadd.f32 1.0, %v3482_v5  ;;  %3495 = vrcp.f32 %v2447_v17 }
 0x8b0   :  { %v3486_v2 = vpop.eup %3485  ;;  %v2449_v8 = vadd.f32 1.0, %v3484_v60 }
 0x8b1   :  { %v2450_v46 = vadd.f32 1.0, %v3486_v2  ;;  %3497 = vrcp.f32 %v2448_v7  ;;  %v3488_v15 = vpop.eup %3487 }
 0x8b2   :  { %3499 = vrcp.f32 %v2449_v8  ;;  %v3490_v25 = vpop.eup %3489  ;;  %v2483_v27 = vadd.f32 1.0, %v3488_v15  ;;  %v2851_v15 = vld [vmem:[%s4344_s7] ss:$0 sm:$0xff]  ;;  %s3673_s7 = smov [#allocation14]  }
 0x8b3   :  { %3501 = vrcp.f32 %v2450_v46  ;;  %v3492_v26 = vpop.eup %3491  ;;  %v2484_v14 = vadd.f32 1.0, %v3490_v25  ;;  %s2719_s4 = sshll.u32 %s3673_s7, 4  ;;  %s2720_s4 = int_to_ptr.vmem [resolvable:$true] %s2719_s4 }
 0x8b4   :  { %v3494_v9 = vpop.eup %3493  ;;  %v2485_v19 = vadd.f32 1.0, %v3492_v26  ;;  %3503 = vrcp.f32 %v2483_v27  ;;  %s3612_s19 = scalar_lea.vmem %s2720_s4, 64  ;;  %p3617_p11 = scmp.lt.s32.totalorder %s2720_s4, %s2720_s4 }
 0x8b5   :  { %v2486_v13 = vadd.f32 1.0, %v3494_v9  ;;  %3505 = vrcp.f32 %v2484_v14  ;;  %p3613_p10 = scmp.ne.s32.totalorder %s2720_s4, %s3612_s19  ;;  %p3618_p12 = scmp.lt.s32.totalorder %s3612_s19, %s3612_s19 }
 0x8b6   :  { %3507 = vrcp.f32 %v2485_v19 }
 0x8b7   :  { %3509 = vrcp.f32 %v2486_v13  ;;  %p3619_p13 = por %p3618_p12, %p3617_p11 }
 0x8b9   :  { %v3496_v22 = vpop.eup %3495  ;;  %p3620_p0 = pnand %p3619_p13, %p3613_p10 }
 0x8ba   :  { %v2503_v28 = vmul.f32 %v3496_v22, %v2406_v12 }
 0x8bb   :  { %v3498_v11 = vpop.eup %3497 }
 0x8bc   :  { %v3500_v1 = vpop.eup %3499  ;;  %v2504_v29 = vmul.f32 %v3498_v11, %v2496_v0  ;;  %v2507_v16 = vadd.f32 %v2503_v28, %v2419_v6 }
 0x8bd   :  { %v3502_v30 = vpop.eup %3501  ;;  %v2505_v51 = vmul.f32 %v3500_v1, %v2497_v18 }
 0x8be   :  { %v2506_v34 = vmul.f32 %v3502_v30, %v2498_v21  ;;  %v2508_v20 = vadd.f32 %v2504_v29, %v2420_v31  ;;  %3511 = vtanh.f32 %v2507_v16  ;;  %v3504_v39 = vpop.eup %3503 }
 0x8bf   :  { %v2509_v36 = vadd.f32 %v2505_v51, %v2421_v32  ;;  %v3506_v42 = vpop.eup %3505  ;;  %v2515_v45 = vsub.f32 1.0, %v3504_v39  ;;  %v2523_v47 = vmul.f32 %v3504_v39, %v4228_v56 }
 0x8c0   :  { %v2510_v10 = vadd.f32 %v2506_v34, %v2422_v35  ;;  %3513 = vtanh.f32 %v2508_v20  ;;  %v3508_v24 = vpop.eup %3507  ;;  %v2516_v44 = vsub.f32 1.0, %v3506_v42  ;;  %v2524_v55 = vmul.f32 %v3506_v42, %v4231_v23 }
 0x8c1   :  { %3515 = vtanh.f32 %v2509_v36  ;;  %v3510_v43 = vpop.eup %3509  ;;  %v2517_v53 = vsub.f32 1.0, %v3508_v24  ;;  %v2525_v38 = vmul.f32 %v3508_v24, %v4236_v62 }
 0x8c2   :  { %3517 = vtanh.f32 %v2510_v10  ;;  %v2518_v54 = vsub.f32 1.0, %v3510_v43  ;;  %v2526_v41 = vmul.f32 %v3510_v43, %v4240_v57 }
 0x8c8   :  { %v3512_v49 = vpop.eup %3511 }
 0x8c9   :  { %v2519_v50 = vmul.f32 %v3512_v49, %v2515_v45 }
 0x8ca   :  { %v3514_v52 = vpop.eup %3513 }
 0x8cb   :  { %v3516_v48 = vpop.eup %3515  ;;  %v2520_v3 = vmul.f32 %v3514_v52, %v2516_v44  ;;  %v2527_v33 = vadd.f32 %v2523_v47, %v2519_v50 }
 0x8cc   :  { %v3518_v59 = vpop.eup %3517  ;;  %v2521_v61 = vmul.f32 %v3516_v48, %v2517_v53 }
 0x8cd   :  { %v2522_v63 = vmul.f32 %v3518_v59, %v2518_v54  ;;  %v2528_v58 = vadd.f32 %v2524_v55, %v2520_v3  ;;  %2531 = vst.msk [vmem:[#allocation3 + $0x7] sm:$0x1] %vm665_vm3, %v2527_v33 }
 0x8ce   :  { %v2529_v56 = vadd.f32 %v2525_v38, %v2521_v61 }
 0x8cf   :  { %v2530_v40 = vadd.f32 %v2526_v41, %v2522_v63  ;;  %2532 = vst.msk [vmem:[#allocation3 + $0xf] sm:$0x1] %vm665_vm3, %v2528_v58  ;;  %v2539_v37 = vrot.slane %v2528_v58, 7 }
 0x8d0   :  { %2533 = vst.msk [vmem:[#allocation3 + $0x17] sm:$0x1] %vm665_vm3, %v2529_v56  ;;  %v2541_v23 = vrot.slane %v2529_v56, 6 }
 0x8d1   :  { %2534 = vst.msk [vmem:[#allocation3 + $0x1f] sm:$0x1] %vm665_vm3, %v2530_v40  ;;  %v2540_v4 = vsel %vm683_vm4, %v2539_v37, %v2527_v33  ;;  %v2543_v62 = vrot.slane %v2530_v40, 5 }
 0x8d2   :  { %v2542_v17 = vsel %vm686_vm5, %v2541_v23, %v2540_v4 }
 0x8d3   :  { %v2544_v57 = vsel %vm689_vm6, %v2543_v62, %v2542_v17 }
 0x8d4   :  { %2547 = vst.msk [vmem:[#allocation2] sm:$0xf] %vm80_vm1, %v2544_v57  ;;  %2700 = vst.msk [vmem:[#allocation14] sm:$0xf] %vm80_vm1, %v2544_v57  ;;  %v2548_v5 = vld [vmem:[#allocation3] sm:$0xff] }
 0x8d6   :  { %v2549_v60 = vld [vmem:[#allocation3 + $0x8] sm:$0xff] }
 0x8d7   :  { %v2860_v7 = vpack.c.bf16 %v2549_v60, %v2548_v5  ;;  %v2550_v2 = vld [vmem:[#allocation3 + $0x10] sm:$0xff] }
 0x8d8   :  { %v2551_v8 = vld [vmem:[#allocation3 + $0x18] sm:$0xff] }
 0x8d9   :  { %3170 = vmatprep.mubr.msk.bf16.mxu1 %vm123_vm0, %v2860_v7  ;;  %v2861_v46 = vpack.c.bf16 %v2551_v8, %v2550_v2 }
 0x8db   :  { %3171 = vmatmul.mubr.msk.bf16.vlgmr.msra.gmra.mrb[52].mxu1 %vm123_vm0, %v2861_v46 }
 0x9ae   :  { %v3172_v25 = vpop.f32.mrb[52].mxu1 }
 0x9af   :  { %v2638_v26 = vadd.f32 %v3172_v25, %v2851_v15  ;;  %v2629_v9 = vpop.f32.mrb[53].mxu1 }
 0x9b0   :  { %v2630_v27 = vadd.f32 %v2851_v15, %v2629_v9  ;;  %v3173_v12 = vpop.f32.mrb[54].mxu1 }
 0x9b1   :  { %v2641_v14 = vadd.f32 %v3173_v12, %v2851_v15  ;;  %v2632_v19 = vpop.f32.mrb[55].mxu1  ;;  %v2651_v22 = vsel %vm2644_vm7, %v2638_v26, -inf }
 0x9b2   :  { %v2633_v13 = vadd.f32 %v2851_v15, %v2632_v19  ;;  %2652 = vmax.xlane.f32.xlu1 %v2651_v22  ;;  %v2645_v0 = vsel %vm2644_vm7, %v2630_v27, -inf }
 0x9b3   :  { %2646 = vmax.xlane.f32.xlu0 %v2645_v0  ;;  %v2654_v28 = vsel %vm2644_vm7, %v2641_v14, -inf }
 0x9b4   :  { %v2648_v11 = vsel %vm2644_vm7, %v2633_v13, -inf }
 0x9b6   :  { %2655 = vmax.xlane.f32.xlu1 %v2654_v28 }
 0x9b7   :  { %2649 = vmax.xlane.f32.xlu0 %v2648_v11 }
 0xa3f   :  { %v2653_v6 = vpop.xlane.xlu1 %2652 }
 0xa40   :  { %v4294_v18 = vsub.f32 %v2638_v26, %v2653_v6  ;;  %v2647_v1 = vpop.xlane.xlu0 %2646 }
 0xa41   :  { %v2657_v21 = vsub.f32 %v2630_v27, %v2647_v1 }
 0xa42   :  { %v2665_v29 = vmul.f32 1.442695, %v4294_v18 }
 0xa43   :  { %v2661_v16 = vmul.f32 1.442695, %v2657_v21  ;;  %v2656_v30 = vpop.xlane.xlu1 %2655 }
 0xa44   :  { %v4297_v31 = vsub.f32 %v2641_v14, %v2656_v30  ;;  %v2650_v51 = vpop.xlane.xlu0 %2649 }
 0xa45   :  { %3519 = vpow2.f32 %v2661_v16  ;;  %v2658_v32 = vsub.f32 %v2633_v13, %v2650_v51 }
 0xa46   :  { %3521 = vpow2.f32 %v2665_v29  ;;  %v2667_v34 = vmul.f32 1.442695, %v4297_v31 }
 0xa47   :  { %v2663_v20 = vmul.f32 1.442695, %v2658_v32 }
 0xa49   :  { %3523 = vpow2.f32 %v2663_v20 }
 0xa4a   :  { %3525 = vpow2.f32 %v2667_v34 }
 0xa4f   :  { %v3520_v35 = vpop.eup %3519 }
 0xa50   :  { %v2669_v36 = vsel %vm2644_vm7, %v3520_v35, 0.0  ;;  %v3522_v10 = vpop.eup %3521 }
 0xa51   :  { %2670 = vadd.xlane.f32.xlu0 %v2669_v36  ;;  %v2675_v42 = vsel %vm2644_vm7, %v3522_v10, 0.0 }
 0xa53   :  { %v3524_v39 = vpop.eup %3523 }
 0xa54   :  { %v2672_v24 = vsel %vm2644_vm7, %v3524_v39, 0.0  ;;  %v3526_v43 = vpop.eup %3525 }
 0xa55   :  { %2676 = vadd.xlane.f32.xlu0 %v2675_v42  ;;  %2673 = vadd.xlane.f32.xlu1 %v2672_v24  ;;  %v2678_v45 = vsel %vm2644_vm7, %v3526_v43, 0.0 }
 0xa59   :  { %2679 = vadd.xlane.f32.xlu1 %v2678_v45 }
 0xa5a   :  { %3623 = shalt.err (!%p3620_p0)
}
 0xa5b   :  { %s3624_s28 = scalar_lea.hbm %s4346_s9, 64 }
 0xa5c   :  { %p3625_p1 = scmp.ne.s32.totalorder %s4346_s9, %s3624_s28  ;;  %p3628_p2 = scmp.lt.u32.totalorder %s3624_s28, %s4346_s9 }
 0xa5e   :  { %p3630_p3 = pnand %p3628_p2, %p3625_p1 }
 0xa60   :  { %3633 = shalt.err (!%p3630_p3)
}
 0xa61   :  { %2722 = dma.vmem_to_hbm [thread:$0]  %s2720_s4, 64, %s4346_s9, [#allocation15]  }
 0xa62   :  { %s3674_s9 = smov [#allocation13]  }
 0xa63   :  { %s2706_s14 = sshll.u32 %s3674_s9, 4  ;;  %s2707_s14 = int_to_ptr.vmem [resolvable:$true] %s2706_s14 }
 0xa64   :  { %s3634_s15 = scalar_lea.vmem %s2707_s14, 512  ;;  %p3639_p5 = scmp.lt.s32.totalorder %s2707_s14, %s2707_s14 }
 0xa65   :  { %p3635_p4 = scmp.ne.s32.totalorder %s2707_s14, %s3634_s15  ;;  %p3640_p6 = scmp.lt.s32.totalorder %s3634_s15, %s3634_s15 }
 0xa67   :  { %p3641_p7 = por %p3640_p6, %p3639_p5 }
 0xa69   :  { %p3642_p8 = pnand %p3641_p7, %p3635_p4 }
 0xade   :  { %v2671_v49 = vpop.xlane.xlu0 %2670 }
 0xadf   :  { %3527 = vlog2.f32 %v2671_v49 }
 0xae2   :  { %v2674_v44 = vpop.xlane.xlu1 %2673  ;;  %v2677_v47 = vpop.xlane.xlu0 %2676 }
 0xae3   :  { %3529 = vlog2.f32 %v2674_v44 }
 0xae4   :  { %3531 = vlog2.f32 %v2677_v47 }
 0xae6   :  { %v2680_v50 = vpop.xlane.xlu1 %2679 }
 0xae7   :  { %3533 = vlog2.f32 %v2680_v50 }
 0xae9   :  { %v3528_v52 = vpop.eup %3527 }
 0xaea   :  { %v2682_v53 = vmul.f32 0.6931472, %v3528_v52 }
 0xaec   :  { %v2689_v48 = vsub.f32 %v2657_v21, %v2682_v53 }
 0xaed   :  { %v3530_v54 = vpop.eup %3529 }
 0xaee   :  { %v3532_v55 = vpop.eup %3531  ;;  %2693 = vst.msk [vmem:[#allocation13] sm:$0xff] %vm2644_vm7, %v2689_v48  ;;  %v2684_v3 = vmul.f32 0.6931472, %v3530_v54 }
 0xaef   :  { %v2686_v33 = vmul.f32 0.6931472, %v3532_v55 }
 0xaf0   :  { %v2690_v59 = vsub.f32 %v2658_v32, %v2684_v3 }
 0xaf1   :  { %v3534_v38 = vpop.eup %3533  ;;  %v2691_v61 = vsub.f32 %v4294_v18, %v2686_v33 }
 0xaf2   :  { %2694 = vst.msk [vmem:[#allocation13 + $0x8] sm:$0xff] %vm2644_vm7, %v2690_v59  ;;  %v2688_v41 = vmul.f32 0.6931472, %v3534_v38 }
 0xaf3   :  { %2695 = vst.msk [vmem:[#allocation13 + $0x10] sm:$0xff] %vm2644_vm7, %v2691_v61 }
 0xaf4   :  { %v2692_v63 = vsub.f32 %v4297_v31, %v2688_v41 }
 0xaf6   :  { %2696 = vst.msk [vmem:[#allocation13 + $0x18] sm:$0xff] %vm2644_vm7, %v2692_v63 }
 0xaf7   :  { %3645 = shalt.err (!%p3642_p8)
}
 0xaf8   :  { %s3646_s18 = scalar_lea.hbm %s4345_s8, 512 }
 0xaf9   :  { %p3647_p9 = scmp.ne.s32.totalorder %s4345_s8, %s3646_s18  ;;  %p3650_p10 = scmp.lt.u32.totalorder %s3646_s18, %s4345_s8 }
 0xafb   :  { %p3652_p11 = pnand %p3650_p10, %p3647_p9 }
 0xafd   :  { %3655 = shalt.err (!%p3652_p11)
}
 0xafe   :  { %2712 = dma.vmem_to_hbm [thread:$0]  %s2707_s14, 512, %s4345_s8, [#allocation9], %s3668_s2, %s3668_s2, %s3669_s10  }
 0xaff   :  { %3660 = dma.done.wait [#allocation9], 512  }
 0xb00   :  { %3661 = vsyncadd [#allocation9], 4294966784 }
 0xb01   :  { %3662 = dma.done.wait [#allocation15], 64  }
 0xb02   :  { %3663 = vsyncadd [#allocation15], 4294967232 }
 0xb03   :  { %2729 = vsyncpa [#allocation8], 1 }
 0xb04   :  { %2730 = vsyncpa [#allocation11], 1 }
 0xb05   :  { %2731 = vsyncpa [#allocation9], 1 }
 0xb06   :  { %2732 = vsyncpa [#allocation15], 1 }

</bundles_post_ra>
